<compile_context>
chip_gen: v7x
topology: tpu7x:2x2x1
jax: 0.10.0
libtpu: 0.0.40
codegen_flags: <defaults>
</compile_context>

<pallas_src>
import numpy as np
import jax
import jax.numpy as jnp
from jax.experimental import pallas as pl
from jax.experimental.pallas import tpu as pltpu


def _cdiv(a, b):
    return -(-a // b)


def _round_up(a, b):
    return _cdiv(a, b) * b


# ----------------------------- Pallas kernel --------------------------------
def make_kernel(num_layers: int, hidden_dim: int, seq_len: int,
                b_tile: int, c_cat: int, c_num: int, out_lanes_time: bool):
    H = hidden_dim
    H4 = 4 * H
    L = seq_len
    Bt = b_tile
    R = L * Bt                       # rows for the batched (non-recurrent) matmuls
    unroll = True if L <= 32 else 4  # full unroll short seqs, partial otherwise

    def kernel(cat_ref, num_ref,
               w_cat_ref, b_cat_ref, g_cat_ref, be_cat_ref,
               w_num_ref, b_num_ref, g_num_ref, be_num_ref,
               w_ih_ref, w_hh_ref, b_lstm_ref,
               w_p_ref, b_p_ref,
               out_ref,
               x_seq, xw_scr):
        store_dt = x_seq.dtype
        f32 = jnp.float32

        def linear_ln(x, w_ref, b_ref, g_ref, be_ref):
            # matmul in storage dtype, f32 accumulate; LayerNorm stats in f32.
            y = jnp.dot(x, w_ref[...], preferred_element_type=f32) + b_ref[...].astype(f32)
            mu = jnp.mean(y, axis=-1, keepdims=True)
            var = jnp.mean(jnp.square(y - mu), axis=-1, keepdims=True)
            y = (y - mu) * jax.lax.rsqrt(var + 1e-6)
            return y * g_ref[...].astype(f32) + be_ref[...].astype(f32)

        # ---- non-recurrent front-end, batched over all L*Bt rows ----
        cat_e = linear_ln(cat_ref[...].reshape(R, c_cat),
                          w_cat_ref, b_cat_ref, g_cat_ref, be_cat_ref)   # (R, H/2)
        num_e = linear_ln(num_ref[...].reshape(R, c_num),
                          w_num_ref, b_num_ref, g_num_ref, be_num_ref)   # (R, H/2)
        # nn.Dropout is the identity in eval mode.
        x_seq[...] = jnp.concatenate([cat_e, num_e],
                                     axis=-1).astype(store_dt).reshape(L, Bt, H)

        # ---- stacked LSTM: only the h/c recurrence stays serial ----
        for l in range(num_layers):
            # Fused input->gate projection for ALL timesteps of this layer.
            xf = x_seq[...].reshape(R, H)
            xw = (jnp.dot(xf, w_ih_ref[l], preferred_element_type=f32)
                  + b_lstm_ref[l].astype(f32))                            # (R, 4H)
            xw_scr[...] = xw.astype(store_dt).reshape(L, Bt, H4)

            whh = w_hh_ref[l]  # (H, 4H) held across the whole layer

            def step(t, carry):
                h, c = carry                                              # f32 (Bt, H)
                gates = (xw_scr[t].astype(f32)
                         + jnp.dot(h.astype(store_dt), whh,
                                   preferred_element_type=f32))           # (Bt, 4H)
                i_g = jax.nn.sigmoid(gates[:, 0 * H:1 * H])
                f_g = jax.nn.sigmoid(gates[:, 1 * H:2 * H])
                g_g = jnp.tanh(gates[:, 2 * H:3 * H])
                o_g = jax.nn.sigmoid(gates[:, 3 * H:4 * H])
                c_new = f_g * c + i_g * g_g
                h_new = o_g * jnp.tanh(c_new)
                # Overwrite this layer's input with its output; the input
                # contribution was already captured in xw_scr.
                x_seq[t] = h_new.astype(store_dt)
                return h_new, c_new

            h0 = jnp.zeros((Bt, H), f32)
            c0 = jnp.zeros((Bt, H), f32)
            jax.lax.fori_loop(0, L, step, (h0, c0), unroll=unroll)
            # TODO(synk): nn.LSTM inter-layer dropout (training only) omitted.

        # ---- predict head: sigmoid(h @ w_p + b_p), batched over all steps ----
        h_all = x_seq[...].astype(f32)
        logits = jnp.sum(h_all * w_p_ref[...].astype(f32), axis=-1) \
            + b_p_ref[...].astype(f32)                                    # (L, Bt)
        probs = jax.nn.sigmoid(logits)
        if out_lanes_time:
            out_ref[0] = jnp.transpose(probs)                             # (Bt, L)
        else:
            out_ref[0] = probs                                            # (L, Bt)

    return kernel


# ------------------------------- wrapper -------------------------------------
def lstm_pallas_forward(params, past_answerCode, now_cat, now_num,
                        cat_cols, num_layers, hidden_dim,
                        storage_dtype=jnp.float32, b_tile_max=None):
    H = hidden_dim
    B, L = past_answerCode.shape
    sd = np.dtype(storage_dtype)

    # Device-aware defaults: 64-MiB-VMEM parts (v7x-class) get a smaller tile.
    try:
        vmem_cap = int(pltpu.get_tpu_info().vmem_capacity_bytes)
    except Exception:
        vmem_cap = 128 * 1024 * 1024
    if b_tile_max is None:
        b_tile_max = 64 if vmem_cap <= 64 * 1024 * 1024 else 128

    # Embedding gathers with TIME-MAJOR indices (transpose tiny index arrays,
    # not the gathered activation tensor).
    pa_tm = past_answerCode.T                               # (L, B)
    cat_idx_tm = jnp.transpose(now_cat, (1, 0, 2))          # (L, B, n_cat)
    emb_list = [jnp.take(params["answerCode_emb"], pa_tm, axis=0)]
    for idx, col in enumerate(cat_cols):
        emb_list.append(jnp.take(params["emb"][col], cat_idx_tm[:, :, idx], axis=0))
    cat_tm = jnp.concatenate(emb_list, axis=-1).astype(sd)  # (L, B, C_cat)
    num_tm = jnp.transpose(now_num, (1, 0, 2)).astype(sd)   # (L, B, C_num)
    C_cat = cat_tm.shape[-1]
    C_num = num_tm.shape[-1]

    # Batch tiling: pad to the sublane multiple of the storage dtype; prefer
    # >=2 tiles so the "parallel" grid axis can land on both v7x TensorCores.
    sub = 16 if sd.itemsize < 4 else 8
    b_min = _round_up(B, sub)
    b_tile = min(b_tile_max, b_min)
    if _cdiv(b_min, b_tile) == 1 and b_min >= 2 * sub:
        b_tile = _round_up(_cdiv(b_min, 2), sub)
    nb = _cdiv(b_min, b_tile)
    b_pad = nb * b_tile
    if b_pad != B:
        cat_tm = jnp.pad(cat_tm, ((0, 0), (0, b_pad - B), (0, 0)))
        num_tm = jnp.pad(num_tm, ((0, 0), (0, b_pad - B), (0, 0)))

    weights = (params["w_cat"], params["b_cat"], params["g_cat"], params["be_cat"],
               params["w_num"], params["b_num"], params["g_num"], params["be_num"],
               params["w_ih"], params["w_hh"], params["b_lstm"],
               params["w_p"].T, params["b_p"])
    weights = tuple(jnp.asarray(w, sd) for w in weights)

    # Lane-dense output: put whichever of (L, b_tile) is the better lane dim last.
    out_lanes_time = L > b_tile

    # VMEM budget computed from the actual footprint, not hard-coded.
    isz = sd.itemsize
    scratch_bytes = L * b_tile * H * isz + L * b_tile * 4 * H * isz
    io_bytes = 2 * L * b_tile * (C_cat + C_num) * isz + 2 * L * b_tile * 4
    wgt_bytes = 2 * sum(int(w.size) * w.dtype.itemsize for w in weights)
    vmem_limit = max(32 * 1024 * 1024,
                     int((scratch_bytes + io_bytes + wgt_bytes) * 1.25))
    vmem_limit = min(vmem_limit, (vmem_cap * 3) // 4)

    def full_spec(arr):
        zeros = (0,) * arr.ndim
        return pl.BlockSpec(arr.shape, lambda b, _z=zeros: _z)

    in_specs = [
        pl.BlockSpec((L, b_tile, C_cat), lambda b: (0, b, 0)),
        pl.BlockSpec((L, b_tile, C_num), lambda b: (0, b, 0)),
    ] + [full_spec(w) for w in weights]

    if out_lanes_time:
        out_shape = jax.ShapeDtypeStruct((nb, b_tile, L), jnp.float32)
        out_spec = pl.BlockSpec((1, b_tile, L), lambda b: (b, 0, 0))
    else:
        out_shape = jax.ShapeDtypeStruct((nb, L, b_tile), jnp.float32)
        out_spec = pl.BlockSpec((1, L, b_tile), lambda b: (b, 0, 0))

    out = pl.pallas_call(
        make_kernel(num_layers, H, L, b_tile, C_cat, C_num, out_lanes_time),
        out_shape=out_shape,
        grid_spec=pltpu.PrefetchScalarGridSpec(
            num_scalar_prefetch=0,
            grid=(nb,),                                    # batch tiles only
            in_specs=in_specs,
            out_specs=out_spec,
            scratch_shapes=[pltpu.VMEM((L, b_tile, H), sd),       # x / h sequence
                            pltpu.VMEM((L, b_tile, 4 * H), sd)],  # x@W_ih + b
        ),
        compiler_params=pltpu.CompilerParams(
            dimension_semantics=("parallel",),             # batch tiles independent
            vmem_limit_bytes=vmem_limit,
        ),
    )(cat_tm, num_tm, *weights)

    # -> (B, L), matching output.squeeze(2) of the PyTorch module.
    if out_lanes_time:
        out_bl = out.reshape(nb * b_tile, L)[:B]
    else:
        out_bl = jnp.transpose(out, (0, 2, 1)).reshape(nb * b_tile, L)[:B]
    return out_bl


# -------------------------- pure-JAX reference -------------------------------
def lstm_reference_forward(params, past_answerCode, now_cat, now_num,
                           cat_cols, num_layers, hidden_dim):
    H = hidden_dim
    cat_emb_list = [jnp.take(params["answerCode_emb"], past_answerCode, axis=0)]
    for idx, col in enumerate(cat_cols):
        cat_emb_list.append(
            jnp.take(params["emb"][col], now_cat[:, :, idx], axis=0))
    cat_concat = jnp.concatenate(cat_emb_list, axis=-1)

    def linear_ln(x, w, b, g, be):
        y = x @ w + b
        mu = y.mean(-1, keepdims=True)
        var = ((y - mu) ** 2).mean(-1, keepdims=True)
        return (y - mu) / jnp.sqrt(var + 1e-6) * g + be

    cat_e = linear_ln(cat_concat, params["w_cat"], params["b_cat"],
                      params["g_cat"], params["be_cat"])
    num_e = linear_ln(now_num.astype(jnp.float32), params["w_num"],
                      params["b_num"], params["g_num"], params["be_num"])
    x = jnp.concatenate([cat_e, num_e], axis=-1)            # [B, L, H]
    B, L, _ = x.shape

    for l in range(num_layers):
        h = jnp.zeros((B, H), jnp.float32)
        c = jnp.zeros((B, H), jnp.float32)
        outs = []
        for t in range(L):
            gates = x[:, t] @ params["w_ih"][l] + h @ params["w_hh"][l] \
                + params["b_lstm"][l, 0]
            i_g = jax.nn.sigmoid(gates[:, 0 * H:1 * H])
            f_g = jax.nn.sigmoid(gates[:, 1 * H:2 * H])
            g_g = jnp.tanh(gates[:, 2 * H:3 * H])
            o_g = jax.nn.sigmoid(gates[:, 3 * H:4 * H])
            c = f_g * c + i_g * g_g
            h = o_g * jnp.tanh(c)
            outs.append(h)
        x = jnp.stack(outs, axis=1)

    pred = jax.nn.sigmoid(x @ params["w_p"] + params["b_p"])
    return pred[:, :, 0]


# ------------------------------- main ----------------------------------------
if __name__ == "__main__":
    # Small deterministic config (stands in for `bargs`).
    B, L = 2, 8
    E = 8                 # embedding_size
    H = 32                # hidden_dim
    H2 = H // 2
    NUM_LAYERS = 2
    CAT_COLS = ["assessmentItemID2idx", "testId2idx", "KnowledgeTag2idx"]
    NUM_COLS = ["n0", "n1", "n2", "n3"]
    VOCAB = {"assessmentItemID2idx": 10, "testId2idx": 5, "KnowledgeTag2idx": 7}
    C_CAT = (len(CAT_COLS) + 1) * E
    C_NUM = len(NUM_COLS)

    key = jax.random.PRNGKey(0)

    def nrm(k, shape, scale=0.1):
        return scale * jax.random.normal(k, shape, jnp.float32)

    keys = iter(jax.random.split(key, 64))
    params = {"emb": {}}
    for col in CAT_COLS:
        tbl = nrm(next(keys), (VOCAB[col] + 1, E))
        params["emb"][col] = tbl.at[0].set(0.0)               # padding_idx=0
    params["answerCode_emb"] = nrm(next(keys), (3, E)).at[0].set(0.0)

    params["w_cat"] = nrm(next(keys), (C_CAT, H2))
    params["b_cat"] = nrm(next(keys), (1, H2))
    params["g_cat"] = jnp.ones((1, H2), jnp.float32)          # LayerNorm weight
    params["be_cat"] = jnp.zeros((1, H2), jnp.float32)        # LayerNorm bias
    params["w_num"] = nrm(next(keys), (C_NUM, H2))
    params["b_num"] = nrm(next(keys), (1, H2))
    params["g_num"] = jnp.ones((1, H2), jnp.float32)
    params["be_num"] = jnp.zeros((1, H2), jnp.float32)

    params["w_ih"] = nrm(next(keys), (NUM_LAYERS, H, 4 * H))
    params["w_hh"] = nrm(next(keys), (NUM_LAYERS, H, 4 * H))
    # combined bias: b_ih + b_hh
    params["b_lstm"] = nrm(next(keys), (NUM_LAYERS, 1, 4 * H))

    params["w_p"] = nrm(next(keys), (H, 1))
    params["b_p"] = nrm(next(keys), (1, 1))

    # Deterministic inputs.
    k1, k2, k3 = jax.random.split(next(keys), 3)
    past_answerCode = jax.random.randint(k1, (B, L), 0, 3)
    now_cat = jnp.stack(
        [jax.random.randint(jax.random.fold_in(k2, i), (B, L), 0,
                            VOCAB[col] + 1)
         for i, col in enumerate(CAT_COLS)], axis=-1)          # [B, L, n_cat]
    now_num = jax.random.normal(k3, (B, L, C_NUM), jnp.float32)

    ref = lstm_reference_forward(params, past_answerCode, now_cat, now_num,
                                 CAT_COLS, NUM_LAYERS, H)

    # f32 storage: exact-parity check against the reference.
    out_f32 = lstm_pallas_forward(params, past_answerCode, now_cat, now_num,
                                  CAT_COLS, NUM_LAYERS, H,
                                  storage_dtype=jnp.float32)
    out_f32 = jax.block_until_ready(out_f32)
    assert out_f32.shape == (B, L), out_f32.shape
    assert jnp.allclose(out_f32, ref, rtol=1e-3, atol=1e-3), \
        f"f32 max abs err {jnp.max(jnp.abs(out_f32 - ref))}"

    # bf16 storage (f32 accumulation, f32 h/c carry): looser tolerance.
    out_bf16 = lstm_pallas_forward(params, past_answerCode, now_cat, now_num,
                                   CAT_COLS, NUM_LAYERS, H,
                                   storage_dtype=jnp.bfloat16)
    out_bf16 = jax.block_until_ready(out_bf16)
    assert out_bf16.shape == (B, L), out_bf16.shape
    assert jnp.allclose(out_bf16, ref, rtol=3e-2, atol=3e-2), \
        f"bf16 max abs err {jnp.max(jnp.abs(out_bf16 - ref))}"

    print("KERNEL_OK")
</pallas_src>

<mosaic_0001>
module attributes {stable_mosaic.version = 11 : i64} {
  func.func @kernel(%arg0: i32, %arg1: memref<8x8x32xf32, #tpu.memory_space<vmem>>, %arg2: memref<8x8x4xf32, #tpu.memory_space<vmem>>, %arg3: memref<32x16xf32, #tpu.memory_space<vmem>>, %arg4: memref<1x16xf32, #tpu.memory_space<vmem>>, %arg5: memref<1x16xf32, #tpu.memory_space<vmem>>, %arg6: memref<1x16xf32, #tpu.memory_space<vmem>>, %arg7: memref<4x16xf32, #tpu.memory_space<vmem>>, %arg8: memref<1x16xf32, #tpu.memory_space<vmem>>, %arg9: memref<1x16xf32, #tpu.memory_space<vmem>>, %arg10: memref<1x16xf32, #tpu.memory_space<vmem>>, %arg11: memref<2x32x128xf32, #tpu.memory_space<vmem>>, %arg12: memref<2x32x128xf32, #tpu.memory_space<vmem>>, %arg13: memref<2x1x128xf32, #tpu.memory_space<vmem>>, %arg14: memref<1x32xf32, #tpu.memory_space<vmem>>, %arg15: memref<1x1xf32, #tpu.memory_space<vmem>>, %arg16: memref<1x8x8xf32, #tpu.memory_space<vmem>>, %arg17: memref<8x8x32xf32, #tpu.memory_space<vmem>>, %arg18: memref<8x8x128xf32, #tpu.memory_space<vmem>>) attributes {dimension_semantics = [#tpu.dimension_semantics<parallel>], iteration_bounds = array<i64: 1>, scalar_prefetch = 0 : i64, scratch_operands = 2 : i64, tpu.core_type = #tpu.core_type<tc>, window_params = [{transform_indices = @transform_0, window_bounds = array<i64: 8, 8, 32>}, {transform_indices = @transform_1, window_bounds = array<i64: 8, 8, 4>}, {pipeline_mode = #tpu.pipeline_mode<synchronous>, transform_indices = @transform_2, window_bounds = array<i64: 32, 16>}, {pipeline_mode = #tpu.pipeline_mode<synchronous>, transform_indices = @transform_3, window_bounds = array<i64: 1, 16>}, {pipeline_mode = #tpu.pipeline_mode<synchronous>, transform_indices = @transform_4, window_bounds = array<i64: 1, 16>}, {pipeline_mode = #tpu.pipeline_mode<synchronous>, transform_indices = @transform_5, window_bounds = array<i64: 1, 16>}, {pipeline_mode = #tpu.pipeline_mode<synchronous>, transform_indices = @transform_6, window_bounds = array<i64: 4, 16>}, {pipeline_mode = #tpu.pipeline_mode<synchronous>, transform_indices = @transform_7, window_bounds = array<i64: 1, 16>}, {pipeline_mode = #tpu.pipeline_mode<synchronous>, transform_indices = @transform_8, window_bounds = array<i64: 1, 16>}, {pipeline_mode = #tpu.pipeline_mode<synchronous>, transform_indices = @transform_9, window_bounds = array<i64: 1, 16>}, {pipeline_mode = #tpu.pipeline_mode<synchronous>, transform_indices = @transform_10, window_bounds = array<i64: 2, 32, 128>}, {pipeline_mode = #tpu.pipeline_mode<synchronous>, transform_indices = @transform_11, window_bounds = array<i64: 2, 32, 128>}, {pipeline_mode = #tpu.pipeline_mode<synchronous>, transform_indices = @transform_12, window_bounds = array<i64: 2, 1, 128>}, {pipeline_mode = #tpu.pipeline_mode<synchronous>, transform_indices = @transform_13, window_bounds = array<i64: 1, 32>}, {pipeline_mode = #tpu.pipeline_mode<synchronous>, transform_indices = @transform_14, window_bounds = array<i64: 1, 1>}, {transform_indices = @transform_15, window_bounds = array<i64: 1, 8, 8>}]} {
    %c0 = arith.constant 0 : index
    %c0_0 = arith.constant 0 : index
    %c0_1 = arith.constant 0 : index
    %0 = vector.load %arg1[%c0, %c0_0, %c0_1] : memref<8x8x32xf32, #tpu.memory_space<vmem>>, vector<8x8x32xf32>
    %1 = vector.shape_cast %0 : vector<8x8x32xf32> to vector<64x32xf32>
    %c0_2 = arith.constant 0 : index
    %c0_3 = arith.constant 0 : index
    %2 = vector.load %arg3[%c0_2, %c0_3] : memref<32x16xf32, #tpu.memory_space<vmem>>, vector<32x16xf32>
    %cst = arith.constant dense<0.000000e+00> : vector<64x16xf32>
    %3 = tpu.matmul %1, %2, %cst {dimension_numbers = #tpu.dot_dimension_numbers<[1], [0], [0], [1], [0, 0, 1, 1], [], []>} : vector<64x32xf32>, vector<32x16xf32>, vector<64x16xf32> -> vector<64x16xf32>
    %c0_4 = arith.constant 0 : index
    %c0_5 = arith.constant 0 : index
    %4 = vector.load %arg4[%c0_4, %c0_5] : memref<1x16xf32, #tpu.memory_space<vmem>>, vector<1x16xf32>
    %5 = vector.broadcast %4 : vector<1x16xf32> to vector<64x16xf32>
    %6 = arith.addf %3, %5 : vector<64x16xf32>
    %cst_6 = arith.constant dense<0.000000e+00> : vector<64xf32>
    %7 = vector.multi_reduction <add>, %6, %cst_6 [1] : vector<64x16xf32> to vector<64xf32>
    %8 = vector.shape_cast %7 : vector<64xf32> to vector<64x1xf32>
    %cst_7 = arith.constant 1.600000e+01 : f32
    %9 = vector.broadcast %cst_7 : f32 to vector<64x1xf32>
    %10 = arith.divf %8, %9 : vector<64x1xf32>
    %11 = vector.broadcast %10 : vector<64x1xf32> to vector<64x16xf32>
    %12 = arith.subf %6, %11 : vector<64x16xf32>
    %13 = arith.mulf %12, %12 : vector<64x16xf32>
    %cst_8 = arith.constant dense<0.000000e+00> : vector<64xf32>
    %14 = vector.multi_reduction <add>, %13, %cst_8 [1] : vector<64x16xf32> to vector<64xf32>
    %15 = vector.shape_cast %14 : vector<64xf32> to vector<64x1xf32>
    %cst_9 = arith.constant 1.600000e+01 : f32
    %16 = vector.broadcast %cst_9 : f32 to vector<64x1xf32>
    %17 = arith.divf %15, %16 : vector<64x1xf32>
    %18 = vector.broadcast %10 : vector<64x1xf32> to vector<64x16xf32>
    %19 = arith.subf %6, %18 : vector<64x16xf32>
    %cst_10 = arith.constant 9.99999997E-7 : f32
    %20 = vector.broadcast %cst_10 : f32 to vector<64x1xf32>
    %21 = arith.addf %17, %20 : vector<64x1xf32>
    %22 = math.rsqrt %21 : vector<64x1xf32>
    %23 = vector.broadcast %22 : vector<64x1xf32> to vector<64x16xf32>
    %24 = arith.mulf %19, %23 : vector<64x16xf32>
    %c0_11 = arith.constant 0 : index
    %c0_12 = arith.constant 0 : index
    %25 = vector.load %arg5[%c0_11, %c0_12] : memref<1x16xf32, #tpu.memory_space<vmem>>, vector<1x16xf32>
    %26 = vector.broadcast %25 : vector<1x16xf32> to vector<64x16xf32>
    %27 = arith.mulf %24, %26 : vector<64x16xf32>
    %c0_13 = arith.constant 0 : index
    %c0_14 = arith.constant 0 : index
    %28 = vector.load %arg6[%c0_13, %c0_14] : memref<1x16xf32, #tpu.memory_space<vmem>>, vector<1x16xf32>
    %29 = vector.broadcast %28 : vector<1x16xf32> to vector<64x16xf32>
    %30 = arith.addf %27, %29 : vector<64x16xf32>
    %c0_15 = arith.constant 0 : index
    %c0_16 = arith.constant 0 : index
    %c0_17 = arith.constant 0 : index
    %31 = vector.load %arg2[%c0_15, %c0_16, %c0_17] : memref<8x8x4xf32, #tpu.memory_space<vmem>>, vector<8x8x4xf32>
    %32 = vector.shape_cast %31 : vector<8x8x4xf32> to vector<64x4xf32>
    %c0_18 = arith.constant 0 : index
    %c0_19 = arith.constant 0 : index
    %33 = vector.load %arg7[%c0_18, %c0_19] : memref<4x16xf32, #tpu.memory_space<vmem>>, vector<4x16xf32>
    %cst_20 = arith.constant dense<0.000000e+00> : vector<64x16xf32>
    %34 = tpu.matmul %32, %33, %cst_20 {dimension_numbers = #tpu.dot_dimension_numbers<[1], [0], [0], [1], [0, 0, 1, 1], [], []>} : vector<64x4xf32>, vector<4x16xf32>, vector<64x16xf32> -> vector<64x16xf32>
    %c0_21 = arith.constant 0 : index
    %c0_22 = arith.constant 0 : index
    %35 = vector.load %arg8[%c0_21, %c0_22] : memref<1x16xf32, #tpu.memory_space<vmem>>, vector<1x16xf32>
    %36 = vector.broadcast %35 : vector<1x16xf32> to vector<64x16xf32>
    %37 = arith.addf %34, %36 : vector<64x16xf32>
    %cst_23 = arith.constant dense<0.000000e+00> : vector<64xf32>
    %38 = vector.multi_reduction <add>, %37, %cst_23 [1] : vector<64x16xf32> to vector<64xf32>
    %39 = vector.shape_cast %38 : vector<64xf32> to vector<64x1xf32>
    %cst_24 = arith.constant 1.600000e+01 : f32
    %40 = vector.broadcast %cst_24 : f32 to vector<64x1xf32>
    %41 = arith.divf %39, %40 : vector<64x1xf32>
    %42 = vector.broadcast %41 : vector<64x1xf32> to vector<64x16xf32>
    %43 = arith.subf %37, %42 : vector<64x16xf32>
    %44 = arith.mulf %43, %43 : vector<64x16xf32>
    %cst_25 = arith.constant dense<0.000000e+00> : vector<64xf32>
    %45 = vector.multi_reduction <add>, %44, %cst_25 [1] : vector<64x16xf32> to vector<64xf32>
    %46 = vector.shape_cast %45 : vector<64xf32> to vector<64x1xf32>
    %cst_26 = arith.constant 1.600000e+01 : f32
    %47 = vector.broadcast %cst_26 : f32 to vector<64x1xf32>
    %48 = arith.divf %46, %47 : vector<64x1xf32>
    %49 = vector.broadcast %41 : vector<64x1xf32> to vector<64x16xf32>
    %50 = arith.subf %37, %49 : vector<64x16xf32>
    %cst_27 = arith.constant 9.99999997E-7 : f32
    %51 = vector.broadcast %cst_27 : f32 to vector<64x1xf32>
    %52 = arith.addf %48, %51 : vector<64x1xf32>
    %53 = math.rsqrt %52 : vector<64x1xf32>
    %54 = vector.broadcast %53 : vector<64x1xf32> to vector<64x16xf32>
    %55 = arith.mulf %50, %54 : vector<64x16xf32>
    %c0_28 = arith.constant 0 : index
    %c0_29 = arith.constant 0 : index
    %56 = vector.load %arg9[%c0_28, %c0_29] : memref<1x16xf32, #tpu.memory_space<vmem>>, vector<1x16xf32>
    %57 = vector.broadcast %56 : vector<1x16xf32> to vector<64x16xf32>
    %58 = arith.mulf %55, %57 : vector<64x16xf32>
    %c0_30 = arith.constant 0 : index
    %c0_31 = arith.constant 0 : index
    %59 = vector.load %arg10[%c0_30, %c0_31] : memref<1x16xf32, #tpu.memory_space<vmem>>, vector<1x16xf32>
    %60 = vector.broadcast %59 : vector<1x16xf32> to vector<64x16xf32>
    %61 = arith.addf %58, %60 : vector<64x16xf32>
    %62 = tpu.concatenate %30, %61 in 1 : vector<64x16xf32>, vector<64x16xf32> -> vector<64x32xf32>
    %63 = vector.shape_cast %62 : vector<64x32xf32> to vector<8x8x32xf32>
    %c0_32 = arith.constant 0 : index
    %c0_33 = arith.constant 0 : index
    %c0_34 = arith.constant 0 : index
    %64 = vector.load %arg17[%c0_32, %c0_33, %c0_34] : memref<8x8x32xf32, #tpu.memory_space<vmem>>, vector<8x8x32xf32>
    tpu.vector_store %arg17[%c0_32, %c0_33, %c0_34], %63 {strides = array<i32>} : memref<8x8x32xf32, #tpu.memory_space<vmem>>, vector<8x8x32xf32>,
    %c0_35 = arith.constant 0 : index
    %c0_36 = arith.constant 0 : index
    %c0_37 = arith.constant 0 : index
    %65 = vector.load %arg17[%c0_35, %c0_36, %c0_37] : memref<8x8x32xf32, #tpu.memory_space<vmem>>, vector<8x8x32xf32>
    %66 = vector.shape_cast %65 : vector<8x8x32xf32> to vector<64x32xf32>
    %c0_38 = arith.constant 0 : index
    %c0_39 = arith.constant 0 : index
    %c0_40 = arith.constant 0 : index
    %67 = vector.load %arg11[%c0_38, %c0_39, %c0_40] : memref<2x32x128xf32, #tpu.memory_space<vmem>>, vector<1x32x128xf32>
    %68 = vector.shape_cast %67 : vector<1x32x128xf32> to vector<32x128xf32>
    %cst_41 = arith.constant dense<0.000000e+00> : vector<64x128xf32>
    %69 = tpu.matmul %66, %68, %cst_41 {dimension_numbers = #tpu.dot_dimension_numbers<[1], [0], [0], [1], [0, 0, 1, 1], [], []>} : vector<64x32xf32>, vector<32x128xf32>, vector<64x128xf32> -> vector<64x128xf32>
    %c0_42 = arith.constant 0 : index
    %c0_43 = arith.constant 0 : index
    %c0_44 = arith.constant 0 : index
    %70 = vector.load %arg13[%c0_42, %c0_43, %c0_44] : memref<2x1x128xf32, #tpu.memory_space<vmem>>, vector<1x1x128xf32>
    %71 = vector.shape_cast %70 : vector<1x1x128xf32> to vector<1x128xf32>
    %72 = vector.broadcast %71 : vector<1x128xf32> to vector<64x128xf32>
    %73 = arith.addf %69, %72 : vector<64x128xf32>
    %74 = vector.shape_cast %73 : vector<64x128xf32> to vector<8x8x128xf32>
    %c0_45 = arith.constant 0 : index
    %c0_46 = arith.constant 0 : index
    %c0_47 = arith.constant 0 : index
    %75 = vector.load %arg18[%c0_45, %c0_46, %c0_47] : memref<8x8x128xf32, #tpu.memory_space<vmem>>, vector<8x8x128xf32>
    tpu.vector_store %arg18[%c0_45, %c0_46, %c0_47], %74 {strides = array<i32>} : memref<8x8x128xf32, #tpu.memory_space<vmem>>, vector<8x8x128xf32>,
    %c0_48 = arith.constant 0 : index
    %c0_49 = arith.constant 0 : index
    %c0_50 = arith.constant 0 : index
    %76 = vector.load %arg12[%c0_48, %c0_49, %c0_50] : memref<2x32x128xf32, #tpu.memory_space<vmem>>, vector<1x32x128xf32>
    %77 = vector.shape_cast %76 : vector<1x32x128xf32> to vector<32x128xf32>
    %cst_51 = arith.constant 0.000000e+00 : f32
    %78 = vector.broadcast %cst_51 : f32 to vector<8x32xf32>
    %cst_52 = arith.constant 0.000000e+00 : f32
    %79 = vector.broadcast %cst_52 : f32 to vector<8x32xf32>
    %c0_i32 = arith.constant 0 : i32
    %80 = arith.index_cast %c0_i32 : i32 to index
    %c0_53 = arith.constant 0 : index
    %c0_54 = arith.constant 0 : index
    %81 = vector.load %arg18[%80, %c0_53, %c0_54] : memref<8x8x128xf32, #tpu.memory_space<vmem>>, vector<1x8x128xf32>
    %82 = vector.shape_cast %81 : vector<1x8x128xf32> to vector<8x128xf32>
    %cst_55 = arith.constant dense<0.000000e+00> : vector<8x128xf32>
    %83 = tpu.matmul %78, %77, %cst_55 {dimension_numbers = #tpu.dot_dimension_numbers<[1], [0], [0], [1], [0, 0, 1, 1], [], []>} : vector<8x32xf32>, vector<32x128xf32>, vector<8x128xf32> -> vector<8x128xf32>
    %84 = arith.addf %82, %83 : vector<8x128xf32>
    %85 = vector.extract_strided_slice %84 {offsets = [0, 0], sizes = [8, 32], strides = [1, 1]} : vector<8x128xf32> to vector<8x32xf32>
    %86 = arith.negf %85 : vector<8x32xf32>
    %87 = math.exp %86 : vector<8x32xf32>
    %cst_56 = arith.constant 1.000000e+00 : f32
    %88 = vector.broadcast %cst_56 : f32 to vector<8x32xf32>
    %89 = arith.addf %88, %87 : vector<8x32xf32>
    %90 = arith.divf %88, %89 : vector<8x32xf32>
    %91 = vector.extract_strided_slice %84 {offsets = [0, 32], sizes = [8, 32], strides = [1, 1]} : vector<8x128xf32> to vector<8x32xf32>
    %92 = arith.negf %91 : vector<8x32xf32>
    %93 = math.exp %92 : vector<8x32xf32>
    %cst_57 = arith.constant 1.000000e+00 : f32
    %94 = vector.broadcast %cst_57 : f32 to vector<8x32xf32>
    %95 = arith.addf %94, %93 : vector<8x32xf32>
    %96 = arith.divf %94, %95 : vector<8x32xf32>
    %97 = vector.extract_strided_slice %84 {offsets = [0, 64], sizes = [8, 32], strides = [1, 1]} : vector<8x128xf32> to vector<8x32xf32>
    %98 = math.tanh %97 : vector<8x32xf32>
    %99 = vector.extract_strided_slice %84 {offsets = [0, 96], sizes = [8, 32], strides = [1, 1]} : vector<8x128xf32> to vector<8x32xf32>
    %100 = arith.negf %99 : vector<8x32xf32>
    %101 = math.exp %100 : vector<8x32xf32>
    %cst_58 = arith.constant 1.000000e+00 : f32
    %102 = vector.broadcast %cst_58 : f32 to vector<8x32xf32>
    %103 = arith.addf %102, %101 : vector<8x32xf32>
    %104 = arith.divf %102, %103 : vector<8x32xf32>
    %105 = arith.mulf %96, %79 : vector<8x32xf32>
    %106 = arith.mulf %90, %98 : vector<8x32xf32>
    %107 = arith.addf %105, %106 : vector<8x32xf32>
    %108 = math.tanh %107 : vector<8x32xf32>
    %109 = arith.mulf %104, %108 : vector<8x32xf32>
    %110 = arith.index_cast %c0_i32 : i32 to index
    %c0_59 = arith.constant 0 : index
    %c0_60 = arith.constant 0 : index
    %111 = vector.load %arg17[%110, %c0_59, %c0_60] : memref<8x8x32xf32, #tpu.memory_space<vmem>>, vector<1x8x32xf32>
    %112 = vector.shape_cast %111 : vector<1x8x32xf32> to vector<8x32xf32>
    %113 = vector.shape_cast %109 : vector<8x32xf32> to vector<1x8x32xf32>
    tpu.vector_store %arg17[%110, %c0_59, %c0_60], %113 {strides = array<i32>} : memref<8x8x32xf32, #tpu.memory_space<vmem>>, vector<1x8x32xf32>,
    %c1_i32 = arith.constant 1 : i32
    %114 = arith.index_cast %c1_i32 : i32 to index
    %c0_61 = arith.constant 0 : index
    %c0_62 = arith.constant 0 : index
    %115 = vector.load %arg18[%114, %c0_61, %c0_62] : memref<8x8x128xf32, #tpu.memory_space<vmem>>, vector<1x8x128xf32>
    %116 = vector.shape_cast %115 : vector<1x8x128xf32> to vector<8x128xf32>
    %cst_63 = arith.constant dense<0.000000e+00> : vector<8x128xf32>
    %117 = tpu.matmul %109, %77, %cst_63 {dimension_numbers = #tpu.dot_dimension_numbers<[1], [0], [0], [1], [0, 0, 1, 1], [], []>} : vector<8x32xf32>, vector<32x128xf32>, vector<8x128xf32> -> vector<8x128xf32>
    %118 = arith.addf %116, %117 : vector<8x128xf32>
    %119 = vector.extract_strided_slice %118 {offsets = [0, 0], sizes = [8, 32], strides = [1, 1]} : vector<8x128xf32> to vector<8x32xf32>
    %120 = arith.negf %119 : vector<8x32xf32>
    %121 = math.exp %120 : vector<8x32xf32>
    %cst_64 = arith.constant 1.000000e+00 : f32
    %122 = vector.broadcast %cst_64 : f32 to vector<8x32xf32>
    %123 = arith.addf %122, %121 : vector<8x32xf32>
    %124 = arith.divf %122, %123 : vector<8x32xf32>
    %125 = vector.extract_strided_slice %118 {offsets = [0, 32], sizes = [8, 32], strides = [1, 1]} : vector<8x128xf32> to vector<8x32xf32>
    %126 = arith.negf %125 : vector<8x32xf32>
    %127 = math.exp %126 : vector<8x32xf32>
    %cst_65 = arith.constant 1.000000e+00 : f32
    %128 = vector.broadcast %cst_65 : f32 to vector<8x32xf32>
    %129 = arith.addf %128, %127 : vector<8x32xf32>
    %130 = arith.divf %128, %129 : vector<8x32xf32>
    %131 = vector.extract_strided_slice %118 {offsets = [0, 64], sizes = [8, 32], strides = [1, 1]} : vector<8x128xf32> to vector<8x32xf32>
    %132 = math.tanh %131 : vector<8x32xf32>
    %133 = vector.extract_strided_slice %118 {offsets = [0, 96], sizes = [8, 32], strides = [1, 1]} : vector<8x128xf32> to vector<8x32xf32>
    %134 = arith.negf %133 : vector<8x32xf32>
    %135 = math.exp %134 : vector<8x32xf32>
    %cst_66 = arith.constant 1.000000e+00 : f32
    %136 = vector.broadcast %cst_66 : f32 to vector<8x32xf32>
    %137 = arith.addf %136, %135 : vector<8x32xf32>
    %138 = arith.divf %136, %137 : vector<8x32xf32>
    %139 = arith.mulf %130, %107 : vector<8x32xf32>
    %140 = arith.mulf %124, %132 : vector<8x32xf32>
    %141 = arith.addf %139, %140 : vector<8x32xf32>
    %142 = math.tanh %141 : vector<8x32xf32>
    %143 = arith.mulf %138, %142 : vector<8x32xf32>
    %144 = arith.index_cast %c1_i32 : i32 to index
    %c0_67 = arith.constant 0 : index
    %c0_68 = arith.constant 0 : index
    %145 = vector.load %arg17[%144, %c0_67, %c0_68] : memref<8x8x32xf32, #tpu.memory_space<vmem>>, vector<1x8x32xf32>
    %146 = vector.shape_cast %145 : vector<1x8x32xf32> to vector<8x32xf32>
    %147 = vector.shape_cast %143 : vector<8x32xf32> to vector<1x8x32xf32>
    tpu.vector_store %arg17[%144, %c0_67, %c0_68], %147 {strides = array<i32>} : memref<8x8x32xf32, #tpu.memory_space<vmem>>, vector<1x8x32xf32>,
    %c2_i32 = arith.constant 2 : i32
    %148 = arith.index_cast %c2_i32 : i32 to index
    %c0_69 = arith.constant 0 : index
    %c0_70 = arith.constant 0 : index
    %149 = vector.load %arg18[%148, %c0_69, %c0_70] : memref<8x8x128xf32, #tpu.memory_space<vmem>>, vector<1x8x128xf32>
    %150 = vector.shape_cast %149 : vector<1x8x128xf32> to vector<8x128xf32>
    %cst_71 = arith.constant dense<0.000000e+00> : vector<8x128xf32>
    %151 = tpu.matmul %143, %77, %cst_71 {dimension_numbers = #tpu.dot_dimension_numbers<[1], [0], [0], [1], [0, 0, 1, 1], [], []>} : vector<8x32xf32>, vector<32x128xf32>, vector<8x128xf32> -> vector<8x128xf32>
    %152 = arith.addf %150, %151 : vector<8x128xf32>
    %153 = vector.extract_strided_slice %152 {offsets = [0, 0], sizes = [8, 32], strides = [1, 1]} : vector<8x128xf32> to vector<8x32xf32>
    %154 = arith.negf %153 : vector<8x32xf32>
    %155 = math.exp %154 : vector<8x32xf32>
    %cst_72 = arith.constant 1.000000e+00 : f32
    %156 = vector.broadcast %cst_72 : f32 to vector<8x32xf32>
    %157 = arith.addf %156, %155 : vector<8x32xf32>
    %158 = arith.divf %156, %157 : vector<8x32xf32>
    %159 = vector.extract_strided_slice %152 {offsets = [0, 32], sizes = [8, 32], strides = [1, 1]} : vector<8x128xf32> to vector<8x32xf32>
    %160 = arith.negf %159 : vector<8x32xf32>
    %161 = math.exp %160 : vector<8x32xf32>
    %cst_73 = arith.constant 1.000000e+00 : f32
    %162 = vector.broadcast %cst_73 : f32 to vector<8x32xf32>
    %163 = arith.addf %162, %161 : vector<8x32xf32>
    %164 = arith.divf %162, %163 : vector<8x32xf32>
    %165 = vector.extract_strided_slice %152 {offsets = [0, 64], sizes = [8, 32], strides = [1, 1]} : vector<8x128xf32> to vector<8x32xf32>
    %166 = math.tanh %165 : vector<8x32xf32>
    %167 = vector.extract_strided_slice %152 {offsets = [0, 96], sizes = [8, 32], strides = [1, 1]} : vector<8x128xf32> to vector<8x32xf32>
    %168 = arith.negf %167 : vector<8x32xf32>
    %169 = math.exp %168 : vector<8x32xf32>
    %cst_74 = arith.constant 1.000000e+00 : f32
    %170 = vector.broadcast %cst_74 : f32 to vector<8x32xf32>
    %171 = arith.addf %170, %169 : vector<8x32xf32>
    %172 = arith.divf %170, %171 : vector<8x32xf32>
    %173 = arith.mulf %164, %141 : vector<8x32xf32>
    %174 = arith.mulf %158, %166 : vector<8x32xf32>
    %175 = arith.addf %173, %174 : vector<8x32xf32>
    %176 = math.tanh %175 : vector<8x32xf32>
    %177 = arith.mulf %172, %176 : vector<8x32xf32>
    %178 = arith.index_cast %c2_i32 : i32 to index
    %c0_75 = arith.constant 0 : index
    %c0_76 = arith.constant 0 : index
    %179 = vector.load %arg17[%178, %c0_75, %c0_76] : memref<8x8x32xf32, #tpu.memory_space<vmem>>, vector<1x8x32xf32>
    %180 = vector.shape_cast %179 : vector<1x8x32xf32> to vector<8x32xf32>
    %181 = vector.shape_cast %177 : vector<8x32xf32> to vector<1x8x32xf32>
    tpu.vector_store %arg17[%178, %c0_75, %c0_76], %181 {strides = array<i32>} : memref<8x8x32xf32, #tpu.memory_space<vmem>>, vector<1x8x32xf32>,
    %c3_i32 = arith.constant 3 : i32
    %182 = arith.index_cast %c3_i32 : i32 to index
    %c0_77 = arith.constant 0 : index
    %c0_78 = arith.constant 0 : index
    %183 = vector.load %arg18[%182, %c0_77, %c0_78] : memref<8x8x128xf32, #tpu.memory_space<vmem>>, vector<1x8x128xf32>
    %184 = vector.shape_cast %183 : vector<1x8x128xf32> to vector<8x128xf32>
    %cst_79 = arith.constant dense<0.000000e+00> : vector<8x128xf32>
    %185 = tpu.matmul %177, %77, %cst_79 {dimension_numbers = #tpu.dot_dimension_numbers<[1], [0], [0], [1], [0, 0, 1, 1], [], []>} : vector<8x32xf32>, vector<32x128xf32>, vector<8x128xf32> -> vector<8x128xf32>
    %186 = arith.addf %184, %185 : vector<8x128xf32>
    %187 = vector.extract_strided_slice %186 {offsets = [0, 0], sizes = [8, 32], strides = [1, 1]} : vector<8x128xf32> to vector<8x32xf32>
    %188 = arith.negf %187 : vector<8x32xf32>
    %189 = math.exp %188 : vector<8x32xf32>
    %cst_80 = arith.constant 1.000000e+00 : f32
    %190 = vector.broadcast %cst_80 : f32 to vector<8x32xf32>
    %191 = arith.addf %190, %189 : vector<8x32xf32>
    %192 = arith.divf %190, %191 : vector<8x32xf32>
    %193 = vector.extract_strided_slice %186 {offsets = [0, 32], sizes = [8, 32], strides = [1, 1]} : vector<8x128xf32> to vector<8x32xf32>
    %194 = arith.negf %193 : vector<8x32xf32>
    %195 = math.exp %194 : vector<8x32xf32>
    %cst_81 = arith.constant 1.000000e+00 : f32
    %196 = vector.broadcast %cst_81 : f32 to vector<8x32xf32>
    %197 = arith.addf %196, %195 : vector<8x32xf32>
    %198 = arith.divf %196, %197 : vector<8x32xf32>
    %199 = vector.extract_strided_slice %186 {offsets = [0, 64], sizes = [8, 32], strides = [1, 1]} : vector<8x128xf32> to vector<8x32xf32>
    %200 = math.tanh %199 : vector<8x32xf32>
    %201 = vector.extract_strided_slice %186 {offsets = [0, 96], sizes = [8, 32], strides = [1, 1]} : vector<8x128xf32> to vector<8x32xf32>
    %202 = arith.negf %201 : vector<8x32xf32>
    %203 = math.exp %202 : vector<8x32xf32>
    %cst_82 = arith.constant 1.000000e+00 : f32
    %204 = vector.broadcast %cst_82 : f32 to vector<8x32xf32>
    %205 = arith.addf %204, %203 : vector<8x32xf32>
    %206 = arith.divf %204, %205 : vector<8x32xf32>
    %207 = arith.mulf %198, %175 : vector<8x32xf32>
    %208 = arith.mulf %192, %200 : vector<8x32xf32>
    %209 = arith.addf %207, %208 : vector<8x32xf32>
    %210 = math.tanh %209 : vector<8x32xf32>
    %211 = arith.mulf %206, %210 : vector<8x32xf32>
    %212 = arith.index_cast %c3_i32 : i32 to index
    %c0_83 = arith.constant 0 : index
    %c0_84 = arith.constant 0 : index
    %213 = vector.load %arg17[%212, %c0_83, %c0_84] : memref<8x8x32xf32, #tpu.memory_space<vmem>>, vector<1x8x32xf32>
    %214 = vector.shape_cast %213 : vector<1x8x32xf32> to vector<8x32xf32>
    %215 = vector.shape_cast %211 : vector<8x32xf32> to vector<1x8x32xf32>
    tpu.vector_store %arg17[%212, %c0_83, %c0_84], %215 {strides = array<i32>} : memref<8x8x32xf32, #tpu.memory_space<vmem>>, vector<1x8x32xf32>,
    %c4_i32 = arith.constant 4 : i32
    %216 = arith.index_cast %c4_i32 : i32 to index
    %c0_85 = arith.constant 0 : index
    %c0_86 = arith.constant 0 : index
    %217 = vector.load %arg18[%216, %c0_85, %c0_86] : memref<8x8x128xf32, #tpu.memory_space<vmem>>, vector<1x8x128xf32>
    %218 = vector.shape_cast %217 : vector<1x8x128xf32> to vector<8x128xf32>
    %cst_87 = arith.constant dense<0.000000e+00> : vector<8x128xf32>
    %219 = tpu.matmul %211, %77, %cst_87 {dimension_numbers = #tpu.dot_dimension_numbers<[1], [0], [0], [1], [0, 0, 1, 1], [], []>} : vector<8x32xf32>, vector<32x128xf32>, vector<8x128xf32> -> vector<8x128xf32>
    %220 = arith.addf %218, %219 : vector<8x128xf32>
    %221 = vector.extract_strided_slice %220 {offsets = [0, 0], sizes = [8, 32], strides = [1, 1]} : vector<8x128xf32> to vector<8x32xf32>
    %222 = arith.negf %221 : vector<8x32xf32>
    %223 = math.exp %222 : vector<8x32xf32>
    %cst_88 = arith.constant 1.000000e+00 : f32
    %224 = vector.broadcast %cst_88 : f32 to vector<8x32xf32>
    %225 = arith.addf %224, %223 : vector<8x32xf32>
    %226 = arith.divf %224, %225 : vector<8x32xf32>
    %227 = vector.extract_strided_slice %220 {offsets = [0, 32], sizes = [8, 32], strides = [1, 1]} : vector<8x128xf32> to vector<8x32xf32>
    %228 = arith.negf %227 : vector<8x32xf32>
    %229 = math.exp %228 : vector<8x32xf32>
    %cst_89 = arith.constant 1.000000e+00 : f32
    %230 = vector.broadcast %cst_89 : f32 to vector<8x32xf32>
    %231 = arith.addf %230, %229 : vector<8x32xf32>
    %232 = arith.divf %230, %231 : vector<8x32xf32>
    %233 = vector.extract_strided_slice %220 {offsets = [0, 64], sizes = [8, 32], strides = [1, 1]} : vector<8x128xf32> to vector<8x32xf32>
    %234 = math.tanh %233 : vector<8x32xf32>
    %235 = vector.extract_strided_slice %220 {offsets = [0, 96], sizes = [8, 32], strides = [1, 1]} : vector<8x128xf32> to vector<8x32xf32>
    %236 = arith.negf %235 : vector<8x32xf32>
    %237 = math.exp %236 : vector<8x32xf32>
    %cst_90 = arith.constant 1.000000e+00 : f32
    %238 = vector.broadcast %cst_90 : f32 to vector<8x32xf32>
    %239 = arith.addf %238, %237 : vector<8x32xf32>
    %240 = arith.divf %238, %239 : vector<8x32xf32>
    %241 = arith.mulf %232, %209 : vector<8x32xf32>
    %242 = arith.mulf %226, %234 : vector<8x32xf32>
    %243 = arith.addf %241, %242 : vector<8x32xf32>
    %244 = math.tanh %243 : vector<8x32xf32>
    %245 = arith.mulf %240, %244 : vector<8x32xf32>
    %246 = arith.index_cast %c4_i32 : i32 to index
    %c0_91 = arith.constant 0 : index
    %c0_92 = arith.constant 0 : index
    %247 = vector.load %arg17[%246, %c0_91, %c0_92] : memref<8x8x32xf32, #tpu.memory_space<vmem>>, vector<1x8x32xf32>
    %248 = vector.shape_cast %247 : vector<1x8x32xf32> to vector<8x32xf32>
    %249 = vector.shape_cast %245 : vector<8x32xf32> to vector<1x8x32xf32>
    tpu.vector_store %arg17[%246, %c0_91, %c0_92], %249 {strides = array<i32>} : memref<8x8x32xf32, #tpu.memory_space<vmem>>, vector<1x8x32xf32>,
    %c5_i32 = arith.constant 5 : i32
    %250 = arith.index_cast %c5_i32 : i32 to index
    %c0_93 = arith.constant 0 : index
    %c0_94 = arith.constant 0 : index
    %251 = vector.load %arg18[%250, %c0_93, %c0_94] : memref<8x8x128xf32, #tpu.memory_space<vmem>>, vector<1x8x128xf32>
    %252 = vector.shape_cast %251 : vector<1x8x128xf32> to vector<8x128xf32>
    %cst_95 = arith.constant dense<0.000000e+00> : vector<8x128xf32>
    %253 = tpu.matmul %245, %77, %cst_95 {dimension_numbers = #tpu.dot_dimension_numbers<[1], [0], [0], [1], [0, 0, 1, 1], [], []>} : vector<8x32xf32>, vector<32x128xf32>, vector<8x128xf32> -> vector<8x128xf32>
    %254 = arith.addf %252, %253 : vector<8x128xf32>
    %255 = vector.extract_strided_slice %254 {offsets = [0, 0], sizes = [8, 32], strides = [1, 1]} : vector<8x128xf32> to vector<8x32xf32>
    %256 = arith.negf %255 : vector<8x32xf32>
    %257 = math.exp %256 : vector<8x32xf32>
    %cst_96 = arith.constant 1.000000e+00 : f32
    %258 = vector.broadcast %cst_96 : f32 to vector<8x32xf32>
    %259 = arith.addf %258, %257 : vector<8x32xf32>
    %260 = arith.divf %258, %259 : vector<8x32xf32>
    %261 = vector.extract_strided_slice %254 {offsets = [0, 32], sizes = [8, 32], strides = [1, 1]} : vector<8x128xf32> to vector<8x32xf32>
    %262 = arith.negf %261 : vector<8x32xf32>
    %263 = math.exp %262 : vector<8x32xf32>
    %cst_97 = arith.constant 1.000000e+00 : f32
    %264 = vector.broadcast %cst_97 : f32 to vector<8x32xf32>
    %265 = arith.addf %264, %263 : vector<8x32xf32>
    %266 = arith.divf %264, %265 : vector<8x32xf32>
    %267 = vector.extract_strided_slice %254 {offsets = [0, 64], sizes = [8, 32], strides = [1, 1]} : vector<8x128xf32> to vector<8x32xf32>
    %268 = math.tanh %267 : vector<8x32xf32>
    %269 = vector.extract_strided_slice %254 {offsets = [0, 96], sizes = [8, 32], strides = [1, 1]} : vector<8x128xf32> to vector<8x32xf32>
    %270 = arith.negf %269 : vector<8x32xf32>
    %271 = math.exp %270 : vector<8x32xf32>
    %cst_98 = arith.constant 1.000000e+00 : f32
    %272 = vector.broadcast %cst_98 : f32 to vector<8x32xf32>
    %273 = arith.addf %272, %271 : vector<8x32xf32>
    %274 = arith.divf %272, %273 : vector<8x32xf32>
    %275 = arith.mulf %266, %243 : vector<8x32xf32>
    %276 = arith.mulf %260, %268 : vector<8x32xf32>
    %277 = arith.addf %275, %276 : vector<8x32xf32>
    %278 = math.tanh %277 : vector<8x32xf32>
    %279 = arith.mulf %274, %278 : vector<8x32xf32>
    %280 = arith.index_cast %c5_i32 : i32 to index
    %c0_99 = arith.constant 0 : index
    %c0_100 = arith.constant 0 : index
    %281 = vector.load %arg17[%280, %c0_99, %c0_100] : memref<8x8x32xf32, #tpu.memory_space<vmem>>, vector<1x8x32xf32>
    %282 = vector.shape_cast %281 : vector<1x8x32xf32> to vector<8x32xf32>
    %283 = vector.shape_cast %279 : vector<8x32xf32> to vector<1x8x32xf32>
    tpu.vector_store %arg17[%280, %c0_99, %c0_100], %283 {strides = array<i32>} : memref<8x8x32xf32, #tpu.memory_space<vmem>>, vector<1x8x32xf32>,
    %c6_i32 = arith.constant 6 : i32
    %284 = arith.index_cast %c6_i32 : i32 to index
    %c0_101 = arith.constant 0 : index
    %c0_102 = arith.constant 0 : index
    %285 = vector.load %arg18[%284, %c0_101, %c0_102] : memref<8x8x128xf32, #tpu.memory_space<vmem>>, vector<1x8x128xf32>
    %286 = vector.shape_cast %285 : vector<1x8x128xf32> to vector<8x128xf32>
    %cst_103 = arith.constant dense<0.000000e+00> : vector<8x128xf32>
    %287 = tpu.matmul %279, %77, %cst_103 {dimension_numbers = #tpu.dot_dimension_numbers<[1], [0], [0], [1], [0, 0, 1, 1], [], []>} : vector<8x32xf32>, vector<32x128xf32>, vector<8x128xf32> -> vector<8x128xf32>
    %288 = arith.addf %286, %287 : vector<8x128xf32>
    %289 = vector.extract_strided_slice %288 {offsets = [0, 0], sizes = [8, 32], strides = [1, 1]} : vector<8x128xf32> to vector<8x32xf32>
    %290 = arith.negf %289 : vector<8x32xf32>
    %291 = math.exp %290 : vector<8x32xf32>
    %cst_104 = arith.constant 1.000000e+00 : f32
    %292 = vector.broadcast %cst_104 : f32 to vector<8x32xf32>
    %293 = arith.addf %292, %291 : vector<8x32xf32>
    %294 = arith.divf %292, %293 : vector<8x32xf32>
    %295 = vector.extract_strided_slice %288 {offsets = [0, 32], sizes = [8, 32], strides = [1, 1]} : vector<8x128xf32> to vector<8x32xf32>
    %296 = arith.negf %295 : vector<8x32xf32>
    %297 = math.exp %296 : vector<8x32xf32>
    %cst_105 = arith.constant 1.000000e+00 : f32
    %298 = vector.broadcast %cst_105 : f32 to vector<8x32xf32>
    %299 = arith.addf %298, %297 : vector<8x32xf32>
    %300 = arith.divf %298, %299 : vector<8x32xf32>
    %301 = vector.extract_strided_slice %288 {offsets = [0, 64], sizes = [8, 32], strides = [1, 1]} : vector<8x128xf32> to vector<8x32xf32>
    %302 = math.tanh %301 : vector<8x32xf32>
    %303 = vector.extract_strided_slice %288 {offsets = [0, 96], sizes = [8, 32], strides = [1, 1]} : vector<8x128xf32> to vector<8x32xf32>
    %304 = arith.negf %303 : vector<8x32xf32>
    %305 = math.exp %304 : vector<8x32xf32>
    %cst_106 = arith.constant 1.000000e+00 : f32
    %306 = vector.broadcast %cst_106 : f32 to vector<8x32xf32>
    %307 = arith.addf %306, %305 : vector<8x32xf32>
    %308 = arith.divf %306, %307 : vector<8x32xf32>
    %309 = arith.mulf %300, %277 : vector<8x32xf32>
    %310 = arith.mulf %294, %302 : vector<8x32xf32>
    %311 = arith.addf %309, %310 : vector<8x32xf32>
    %312 = math.tanh %311 : vector<8x32xf32>
    %313 = arith.mulf %308, %312 : vector<8x32xf32>
    %314 = arith.index_cast %c6_i32 : i32 to index
    %c0_107 = arith.constant 0 : index
    %c0_108 = arith.constant 0 : index
    %315 = vector.load %arg17[%314, %c0_107, %c0_108] : memref<8x8x32xf32, #tpu.memory_space<vmem>>, vector<1x8x32xf32>
    %316 = vector.shape_cast %315 : vector<1x8x32xf32> to vector<8x32xf32>
    %317 = vector.shape_cast %313 : vector<8x32xf32> to vector<1x8x32xf32>
    tpu.vector_store %arg17[%314, %c0_107, %c0_108], %317 {strides = array<i32>} : memref<8x8x32xf32, #tpu.memory_space<vmem>>, vector<1x8x32xf32>,
    %c7_i32 = arith.constant 7 : i32
    %318 = arith.index_cast %c7_i32 : i32 to index
    %c0_109 = arith.constant 0 : index
    %c0_110 = arith.constant 0 : index
    %319 = vector.load %arg18[%318, %c0_109, %c0_110] : memref<8x8x128xf32, #tpu.memory_space<vmem>>, vector<1x8x128xf32>
    %320 = vector.shape_cast %319 : vector<1x8x128xf32> to vector<8x128xf32>
    %cst_111 = arith.constant dense<0.000000e+00> : vector<8x128xf32>
    %321 = tpu.matmul %313, %77, %cst_111 {dimension_numbers = #tpu.dot_dimension_numbers<[1], [0], [0], [1], [0, 0, 1, 1], [], []>} : vector<8x32xf32>, vector<32x128xf32>, vector<8x128xf32> -> vector<8x128xf32>
    %322 = arith.addf %320, %321 : vector<8x128xf32>
    %323 = vector.extract_strided_slice %322 {offsets = [0, 0], sizes = [8, 32], strides = [1, 1]} : vector<8x128xf32> to vector<8x32xf32>
    %324 = arith.negf %323 : vector<8x32xf32>
    %325 = math.exp %324 : vector<8x32xf32>
    %cst_112 = arith.constant 1.000000e+00 : f32
    %326 = vector.broadcast %cst_112 : f32 to vector<8x32xf32>
    %327 = arith.addf %326, %325 : vector<8x32xf32>
    %328 = arith.divf %326, %327 : vector<8x32xf32>
    %329 = vector.extract_strided_slice %322 {offsets = [0, 32], sizes = [8, 32], strides = [1, 1]} : vector<8x128xf32> to vector<8x32xf32>
    %330 = arith.negf %329 : vector<8x32xf32>
    %331 = math.exp %330 : vector<8x32xf32>
    %cst_113 = arith.constant 1.000000e+00 : f32
    %332 = vector.broadcast %cst_113 : f32 to vector<8x32xf32>
    %333 = arith.addf %332, %331 : vector<8x32xf32>
    %334 = arith.divf %332, %333 : vector<8x32xf32>
    %335 = vector.extract_strided_slice %322 {offsets = [0, 64], sizes = [8, 32], strides = [1, 1]} : vector<8x128xf32> to vector<8x32xf32>
    %336 = math.tanh %335 : vector<8x32xf32>
    %337 = vector.extract_strided_slice %322 {offsets = [0, 96], sizes = [8, 32], strides = [1, 1]} : vector<8x128xf32> to vector<8x32xf32>
    %338 = arith.negf %337 : vector<8x32xf32>
    %339 = math.exp %338 : vector<8x32xf32>
    %cst_114 = arith.constant 1.000000e+00 : f32
    %340 = vector.broadcast %cst_114 : f32 to vector<8x32xf32>
    %341 = arith.addf %340, %339 : vector<8x32xf32>
    %342 = arith.divf %340, %341 : vector<8x32xf32>
    %343 = arith.mulf %334, %311 : vector<8x32xf32>
    %344 = arith.mulf %328, %336 : vector<8x32xf32>
    %345 = arith.addf %343, %344 : vector<8x32xf32>
    %346 = math.tanh %345 : vector<8x32xf32>
    %347 = arith.mulf %342, %346 : vector<8x32xf32>
    %348 = arith.index_cast %c7_i32 : i32 to index
    %c0_115 = arith.constant 0 : index
    %c0_116 = arith.constant 0 : index
    %349 = vector.load %arg17[%348, %c0_115, %c0_116] : memref<8x8x32xf32, #tpu.memory_space<vmem>>, vector<1x8x32xf32>
    %350 = vector.shape_cast %349 : vector<1x8x32xf32> to vector<8x32xf32>
    %351 = vector.shape_cast %347 : vector<8x32xf32> to vector<1x8x32xf32>
    tpu.vector_store %arg17[%348, %c0_115, %c0_116], %351 {strides = array<i32>} : memref<8x8x32xf32, #tpu.memory_space<vmem>>, vector<1x8x32xf32>,
    %c8_i32 = arith.constant 8 : i32
    %c0_117 = arith.constant 0 : index
    %c0_118 = arith.constant 0 : index
    %c0_119 = arith.constant 0 : index
    %352 = vector.load %arg17[%c0_117, %c0_118, %c0_119] : memref<8x8x32xf32, #tpu.memory_space<vmem>>, vector<8x8x32xf32>
    %353 = vector.shape_cast %352 : vector<8x8x32xf32> to vector<64x32xf32>
    %c1 = arith.constant 1 : index
    %c0_120 = arith.constant 0 : index
    %c0_121 = arith.constant 0 : index
    %354 = vector.load %arg11[%c1, %c0_120, %c0_121] : memref<2x32x128xf32, #tpu.memory_space<vmem>>, vector<1x32x128xf32>
    %355 = vector.shape_cast %354 : vector<1x32x128xf32> to vector<32x128xf32>
    %cst_122 = arith.constant dense<0.000000e+00> : vector<64x128xf32>
    %356 = tpu.matmul %353, %355, %cst_122 {dimension_numbers = #tpu.dot_dimension_numbers<[1], [0], [0], [1], [0, 0, 1, 1], [], []>} : vector<64x32xf32>, vector<32x128xf32>, vector<64x128xf32> -> vector<64x128xf32>
    %c1_123 = arith.constant 1 : index
    %c0_124 = arith.constant 0 : index
    %c0_125 = arith.constant 0 : index
    %357 = vector.load %arg13[%c1_123, %c0_124, %c0_125] : memref<2x1x128xf32, #tpu.memory_space<vmem>>, vector<1x1x128xf32>
    %358 = vector.shape_cast %357 : vector<1x1x128xf32> to vector<1x128xf32>
    %359 = vector.broadcast %358 : vector<1x128xf32> to vector<64x128xf32>
    %360 = arith.addf %356, %359 : vector<64x128xf32>
    %361 = vector.shape_cast %360 : vector<64x128xf32> to vector<8x8x128xf32>
    %c0_126 = arith.constant 0 : index
    %c0_127 = arith.constant 0 : index
    %c0_128 = arith.constant 0 : index
    %362 = vector.load %arg18[%c0_126, %c0_127, %c0_128] : memref<8x8x128xf32, #tpu.memory_space<vmem>>, vector<8x8x128xf32>
    tpu.vector_store %arg18[%c0_126, %c0_127, %c0_128], %361 {strides = array<i32>} : memref<8x8x128xf32, #tpu.memory_space<vmem>>, vector<8x8x128xf32>,
    %c1_129 = arith.constant 1 : index
    %c0_130 = arith.constant 0 : index
    %c0_131 = arith.constant 0 : index
    %363 = vector.load %arg12[%c1_129, %c0_130, %c0_131] : memref<2x32x128xf32, #tpu.memory_space<vmem>>, vector<1x32x128xf32>
    %364 = vector.shape_cast %363 : vector<1x32x128xf32> to vector<32x128xf32>
    %cst_132 = arith.constant 0.000000e+00 : f32
    %365 = vector.broadcast %cst_132 : f32 to vector<8x32xf32>
    %cst_133 = arith.constant 0.000000e+00 : f32
    %366 = vector.broadcast %cst_133 : f32 to vector<8x32xf32>
    %c0_i32_134 = arith.constant 0 : i32
    %367 = arith.index_cast %c0_i32_134 : i32 to index
    %c0_135 = arith.constant 0 : index
    %c0_136 = arith.constant 0 : index
    %368 = vector.load %arg18[%367, %c0_135, %c0_136] : memref<8x8x128xf32, #tpu.memory_space<vmem>>, vector<1x8x128xf32>
    %369 = vector.shape_cast %368 : vector<1x8x128xf32> to vector<8x128xf32>
    %cst_137 = arith.constant dense<0.000000e+00> : vector<8x128xf32>
    %370 = tpu.matmul %365, %364, %cst_137 {dimension_numbers = #tpu.dot_dimension_numbers<[1], [0], [0], [1], [0, 0, 1, 1], [], []>} : vector<8x32xf32>, vector<32x128xf32>, vector<8x128xf32> -> vector<8x128xf32>
    %371 = arith.addf %369, %370 : vector<8x128xf32>
    %372 = vector.extract_strided_slice %371 {offsets = [0, 0], sizes = [8, 32], strides = [1, 1]} : vector<8x128xf32> to vector<8x32xf32>
    %373 = arith.negf %372 : vector<8x32xf32>
    %374 = math.exp %373 : vector<8x32xf32>
    %cst_138 = arith.constant 1.000000e+00 : f32
    %375 = vector.broadcast %cst_138 : f32 to vector<8x32xf32>
    %376 = arith.addf %375, %374 : vector<8x32xf32>
    %377 = arith.divf %375, %376 : vector<8x32xf32>
    %378 = vector.extract_strided_slice %371 {offsets = [0, 32], sizes = [8, 32], strides = [1, 1]} : vector<8x128xf32> to vector<8x32xf32>
    %379 = arith.negf %378 : vector<8x32xf32>
    %380 = math.exp %379 : vector<8x32xf32>
    %cst_139 = arith.constant 1.000000e+00 : f32
    %381 = vector.broadcast %cst_139 : f32 to vector<8x32xf32>
    %382 = arith.addf %381, %380 : vector<8x32xf32>
    %383 = arith.divf %381, %382 : vector<8x32xf32>
    %384 = vector.extract_strided_slice %371 {offsets = [0, 64], sizes = [8, 32], strides = [1, 1]} : vector<8x128xf32> to vector<8x32xf32>
    %385 = math.tanh %384 : vector<8x32xf32>
    %386 = vector.extract_strided_slice %371 {offsets = [0, 96], sizes = [8, 32], strides = [1, 1]} : vector<8x128xf32> to vector<8x32xf32>
    %387 = arith.negf %386 : vector<8x32xf32>
    %388 = math.exp %387 : vector<8x32xf32>
    %cst_140 = arith.constant 1.000000e+00 : f32
    %389 = vector.broadcast %cst_140 : f32 to vector<8x32xf32>
    %390 = arith.addf %389, %388 : vector<8x32xf32>
    %391 = arith.divf %389, %390 : vector<8x32xf32>
    %392 = arith.mulf %383, %366 : vector<8x32xf32>
    %393 = arith.mulf %377, %385 : vector<8x32xf32>
    %394 = arith.addf %392, %393 : vector<8x32xf32>
    %395 = math.tanh %394 : vector<8x32xf32>
    %396 = arith.mulf %391, %395 : vector<8x32xf32>
    %397 = arith.index_cast %c0_i32_134 : i32 to index
    %c0_141 = arith.constant 0 : index
    %c0_142 = arith.constant 0 : index
    %398 = vector.load %arg17[%397, %c0_141, %c0_142] : memref<8x8x32xf32, #tpu.memory_space<vmem>>, vector<1x8x32xf32>
    %399 = vector.shape_cast %398 : vector<1x8x32xf32> to vector<8x32xf32>
    %400 = vector.shape_cast %396 : vector<8x32xf32> to vector<1x8x32xf32>
    tpu.vector_store %arg17[%397, %c0_141, %c0_142], %400 {strides = array<i32>} : memref<8x8x32xf32, #tpu.memory_space<vmem>>, vector<1x8x32xf32>,
    %c1_i32_143 = arith.constant 1 : i32
    %401 = arith.index_cast %c1_i32_143 : i32 to index
    %c0_144 = arith.constant 0 : index
    %c0_145 = arith.constant 0 : index
    %402 = vector.load %arg18[%401, %c0_144, %c0_145] : memref<8x8x128xf32, #tpu.memory_space<vmem>>, vector<1x8x128xf32>
    %403 = vector.shape_cast %402 : vector<1x8x128xf32> to vector<8x128xf32>
    %cst_146 = arith.constant dense<0.000000e+00> : vector<8x128xf32>
    %404 = tpu.matmul %396, %364, %cst_146 {dimension_numbers = #tpu.dot_dimension_numbers<[1], [0], [0], [1], [0, 0, 1, 1], [], []>} : vector<8x32xf32>, vector<32x128xf32>, vector<8x128xf32> -> vector<8x128xf32>
    %405 = arith.addf %403, %404 : vector<8x128xf32>
    %406 = vector.extract_strided_slice %405 {offsets = [0, 0], sizes = [8, 32], strides = [1, 1]} : vector<8x128xf32> to vector<8x32xf32>
    %407 = arith.negf %406 : vector<8x32xf32>
    %408 = math.exp %407 : vector<8x32xf32>
    %cst_147 = arith.constant 1.000000e+00 : f32
    %409 = vector.broadcast %cst_147 : f32 to vector<8x32xf32>
    %410 = arith.addf %409, %408 : vector<8x32xf32>
    %411 = arith.divf %409, %410 : vector<8x32xf32>
    %412 = vector.extract_strided_slice %405 {offsets = [0, 32], sizes = [8, 32], strides = [1, 1]} : vector<8x128xf32> to vector<8x32xf32>
    %413 = arith.negf %412 : vector<8x32xf32>
    %414 = math.exp %413 : vector<8x32xf32>
    %cst_148 = arith.constant 1.000000e+00 : f32
    %415 = vector.broadcast %cst_148 : f32 to vector<8x32xf32>
    %416 = arith.addf %415, %414 : vector<8x32xf32>
    %417 = arith.divf %415, %416 : vector<8x32xf32>
    %418 = vector.extract_strided_slice %405 {offsets = [0, 64], sizes = [8, 32], strides = [1, 1]} : vector<8x128xf32> to vector<8x32xf32>
    %419 = math.tanh %418 : vector<8x32xf32>
    %420 = vector.extract_strided_slice %405 {offsets = [0, 96], sizes = [8, 32], strides = [1, 1]} : vector<8x128xf32> to vector<8x32xf32>
    %421 = arith.negf %420 : vector<8x32xf32>
    %422 = math.exp %421 : vector<8x32xf32>
    %cst_149 = arith.constant 1.000000e+00 : f32
    %423 = vector.broadcast %cst_149 : f32 to vector<8x32xf32>
    %424 = arith.addf %423, %422 : vector<8x32xf32>
    %425 = arith.divf %423, %424 : vector<8x32xf32>
    %426 = arith.mulf %417, %394 : vector<8x32xf32>
    %427 = arith.mulf %411, %419 : vector<8x32xf32>
    %428 = arith.addf %426, %427 : vector<8x32xf32>
    %429 = math.tanh %428 : vector<8x32xf32>
    %430 = arith.mulf %425, %429 : vector<8x32xf32>
    %431 = arith.index_cast %c1_i32_143 : i32 to index
    %c0_150 = arith.constant 0 : index
    %c0_151 = arith.constant 0 : index
    %432 = vector.load %arg17[%431, %c0_150, %c0_151] : memref<8x8x32xf32, #tpu.memory_space<vmem>>, vector<1x8x32xf32>
    %433 = vector.shape_cast %432 : vector<1x8x32xf32> to vector<8x32xf32>
    %434 = vector.shape_cast %430 : vector<8x32xf32> to vector<1x8x32xf32>
    tpu.vector_store %arg17[%431, %c0_150, %c0_151], %434 {strides = array<i32>} : memref<8x8x32xf32, #tpu.memory_space<vmem>>, vector<1x8x32xf32>,
    %c2_i32_152 = arith.constant 2 : i32
    %435 = arith.index_cast %c2_i32_152 : i32 to index
    %c0_153 = arith.constant 0 : index
    %c0_154 = arith.constant 0 : index
    %436 = vector.load %arg18[%435, %c0_153, %c0_154] : memref<8x8x128xf32, #tpu.memory_space<vmem>>, vector<1x8x128xf32>
    %437 = vector.shape_cast %436 : vector<1x8x128xf32> to vector<8x128xf32>
    %cst_155 = arith.constant dense<0.000000e+00> : vector<8x128xf32>
    %438 = tpu.matmul %430, %364, %cst_155 {dimension_numbers = #tpu.dot_dimension_numbers<[1], [0], [0], [1], [0, 0, 1, 1], [], []>} : vector<8x32xf32>, vector<32x128xf32>, vector<8x128xf32> -> vector<8x128xf32>
    %439 = arith.addf %437, %438 : vector<8x128xf32>
    %440 = vector.extract_strided_slice %439 {offsets = [0, 0], sizes = [8, 32], strides = [1, 1]} : vector<8x128xf32> to vector<8x32xf32>
    %441 = arith.negf %440 : vector<8x32xf32>
    %442 = math.exp %441 : vector<8x32xf32>
    %cst_156 = arith.constant 1.000000e+00 : f32
    %443 = vector.broadcast %cst_156 : f32 to vector<8x32xf32>
    %444 = arith.addf %443, %442 : vector<8x32xf32>
    %445 = arith.divf %443, %444 : vector<8x32xf32>
    %446 = vector.extract_strided_slice %439 {offsets = [0, 32], sizes = [8, 32], strides = [1, 1]} : vector<8x128xf32> to vector<8x32xf32>
    %447 = arith.negf %446 : vector<8x32xf32>
    %448 = math.exp %447 : vector<8x32xf32>
    %cst_157 = arith.constant 1.000000e+00 : f32
    %449 = vector.broadcast %cst_157 : f32 to vector<8x32xf32>
    %450 = arith.addf %449, %448 : vector<8x32xf32>
    %451 = arith.divf %449, %450 : vector<8x32xf32>
    %452 = vector.extract_strided_slice %439 {offsets = [0, 64], sizes = [8, 32], strides = [1, 1]} : vector<8x128xf32> to vector<8x32xf32>
    %453 = math.tanh %452 : vector<8x32xf32>
    %454 = vector.extract_strided_slice %439 {offsets = [0, 96], sizes = [8, 32], strides = [1, 1]} : vector<8x128xf32> to vector<8x32xf32>
    %455 = arith.negf %454 : vector<8x32xf32>
    %456 = math.exp %455 : vector<8x32xf32>
    %cst_158 = arith.constant 1.000000e+00 : f32
    %457 = vector.broadcast %cst_158 : f32 to vector<8x32xf32>
    %458 = arith.addf %457, %456 : vector<8x32xf32>
    %459 = arith.divf %457, %458 : vector<8x32xf32>
    %460 = arith.mulf %451, %428 : vector<8x32xf32>
    %461 = arith.mulf %445, %453 : vector<8x32xf32>
    %462 = arith.addf %460, %461 : vector<8x32xf32>
    %463 = math.tanh %462 : vector<8x32xf32>
    %464 = arith.mulf %459, %463 : vector<8x32xf32>
    %465 = arith.index_cast %c2_i32_152 : i32 to index
    %c0_159 = arith.constant 0 : index
    %c0_160 = arith.constant 0 : index
    %466 = vector.load %arg17[%465, %c0_159, %c0_160] : memref<8x8x32xf32, #tpu.memory_space<vmem>>, vector<1x8x32xf32>
    %467 = vector.shape_cast %466 : vector<1x8x32xf32> to vector<8x32xf32>
    %468 = vector.shape_cast %464 : vector<8x32xf32> to vector<1x8x32xf32>
    tpu.vector_store %arg17[%465, %c0_159, %c0_160], %468 {strides = array<i32>} : memref<8x8x32xf32, #tpu.memory_space<vmem>>, vector<1x8x32xf32>,
    %c3_i32_161 = arith.constant 3 : i32
    %469 = arith.index_cast %c3_i32_161 : i32 to index
    %c0_162 = arith.constant 0 : index
    %c0_163 = arith.constant 0 : index
    %470 = vector.load %arg18[%469, %c0_162, %c0_163] : memref<8x8x128xf32, #tpu.memory_space<vmem>>, vector<1x8x128xf32>
    %471 = vector.shape_cast %470 : vector<1x8x128xf32> to vector<8x128xf32>
    %cst_164 = arith.constant dense<0.000000e+00> : vector<8x128xf32>
    %472 = tpu.matmul %464, %364, %cst_164 {dimension_numbers = #tpu.dot_dimension_numbers<[1], [0], [0], [1], [0, 0, 1, 1], [], []>} : vector<8x32xf32>, vector<32x128xf32>, vector<8x128xf32> -> vector<8x128xf32>
    %473 = arith.addf %471, %472 : vector<8x128xf32>
    %474 = vector.extract_strided_slice %473 {offsets = [0, 0], sizes = [8, 32], strides = [1, 1]} : vector<8x128xf32> to vector<8x32xf32>
    %475 = arith.negf %474 : vector<8x32xf32>
    %476 = math.exp %475 : vector<8x32xf32>
    %cst_165 = arith.constant 1.000000e+00 : f32
    %477 = vector.broadcast %cst_165 : f32 to vector<8x32xf32>
    %478 = arith.addf %477, %476 : vector<8x32xf32>
    %479 = arith.divf %477, %478 : vector<8x32xf32>
    %480 = vector.extract_strided_slice %473 {offsets = [0, 32], sizes = [8, 32], strides = [1, 1]} : vector<8x128xf32> to vector<8x32xf32>
    %481 = arith.negf %480 : vector<8x32xf32>
    %482 = math.exp %481 : vector<8x32xf32>
    %cst_166 = arith.constant 1.000000e+00 : f32
    %483 = vector.broadcast %cst_166 : f32 to vector<8x32xf32>
    %484 = arith.addf %483, %482 : vector<8x32xf32>
    %485 = arith.divf %483, %484 : vector<8x32xf32>
    %486 = vector.extract_strided_slice %473 {offsets = [0, 64], sizes = [8, 32], strides = [1, 1]} : vector<8x128xf32> to vector<8x32xf32>
    %487 = math.tanh %486 : vector<8x32xf32>
    %488 = vector.extract_strided_slice %473 {offsets = [0, 96], sizes = [8, 32], strides = [1, 1]} : vector<8x128xf32> to vector<8x32xf32>
    %489 = arith.negf %488 : vector<8x32xf32>
    %490 = math.exp %489 : vector<8x32xf32>
    %cst_167 = arith.constant 1.000000e+00 : f32
    %491 = vector.broadcast %cst_167 : f32 to vector<8x32xf32>
    %492 = arith.addf %491, %490 : vector<8x32xf32>
    %493 = arith.divf %491, %492 : vector<8x32xf32>
    %494 = arith.mulf %485, %462 : vector<8x32xf32>
    %495 = arith.mulf %479, %487 : vector<8x32xf32>
    %496 = arith.addf %494, %495 : vector<8x32xf32>
    %497 = math.tanh %496 : vector<8x32xf32>
    %498 = arith.mulf %493, %497 : vector<8x32xf32>
    %499 = arith.index_cast %c3_i32_161 : i32 to index
    %c0_168 = arith.constant 0 : index
    %c0_169 = arith.constant 0 : index
    %500 = vector.load %arg17[%499, %c0_168, %c0_169] : memref<8x8x32xf32, #tpu.memory_space<vmem>>, vector<1x8x32xf32>
    %501 = vector.shape_cast %500 : vector<1x8x32xf32> to vector<8x32xf32>
    %502 = vector.shape_cast %498 : vector<8x32xf32> to vector<1x8x32xf32>
    tpu.vector_store %arg17[%499, %c0_168, %c0_169], %502 {strides = array<i32>} : memref<8x8x32xf32, #tpu.memory_space<vmem>>, vector<1x8x32xf32>,
    %c4_i32_170 = arith.constant 4 : i32
    %503 = arith.index_cast %c4_i32_170 : i32 to index
    %c0_171 = arith.constant 0 : index
    %c0_172 = arith.constant 0 : index
    %504 = vector.load %arg18[%503, %c0_171, %c0_172] : memref<8x8x128xf32, #tpu.memory_space<vmem>>, vector<1x8x128xf32>
    %505 = vector.shape_cast %504 : vector<1x8x128xf32> to vector<8x128xf32>
    %cst_173 = arith.constant dense<0.000000e+00> : vector<8x128xf32>
    %506 = tpu.matmul %498, %364, %cst_173 {dimension_numbers = #tpu.dot_dimension_numbers<[1], [0], [0], [1], [0, 0, 1, 1], [], []>} : vector<8x32xf32>, vector<32x128xf32>, vector<8x128xf32> -> vector<8x128xf32>
    %507 = arith.addf %505, %506 : vector<8x128xf32>
    %508 = vector.extract_strided_slice %507 {offsets = [0, 0], sizes = [8, 32], strides = [1, 1]} : vector<8x128xf32> to vector<8x32xf32>
    %509 = arith.negf %508 : vector<8x32xf32>
    %510 = math.exp %509 : vector<8x32xf32>
    %cst_174 = arith.constant 1.000000e+00 : f32
    %511 = vector.broadcast %cst_174 : f32 to vector<8x32xf32>
    %512 = arith.addf %511, %510 : vector<8x32xf32>
    %513 = arith.divf %511, %512 : vector<8x32xf32>
    %514 = vector.extract_strided_slice %507 {offsets = [0, 32], sizes = [8, 32], strides = [1, 1]} : vector<8x128xf32> to vector<8x32xf32>
    %515 = arith.negf %514 : vector<8x32xf32>
    %516 = math.exp %515 : vector<8x32xf32>
    %cst_175 = arith.constant 1.000000e+00 : f32
    %517 = vector.broadcast %cst_175 : f32 to vector<8x32xf32>
    %518 = arith.addf %517, %516 : vector<8x32xf32>
    %519 = arith.divf %517, %518 : vector<8x32xf32>
    %520 = vector.extract_strided_slice %507 {offsets = [0, 64], sizes = [8, 32], strides = [1, 1]} : vector<8x128xf32> to vector<8x32xf32>
    %521 = math.tanh %520 : vector<8x32xf32>
    %522 = vector.extract_strided_slice %507 {offsets = [0, 96], sizes = [8, 32], strides = [1, 1]} : vector<8x128xf32> to vector<8x32xf32>
    %523 = arith.negf %522 : vector<8x32xf32>
    %524 = math.exp %523 : vector<8x32xf32>
    %cst_176 = arith.constant 1.000000e+00 : f32
    %525 = vector.broadcast %cst_176 : f32 to vector<8x32xf32>
    %526 = arith.addf %525, %524 : vector<8x32xf32>
    %527 = arith.divf %525, %526 : vector<8x32xf32>
    %528 = arith.mulf %519, %496 : vector<8x32xf32>
    %529 = arith.mulf %513, %521 : vector<8x32xf32>
    %530 = arith.addf %528, %529 : vector<8x32xf32>
    %531 = math.tanh %530 : vector<8x32xf32>
    %532 = arith.mulf %527, %531 : vector<8x32xf32>
    %533 = arith.index_cast %c4_i32_170 : i32 to index
    %c0_177 = arith.constant 0 : index
    %c0_178 = arith.constant 0 : index
    %534 = vector.load %arg17[%533, %c0_177, %c0_178] : memref<8x8x32xf32, #tpu.memory_space<vmem>>, vector<1x8x32xf32>
    %535 = vector.shape_cast %534 : vector<1x8x32xf32> to vector<8x32xf32>
    %536 = vector.shape_cast %532 : vector<8x32xf32> to vector<1x8x32xf32>
    tpu.vector_store %arg17[%533, %c0_177, %c0_178], %536 {strides = array<i32>} : memref<8x8x32xf32, #tpu.memory_space<vmem>>, vector<1x8x32xf32>,
    %c5_i32_179 = arith.constant 5 : i32
    %537 = arith.index_cast %c5_i32_179 : i32 to index
    %c0_180 = arith.constant 0 : index
    %c0_181 = arith.constant 0 : index
    %538 = vector.load %arg18[%537, %c0_180, %c0_181] : memref<8x8x128xf32, #tpu.memory_space<vmem>>, vector<1x8x128xf32>
    %539 = vector.shape_cast %538 : vector<1x8x128xf32> to vector<8x128xf32>
    %cst_182 = arith.constant dense<0.000000e+00> : vector<8x128xf32>
    %540 = tpu.matmul %532, %364, %cst_182 {dimension_numbers = #tpu.dot_dimension_numbers<[1], [0], [0], [1], [0, 0, 1, 1], [], []>} : vector<8x32xf32>, vector<32x128xf32>, vector<8x128xf32> -> vector<8x128xf32>
    %541 = arith.addf %539, %540 : vector<8x128xf32>
    %542 = vector.extract_strided_slice %541 {offsets = [0, 0], sizes = [8, 32], strides = [1, 1]} : vector<8x128xf32> to vector<8x32xf32>
    %543 = arith.negf %542 : vector<8x32xf32>
    %544 = math.exp %543 : vector<8x32xf32>
    %cst_183 = arith.constant 1.000000e+00 : f32
    %545 = vector.broadcast %cst_183 : f32 to vector<8x32xf32>
    %546 = arith.addf %545, %544 : vector<8x32xf32>
    %547 = arith.divf %545, %546 : vector<8x32xf32>
    %548 = vector.extract_strided_slice %541 {offsets = [0, 32], sizes = [8, 32], strides = [1, 1]} : vector<8x128xf32> to vector<8x32xf32>
    %549 = arith.negf %548 : vector<8x32xf32>
    %550 = math.exp %549 : vector<8x32xf32>
    %cst_184 = arith.constant 1.000000e+00 : f32
    %551 = vector.broadcast %cst_184 : f32 to vector<8x32xf32>
    %552 = arith.addf %551, %550 : vector<8x32xf32>
    %553 = arith.divf %551, %552 : vector<8x32xf32>
    %554 = vector.extract_strided_slice %541 {offsets = [0, 64], sizes = [8, 32], strides = [1, 1]} : vector<8x128xf32> to vector<8x32xf32>
    %555 = math.tanh %554 : vector<8x32xf32>
    %556 = vector.extract_strided_slice %541 {offsets = [0, 96], sizes = [8, 32], strides = [1, 1]} : vector<8x128xf32> to vector<8x32xf32>
    %557 = arith.negf %556 : vector<8x32xf32>
    %558 = math.exp %557 : vector<8x32xf32>
    %cst_185 = arith.constant 1.000000e+00 : f32
    %559 = vector.broadcast %cst_185 : f32 to vector<8x32xf32>
    %560 = arith.addf %559, %558 : vector<8x32xf32>
    %561 = arith.divf %559, %560 : vector<8x32xf32>
    %562 = arith.mulf %553, %530 : vector<8x32xf32>
    %563 = arith.mulf %547, %555 : vector<8x32xf32>
    %564 = arith.addf %562, %563 : vector<8x32xf32>
    %565 = math.tanh %564 : vector<8x32xf32>
    %566 = arith.mulf %561, %565 : vector<8x32xf32>
    %567 = arith.index_cast %c5_i32_179 : i32 to index
    %c0_186 = arith.constant 0 : index
    %c0_187 = arith.constant 0 : index
    %568 = vector.load %arg17[%567, %c0_186, %c0_187] : memref<8x8x32xf32, #tpu.memory_space<vmem>>, vector<1x8x32xf32>
    %569 = vector.shape_cast %568 : vector<1x8x32xf32> to vector<8x32xf32>
    %570 = vector.shape_cast %566 : vector<8x32xf32> to vector<1x8x32xf32>
    tpu.vector_store %arg17[%567, %c0_186, %c0_187], %570 {strides = array<i32>} : memref<8x8x32xf32, #tpu.memory_space<vmem>>, vector<1x8x32xf32>,
    %c6_i32_188 = arith.constant 6 : i32
    %571 = arith.index_cast %c6_i32_188 : i32 to index
    %c0_189 = arith.constant 0 : index
    %c0_190 = arith.constant 0 : index
    %572 = vector.load %arg18[%571, %c0_189, %c0_190] : memref<8x8x128xf32, #tpu.memory_space<vmem>>, vector<1x8x128xf32>
    %573 = vector.shape_cast %572 : vector<1x8x128xf32> to vector<8x128xf32>
    %cst_191 = arith.constant dense<0.000000e+00> : vector<8x128xf32>
    %574 = tpu.matmul %566, %364, %cst_191 {dimension_numbers = #tpu.dot_dimension_numbers<[1], [0], [0], [1], [0, 0, 1, 1], [], []>} : vector<8x32xf32>, vector<32x128xf32>, vector<8x128xf32> -> vector<8x128xf32>
    %575 = arith.addf %573, %574 : vector<8x128xf32>
    %576 = vector.extract_strided_slice %575 {offsets = [0, 0], sizes = [8, 32], strides = [1, 1]} : vector<8x128xf32> to vector<8x32xf32>
    %577 = arith.negf %576 : vector<8x32xf32>
    %578 = math.exp %577 : vector<8x32xf32>
    %cst_192 = arith.constant 1.000000e+00 : f32
    %579 = vector.broadcast %cst_192 : f32 to vector<8x32xf32>
    %580 = arith.addf %579, %578 : vector<8x32xf32>
    %581 = arith.divf %579, %580 : vector<8x32xf32>
    %582 = vector.extract_strided_slice %575 {offsets = [0, 32], sizes = [8, 32], strides = [1, 1]} : vector<8x128xf32> to vector<8x32xf32>
    %583 = arith.negf %582 : vector<8x32xf32>
    %584 = math.exp %583 : vector<8x32xf32>
    %cst_193 = arith.constant 1.000000e+00 : f32
    %585 = vector.broadcast %cst_193 : f32 to vector<8x32xf32>
    %586 = arith.addf %585, %584 : vector<8x32xf32>
    %587 = arith.divf %585, %586 : vector<8x32xf32>
    %588 = vector.extract_strided_slice %575 {offsets = [0, 64], sizes = [8, 32], strides = [1, 1]} : vector<8x128xf32> to vector<8x32xf32>
    %589 = math.tanh %588 : vector<8x32xf32>
    %590 = vector.extract_strided_slice %575 {offsets = [0, 96], sizes = [8, 32], strides = [1, 1]} : vector<8x128xf32> to vector<8x32xf32>
    %591 = arith.negf %590 : vector<8x32xf32>
    %592 = math.exp %591 : vector<8x32xf32>
    %cst_194 = arith.constant 1.000000e+00 : f32
    %593 = vector.broadcast %cst_194 : f32 to vector<8x32xf32>
    %594 = arith.addf %593, %592 : vector<8x32xf32>
    %595 = arith.divf %593, %594 : vector<8x32xf32>
    %596 = arith.mulf %587, %564 : vector<8x32xf32>
    %597 = arith.mulf %581, %589 : vector<8x32xf32>
    %598 = arith.addf %596, %597 : vector<8x32xf32>
    %599 = math.tanh %598 : vector<8x32xf32>
    %600 = arith.mulf %595, %599 : vector<8x32xf32>
    %601 = arith.index_cast %c6_i32_188 : i32 to index
    %c0_195 = arith.constant 0 : index
    %c0_196 = arith.constant 0 : index
    %602 = vector.load %arg17[%601, %c0_195, %c0_196] : memref<8x8x32xf32, #tpu.memory_space<vmem>>, vector<1x8x32xf32>
    %603 = vector.shape_cast %602 : vector<1x8x32xf32> to vector<8x32xf32>
    %604 = vector.shape_cast %600 : vector<8x32xf32> to vector<1x8x32xf32>
    tpu.vector_store %arg17[%601, %c0_195, %c0_196], %604 {strides = array<i32>} : memref<8x8x32xf32, #tpu.memory_space<vmem>>, vector<1x8x32xf32>,
    %c7_i32_197 = arith.constant 7 : i32
    %605 = arith.index_cast %c7_i32_197 : i32 to index
    %c0_198 = arith.constant 0 : index
    %c0_199 = arith.constant 0 : index
    %606 = vector.load %arg18[%605, %c0_198, %c0_199] : memref<8x8x128xf32, #tpu.memory_space<vmem>>, vector<1x8x128xf32>
    %607 = vector.shape_cast %606 : vector<1x8x128xf32> to vector<8x128xf32>
    %cst_200 = arith.constant dense<0.000000e+00> : vector<8x128xf32>
    %608 = tpu.matmul %600, %364, %cst_200 {dimension_numbers = #tpu.dot_dimension_numbers<[1], [0], [0], [1], [0, 0, 1, 1], [], []>} : vector<8x32xf32>, vector<32x128xf32>, vector<8x128xf32> -> vector<8x128xf32>
    %609 = arith.addf %607, %608 : vector<8x128xf32>
    %610 = vector.extract_strided_slice %609 {offsets = [0, 0], sizes = [8, 32], strides = [1, 1]} : vector<8x128xf32> to vector<8x32xf32>
    %611 = arith.negf %610 : vector<8x32xf32>
    %612 = math.exp %611 : vector<8x32xf32>
    %cst_201 = arith.constant 1.000000e+00 : f32
    %613 = vector.broadcast %cst_201 : f32 to vector<8x32xf32>
    %614 = arith.addf %613, %612 : vector<8x32xf32>
    %615 = arith.divf %613, %614 : vector<8x32xf32>
    %616 = vector.extract_strided_slice %609 {offsets = [0, 32], sizes = [8, 32], strides = [1, 1]} : vector<8x128xf32> to vector<8x32xf32>
    %617 = arith.negf %616 : vector<8x32xf32>
    %618 = math.exp %617 : vector<8x32xf32>
    %cst_202 = arith.constant 1.000000e+00 : f32
    %619 = vector.broadcast %cst_202 : f32 to vector<8x32xf32>
    %620 = arith.addf %619, %618 : vector<8x32xf32>
    %621 = arith.divf %619, %620 : vector<8x32xf32>
    %622 = vector.extract_strided_slice %609 {offsets = [0, 64], sizes = [8, 32], strides = [1, 1]} : vector<8x128xf32> to vector<8x32xf32>
    %623 = math.tanh %622 : vector<8x32xf32>
    %624 = vector.extract_strided_slice %609 {offsets = [0, 96], sizes = [8, 32], strides = [1, 1]} : vector<8x128xf32> to vector<8x32xf32>
    %625 = arith.negf %624 : vector<8x32xf32>
    %626 = math.exp %625 : vector<8x32xf32>
    %cst_203 = arith.constant 1.000000e+00 : f32
    %627 = vector.broadcast %cst_203 : f32 to vector<8x32xf32>
    %628 = arith.addf %627, %626 : vector<8x32xf32>
    %629 = arith.divf %627, %628 : vector<8x32xf32>
    %630 = arith.mulf %621, %598 : vector<8x32xf32>
    %631 = arith.mulf %615, %623 : vector<8x32xf32>
    %632 = arith.addf %630, %631 : vector<8x32xf32>
    %633 = math.tanh %632 : vector<8x32xf32>
    %634 = arith.mulf %629, %633 : vector<8x32xf32>
    %635 = arith.index_cast %c7_i32_197 : i32 to index
    %c0_204 = arith.constant 0 : index
    %c0_205 = arith.constant 0 : index
    %636 = vector.load %arg17[%635, %c0_204, %c0_205] : memref<8x8x32xf32, #tpu.memory_space<vmem>>, vector<1x8x32xf32>
    %637 = vector.shape_cast %636 : vector<1x8x32xf32> to vector<8x32xf32>
    %638 = vector.shape_cast %634 : vector<8x32xf32> to vector<1x8x32xf32>
    tpu.vector_store %arg17[%635, %c0_204, %c0_205], %638 {strides = array<i32>} : memref<8x8x32xf32, #tpu.memory_space<vmem>>, vector<1x8x32xf32>,
    %c8_i32_206 = arith.constant 8 : i32
    %c0_207 = arith.constant 0 : index
    %c0_208 = arith.constant 0 : index
    %c0_209 = arith.constant 0 : index
    %639 = vector.load %arg17[%c0_207, %c0_208, %c0_209] : memref<8x8x32xf32, #tpu.memory_space<vmem>>, vector<8x8x32xf32>
    %c0_210 = arith.constant 0 : index
    %c0_211 = arith.constant 0 : index
    %640 = vector.load %arg14[%c0_210, %c0_211] : memref<1x32xf32, #tpu.memory_space<vmem>>, vector<1x32xf32>
    %641 = vector.shape_cast %640 : vector<1x32xf32> to vector<1x1x32xf32>
    %642 = vector.broadcast %641 : vector<1x1x32xf32> to vector<8x8x32xf32>
    %643 = arith.mulf %639, %642 : vector<8x8x32xf32>
    %cst_212 = arith.constant dense<0.000000e+00> : vector<8x8xf32>
    %644 = vector.multi_reduction <add>, %643, %cst_212 [2] : vector<8x8x32xf32> to vector<8x8xf32>
    %c0_213 = arith.constant 0 : index
    %c0_214 = arith.constant 0 : index
    %645 = vector.load %arg15[%c0_213, %c0_214] : memref<1x1xf32, #tpu.memory_space<vmem>>, vector<1x1xf32>
    %646 = vector.broadcast %645 : vector<1x1xf32> to vector<8x8xf32>
    %647 = arith.addf %644, %646 : vector<8x8xf32>
    %648 = arith.negf %647 : vector<8x8xf32>
    %649 = math.exp %648 : vector<8x8xf32>
    %cst_215 = arith.constant 1.000000e+00 : f32
    %650 = vector.broadcast %cst_215 : f32 to vector<8x8xf32>
    %651 = arith.addf %650, %649 : vector<8x8xf32>
    %652 = arith.divf %650, %651 : vector<8x8xf32>
    %c0_216 = arith.constant 0 : index
    %c0_217 = arith.constant 0 : index
    %c0_218 = arith.constant 0 : index
    %653 = vector.load %arg16[%c0_216, %c0_217, %c0_218] : memref<1x8x8xf32, #tpu.memory_space<vmem>>, vector<1x8x8xf32>
    %654 = vector.shape_cast %653 : vector<1x8x8xf32> to vector<8x8xf32>
    %655 = vector.shape_cast %652 : vector<8x8xf32> to vector<1x8x8xf32>
    tpu.vector_store %arg16[%c0_216, %c0_217, %c0_218], %655 {strides = array<i32>} : memref<1x8x8xf32, #tpu.memory_space<vmem>>, vector<1x8x8xf32>,
    return
  }
  func.func @transform_0(%arg0: i32) -> (i32, i32, i32) {
    %c0_i32 = arith.constant 0 : i32
    %c0_i32_0 = arith.constant 0 : i32
    %c0_i32_1 = arith.constant 0 : i32
    return %c0_i32, %arg0, %c0_i32_0 : i32, i32, i32
  }
  func.func @transform_1(%arg0: i32) -> (i32, i32, i32) {
    %c0_i32 = arith.constant 0 : i32
    %c0_i32_0 = arith.constant 0 : i32
    %c0_i32_1 = arith.constant 0 : i32
    return %c0_i32, %arg0, %c0_i32_0 : i32, i32, i32
  }
  func.func @transform_2(%arg0: i32) -> (i32, i32) {
    %c0_i32 = arith.constant 0 : i32
    %c0_i32_0 = arith.constant 0 : i32
    %c0_i32_1 = arith.constant 0 : i32
    return %c0_i32, %c0_i32_0 : i32, i32
  }
  func.func @transform_3(%arg0: i32) -> (i32, i32) {
    %c0_i32 = arith.constant 0 : i32
    %c0_i32_0 = arith.constant 0 : i32
    %c0_i32_1 = arith.constant 0 : i32
    return %c0_i32, %c0_i32_0 : i32, i32
  }
  func.func @transform_4(%arg0: i32) -> (i32, i32) {
    %c0_i32 = arith.constant 0 : i32
    %c0_i32_0 = arith.constant 0 : i32
    %c0_i32_1 = arith.constant 0 : i32
    return %c0_i32, %c0_i32_0 : i32, i32
  }
  func.func @transform_5(%arg0: i32) -> (i32, i32) {
    %c0_i32 = arith.constant 0 : i32
    %c0_i32_0 = arith.constant 0 : i32
    %c0_i32_1 = arith.constant 0 : i32
    return %c0_i32, %c0_i32_0 : i32, i32
  }
  func.func @transform_6(%arg0: i32) -> (i32, i32) {
    %c0_i32 = arith.constant 0 : i32
    %c0_i32_0 = arith.constant 0 : i32
    %c0_i32_1 = arith.constant 0 : i32
    return %c0_i32, %c0_i32_0 : i32, i32
  }
  func.func @transform_7(%arg0: i32) -> (i32, i32) {
    %c0_i32 = arith.constant 0 : i32
    %c0_i32_0 = arith.constant 0 : i32
    %c0_i32_1 = arith.constant 0 : i32
    return %c0_i32, %c0_i32_0 : i32, i32
  }
  func.func @transform_8(%arg0: i32) -> (i32, i32) {
    %c0_i32 = arith.constant 0 : i32
    %c0_i32_0 = arith.constant 0 : i32
    %c0_i32_1 = arith.constant 0 : i32
    return %c0_i32, %c0_i32_0 : i32, i32
  }
  func.func @transform_9(%arg0: i32) -> (i32, i32) {
    %c0_i32 = arith.constant 0 : i32
    %c0_i32_0 = arith.constant 0 : i32
    %c0_i32_1 = arith.constant 0 : i32
    return %c0_i32, %c0_i32_0 : i32, i32
  }
  func.func @transform_10(%arg0: i32) -> (i32, i32, i32) {
    %c0_i32 = arith.constant 0 : i32
    %c0_i32_0 = arith.constant 0 : i32
    %c0_i32_1 = arith.constant 0 : i32
    %c0_i32_2 = arith.constant 0 : i32
    return %c0_i32, %c0_i32_0, %c0_i32_1 : i32, i32, i32
  }
  func.func @transform_11(%arg0: i32) -> (i32, i32, i32) {
    %c0_i32 = arith.constant 0 : i32
    %c0_i32_0 = arith.constant 0 : i32
    %c0_i32_1 = arith.constant 0 : i32
    %c0_i32_2 = arith.constant 0 : i32
    return %c0_i32, %c0_i32_0, %c0_i32_1 : i32, i32, i32
  }
  func.func @transform_12(%arg0: i32) -> (i32, i32, i32) {
    %c0_i32 = arith.constant 0 : i32
    %c0_i32_0 = arith.constant 0 : i32
    %c0_i32_1 = arith.constant 0 : i32
    %c0_i32_2 = arith.constant 0 : i32
    return %c0_i32, %c0_i32_0, %c0_i32_1 : i32, i32, i32
  }
  func.func @transform_13(%arg0: i32) -> (i32, i32) {
    %c0_i32 = arith.constant 0 : i32
    %c0_i32_0 = arith.constant 0 : i32
    %c0_i32_1 = arith.constant 0 : i32
    return %c0_i32, %c0_i32_0 : i32, i32
  }
  func.func @transform_14(%arg0: i32) -> (i32, i32) {
    %c0_i32 = arith.constant 0 : i32
    %c0_i32_0 = arith.constant 0 : i32
    %c0_i32_1 = arith.constant 0 : i32
    return %c0_i32, %c0_i32_0 : i32, i32
  }
  func.func @transform_15(%arg0: i32) -> (i32, i32, i32) {
    %c0_i32 = arith.constant 0 : i32
    %c0_i32_0 = arith.constant 0 : i32
    %c0_i32_1 = arith.constant 0 : i32
    return %arg0, %c0_i32, %c0_i32_0 : i32, i32, i32
  }
}

</mosaic_0001>

<bundles_post_ra>
// kernel: tpu_custom_call.1
= control target key start
LH: loop header
LB: loop body
LE: loop exit
PB: predicated region body
PF: predicated region fallthrough
CT: control target
= control target key end

     0   :  { %s4454_s0 = inlined_call_operand.vmem [shape: f32[8,8,32], index: 0, kind: input, shape index: {}]   ;;  %s4455_s1 = inlined_call_operand.vmem [shape: f32[8,8,4], index: 1, kind: input, shape index: {}]   ;;  %s4456_s2 = inlined_call_operand.vmem [shape: f32[32,16], index: 2, kind: input, shape index: {}]   ;;  %s4457_s3 = inlined_call_operand.vmem [shape: f32[1,16], index: 3, kind: input, shape index: {}]   ;;  %s4458_s4 = inlined_call_operand.vmem [shape: f32[1,16], index: 4, kind: input, shape index: {}]   ;;  %s4459_s5 = inlined_call_operand.vmem [shape: f32[1,16], index: 5, kind: input, shape index: {}]   ;;  %s4460_s6 = inlined_call_operand.vmem [shape: f32[4,16], index: 6, kind: input, shape index: {}]   ;;  %s4461_s7 = inlined_call_operand.vmem [shape: f32[1,16], index: 7, kind: input, shape index: {}]   ;;  %s4462_s8 = inlined_call_operand.vmem [shape: f32[1,16], index: 8, kind: input, shape index: {}]   ;;  %s4463_s9 = inlined_call_operand.vmem [shape: f32[1,16], index: 9, kind: input, shape index: {}]   ;;  %s4464_s10 = inlined_call_operand.vmem [shape: f32[2,32,128], index: 10, kind: input, shape index: {}]   ;;  %s4465_s11 = inlined_call_operand.hbm [shape: f32[2,32,128], index: 11, kind: input, shape index: {}]   ;;  %s4466_s12 = inlined_call_operand.vmem [shape: f32[2,1,128], index: 12, kind: input, shape index: {}]   ;;  %s4467_s13 = inlined_call_operand.vmem [shape: f32[1,32], index: 13, kind: input, shape index: {}]   ;;  %s4468_s14 = inlined_call_operand.<no memory space> [shape: f32[1,1], index: 14, kind: input, shape index: {}]   ;;  %s4469_s15 = inlined_call_operand.hbm [shape: f32[1,8,8], index: 15, kind: output, shape index: {}]  }
   0x1   :  { %v20_v0 = vstv %s4468_s14 }
   0x2   :  { %21 = vst [vmem:[#allocation4] sm:$0x1] %v20_v0 }
   0x3   :  { %22 = vsyncpa [#allocation6], 0 }
   0x4   :  { %23 = vsyncpa [#allocation7], 0  ;;  %s3689_s20 = smov [#allocation5]   ;;  %s3641_s24 = scalar_lea.hbm %s4465_s11, 1024 }
   0x5   :  { %s51_s21 = sshll.u32 %s3689_s20, 4  ;;  %p3642_p0 = scmp.ne.s32.totalorder %s4465_s11, %s3641_s24  ;;  %s52_s21 = int_to_ptr.vmem [resolvable:$true] %s51_s21 }
   0x6   :  { %p3645_p1 = scmp.lt.u32.totalorder %s3641_s24, %s4465_s11 }
   0x8   :  { %p3647_p2 = pnand %p3645_p1, %p3642_p0 }
   0xa   :  { %3650 = shalt.err (!%p3647_p2)
}
   0xb   :  { %s3651_s14 = scalar_lea.vmem %s52_s21, 1024  ;;  %p3656_p4 = scmp.lt.s32.totalorder %s52_s21, %s52_s21 }
   0xc   :  { %p3652_p3 = scmp.ne.s32.totalorder %s52_s21, %s3651_s14  ;;  %p3657_p5 = scmp.lt.s32.totalorder %s3651_s14, %s3651_s14 }
   0xe   :  { %p3658_p6 = por %p3657_p5, %p3656_p4 }
  0x10   :  { %p3659_p7 = pnand %p3658_p6, %p3652_p3 }
  0x12   :  { %3662 = shalt.err (!%p3659_p7)
}
  0x13   :  { %s3690_s29 = smov 128   ;;  %s3691_s30 = smov 8  }
  0x14   :  { %57 = dma.hbm_to_vmem [thread:$0]  %s4465_s11, 1024, %s52_s21, [#allocation6], %s3690_s29, %s3690_s29, %s3691_s30  }
  0x15   :  { %3685 = dma.done.wait [#allocation6], 1024  }
  0x16   :  { %3686 = vsyncadd [#allocation6], 4294966272  ;;  %vm393_vm0 = vcmask 1043456   ;;  %vm368_vm1 = vcmask 31744   ;;  %v360_v1 = vld [vmem:[%s4460_s6] sm:$0xf] }
  0x17   :  { %v352_v2 = vld [vmem:[%s4455_s1] sm:$0xff]  ;;  %vm86_vm2 = vcmask 261120   ;;  %3086 = vmatprep.subr.msk.mxu1 %vm393_vm0, %v360_v1  ;;  %v76_v4 = vld [vmem:[%s4456_s2 + $0x8] sm:$0xff]  ;;  %v77_v6 = vld [vmem:[%s4456_s2 + $0x10] sm:$0xff]  ;;  %vm216_vm3 = vcmask 130048   ;;  %v3692_v50 = vmov 0.0|0.0  }
  0x18   :  { %v75_v3 = vld [vmem:[%s4456_s2] sm:$0xff]  ;;  %3088 = vmatprep.mubr.msk.f32.mxu1 %vm368_vm1, %v352_v2  ;;  %v353_v5 = vld [vmem:[%s4455_s1 + $0x8] sm:$0xff]  ;;  %3087 = vmatpush3.msk.msra.mxu1 %vm393_vm0, %v360_v1  ;;  %v78_v8 = vld [vmem:[%s4456_s2 + $0x18] sm:$0xff]  ;;  %vm3694_vm4 = vmmov 0   ;;  %s3696_s17 = smov 64   ;;  %s3697_s2 = smov 32  }
  0x19   :  { %v3316_v7 = vpack.c.bf16 %v76_v4, %v75_v3  ;;  %v67_v9 = vld [vmem:[%s4454_s0] sm:$0xff]  ;;  %3089 = vmatmul.mubr.msk.f32.vlgmr.msra.gmra.mrb[0].mxu1 %vm368_vm1, %v353_v5  ;;  %v3320_v10 = vpack.c.bf16 %v78_v8, %v77_v6  ;;  %v68_v11 = vld [vmem:[%s4454_s0 + $0x8] sm:$0xff]  ;;  %v354_v48 = vld [vmem:[%s4455_s1 + $0x10] sm:$0xff]  ;;  %vm2823_vm5 = vcmask 1041409   ;;  %vm2825_vm6 = vcmask 1042434  }
  0x1a   :  { %3074 = vmatprep.mubr.msk.f32.mxu0 %vm86_vm2, %v67_v9  ;;  %v3829_v12 = vld [vmem:[%s4461_s7] ss:$0 sm:$0xff]  ;;  %v693_v47 = vld [vmem:[%s4464_s10 + $0x8] sm:$0xff]  ;;  %3091 = vmatprep.mubr.msk.f32.mxu1 %vm368_vm1, %v354_v48  ;;  %v355_v57 = vld [vmem:[%s4455_s1 + $0x18] sm:$0xff]  ;;  %vm2827_vm7 = vcmask 1043459   ;;  %vm2829_vm8 = vcmask 1044484  }
  0x1b   :  { %3317 = vmatprep.subr.bf16.mxu0 %v3316_v7  ;;  %v3837_v18 = vld [vmem:[%s4457_s3] ss:$0 sm:$0xff]  ;;  %v840_v58 = vld [vmem:[#allocation5] sm:$0xff]  ;;  %v841_v59 = vld [vmem:[#allocation5 + $0x8] sm:$0xff]  ;;  %vm2831_vm9 = vcmask 1045509   ;;  %vm2833_vm10 = vcmask 1046534  }
  0x1c   :  { %3319 = vmatpush3.bf16.msra.mxu0 %v3316_v7  ;;  %v692_v46 = vld [vmem:[%s4464_s10] sm:$0xff]  ;;  %v69_v60 = vld [vmem:[%s4454_s0 + $0x10] sm:$0xff]  ;;  %v3882_v61 = vpack.c.bf16 %v841_v59, %v840_v58  ;;  %v70_v62 = vld [vmem:[%s4454_s0 + $0x18] sm:$0xff]  ;;  %vm2835_vm11 = vcmask 1047559   ;;  %vm2838_vm12 = vcmask 64512  }
  0x1d   :  { %3321 = vmatprep.subr.bf16.mxu0 %v3320_v10  ;;  %v3324_v49 = vpack.c.bf16 %v693_v47, %v692_v46  ;;  %3092 = vmatmul.mubr.msk.f32.gmra.mrb[2].mxu1 %vm368_vm1, %v355_v57  ;;  %v356_v63 = vld [vmem:[%s4455_s1 + $0x20] sm:$0xff]  ;;  %v357_v0 = vld [vmem:[%s4455_s1 + $0x28] sm:$0xff]  ;;  %v694_v1 = vld [vmem:[%s4464_s10 + $0x10] sm:$0xff] }
  0x1e   :  { %3094 = vmatprep.mubr.msk.f32.mxu1 %vm368_vm1, %v356_v63  ;;  %v695_v2 = vld [vmem:[%s4464_s10 + $0x18] sm:$0xff]  ;;  %v71_v3 = vld [vmem:[%s4454_s0 + $0x20] sm:$0xff]  ;;  %v72_v7 = vld [vmem:[%s4454_s0 + $0x28] sm:$0xff] }
  0x1f   :  { %3325 = vmatprep.subr.bf16.mxu1 %v3324_v49  ;;  %v3911_v5 = vld [vmem:[%s4462_s8] ss:$0 sm:$0xff]  ;;  %v3328_v6 = vpack.c.bf16 %v695_v2, %v694_v1  ;;  %v358_v8 = vld [vmem:[%s4455_s1 + $0x30] sm:$0xff] }
  0x20   :  { %3323 = vmatpush3.bf16.msra.mxu0 %v3320_v10  ;;  %3327 = vmatpush3.bf16.msra.mxu1 %v3324_v49  ;;  %v359_v10 = vld [vmem:[%s4455_s1 + $0x38] sm:$0xff]  ;;  %s3693_s1 = smov 16  }
  0x21   :  { %3332 = vmatprep.subr.bf16.mxu0 %v3692_v50  ;;  %3095 = vmatmul.mubr.msk.f32.gmra.mrb[4].mxu1 %vm368_vm1, %v357_v0  ;;  %v3996_v0 = vld [vmem:[%s4466_s12] ss:$0 sm:$0xff] }
  0x22   :  { %3097 = vmatprep.mubr.msk.f32.mxu1 %vm368_vm1, %v358_v8  ;;  %3329 = vmatprep.subr.bf16.mxu1 %v3328_v6 }
  0x23   :  { %3075 = vmatmul.mubr.msk.f32.vlgmr.msra.gmra.mrb[0].mxu0 %vm86_vm2, %v68_v11  ;;  %v842_v11 = vld [vmem:[#allocation5 + $0x10] sm:$0xff] }
  0x24   :  { %3077 = vmatprep.mubr.msk.f32.mxu0 %vm86_vm2, %v69_v60  ;;  %3334 = vmatpush3.bf16.msra.mxu0 %v3882_v61 }
  0x25   :  { %3335 = vmatprep.subr.bf16.mxu0 %v3692_v50  ;;  %3331 = vmatpush3.bf16.msra.mxu1 %v3328_v6 }
  0x26   :  { %3098 = vmatmul.mubr.msk.f32.gmra.mrb[6].mxu1 %vm368_vm1, %v359_v10  ;;  %3344 = vmatprep.subr.bf16.mxu1 %v3692_v50 }
  0x27   :  { %3078 = vmatmul.mubr.msk.f32.gmra.mrb[2].mxu0 %vm86_vm2, %v70_v62 }
  0x28   :  { %3080 = vmatprep.mubr.msk.f32.mxu0 %vm86_vm2, %v71_v3 }
  0x2b   :  { %3081 = vmatmul.mubr.msk.f32.gmra.mrb[4].mxu0 %vm86_vm2, %v72_v7 }
  0xec   :  { %v3090_v13 = vpop.f32.mrb[0].mxu1 }
  0xed   :  { %v463_v14 = vpop.f32.mrb[1].mxu1  ;;  %v469_v16 = vadd.f32 %v3090_v13, %v3829_v12  ;;  %v843_v13 = vld [vmem:[#allocation5 + $0x18] sm:$0xff] }
  0xee   :  { %v464_v15 = vadd.f32 %v3829_v12, %v463_v14  ;;  %v3929_v14 = vld [vmem:[%s4463_s9] ss:$0 sm:$0xff] }
  0xef   :  { %v505_v19 = vsel %vm216_vm3, %v469_v16, 0.0 }
  0xf0   :  { %v502_v17 = vsel %vm216_vm3, %v464_v15, 0.0  ;;  %v3093_v48 = vpop.f32.mrb[2].mxu1 }
  0xf1   :  { %503 = vadd.xlane.f32.xlu0 %v502_v17  ;;  %v73_v17 = vld [vmem:[%s4454_s0 + $0x30] sm:$0xff]  ;;  %v473_v49 = vpop.f32.mrb[3].mxu1 }
  0xf2   :  { %3083 = vmatprep.mubr.msk.f32.mxu0 %vm86_vm2, %v73_v17 }
  0xf5   :  { %506 = vadd.xlane.f32.xlu0 %v505_v19  ;;  %v74_v19 = vld [vmem:[%s4454_s0 + $0x38] sm:$0xff] }
  0xf6   :  { %v3076_v20 = vpop.f32.mrb[0].mxu0  ;;  %3084 = vmatmul.mubr.msk.f32.gmra.mrb[6].mxu0 %vm86_vm2, %v74_v19 }
  0xf7   :  { %v177_v21 = vpop.f32.mrb[1].mxu0  ;;  %v183_v22 = vadd.f32 %v3076_v20, %v3837_v18 }
  0xf8   :  { %v178_v23 = vadd.f32 %v3837_v18, %v177_v21 }
  0xf9   :  { %v220_v25 = vsel %vm216_vm3, %v183_v22, 0.0 }
  0xfa   :  { %v217_v24 = vsel %vm216_vm3, %v178_v23, 0.0 }
  0xfb   :  { %218 = vadd.xlane.f32.xlu1 %v217_v24  ;;  %v3695_v24 = vmov 0.0  }
  0xfc   :  { %3128 = vmatprep.mubr.msk.f32.mxu0 %vm3694_vm4, %v3695_v24 }
  0xff   :  { %221 = vadd.xlane.f32.xlu1 %v220_v25 }
 0x17e   :  { %v504_v26 = vpop.xlane.xlu0 %503 }
 0x17f   :  { %v526_v27 = vmul.f32 0.0625, %v504_v26 }
 0x181   :  { %v3844_v28 = vsub.f32 %v464_v15, %v526_v27  ;;  %v3931_v15 = vpack.c.bf16 %v843_v13, %v842_v11 }
 0x182   :  { %v507_v29 = vpop.xlane.xlu0 %506 }
 0x183   :  { %v527_v30 = vmul.f32 0.0625, %v507_v29  ;;  %v542_v31 = vmul.f32 %v3844_v28, %v3844_v28  ;;  %3337 = vmatpush3.bf16.msra.mxu0 %v3931_v15 }
 0x184   :  { %3338 = vmatprep.subr.bf16.mxu0 %v3692_v50 }
 0x185   :  { %v3848_v32 = vsub.f32 %v469_v16, %v527_v30  ;;  %v550_v33 = vsel %vm216_vm3, %v542_v31, 0.0 }
 0x186   :  { %551 = vadd.xlane.f32.xlu0 %v550_v33  ;;  %3129 = vmatmul.mubr.f32.vlgmr.msra.gmra.mrb[8].mxu0 %v3695_v24 }
 0x187   :  { %v543_v35 = vmul.f32 %v3848_v32, %v3848_v32  ;;  %3340 = vmatpush3.bf16.msra.mxu0 %v3882_v61  ;;  %3139 = vmatprep.mubr.msk.f32.mxu0 %vm3694_vm4, %v3695_v24 }
 0x188   :  { %v219_v34 = vpop.xlane.xlu1 %218  ;;  %3341 = vmatprep.subr.bf16.mxu0 %v3692_v50 }
 0x189   :  { %v242_v36 = vmul.f32 0.0625, %v219_v34  ;;  %v553_v37 = vsel %vm216_vm3, %v543_v35, 0.0  ;;  %v3965_v35 = vld [vmem:[%s4458_s4] ss:$0 sm:$0xff] }
 0x18a   :  { %554 = vadd.xlane.f32.xlu1 %v553_v37 }
 0x18b   :  { %v3854_v38 = vsub.f32 %v178_v23, %v242_v36  ;;  %3343 = vmatpush3.bf16.msra.mxu0 %v3931_v15 }
 0x18c   :  { %v222_v39 = vpop.xlane.xlu1 %221  ;;  %3350 = vmatprep.subr.bf16.mxu0 %v3692_v50 }
 0x18d   :  { %v243_v40 = vmul.f32 0.0625, %v222_v39  ;;  %v258_v41 = vmul.f32 %v3854_v38, %v3854_v38  ;;  %v3972_v39 = vld [vmem:[%s4459_s5] ss:$0 sm:$0xff] }
 0x18f   :  { %v3858_v42 = vsub.f32 %v183_v22, %v243_v40  ;;  %v266_v43 = vsel %vm216_vm3, %v258_v41, 0.0 }
 0x190   :  { %267 = vadd.xlane.f32.xlu0 %v266_v43 }
 0x191   :  { %v259_v44 = vmul.f32 %v3858_v42, %v3858_v42 }
 0x193   :  { %v269_v45 = vsel %vm216_vm3, %v259_v44, 0.0 }
 0x194   :  { %270 = vadd.xlane.f32.xlu1 %v269_v45 }
 0x213   :  { %v552_v51 = vpop.xlane.xlu0 %551 }
 0x214   :  { %v574_v52 = vmul.f32 0.0625, %v552_v51  ;;  %v3079_v51 = vpop.f32.mrb[2].mxu0 }
 0x216   :  { %v582_v53 = vadd.f32 1e-06, %v574_v52  ;;  %v3987_v52 = vpop.f32.mrb[3].mxu0 }
 0x217   :  { %v555_v54 = vpop.xlane.xlu1 %554 }
 0x218   :  { %3448 = vrsqrt.f32 %v582_v53  ;;  %v575_v55 = vmul.f32 0.0625, %v555_v54  ;;  %v3096_v53 = vpop.f32.mrb[4].mxu1 }
 0x219   :  { %v483_v54 = vpop.f32.mrb[5].mxu1 }
 0x21a   :  { %v583_v56 = vadd.f32 1e-06, %v575_v55  ;;  %v3082_v55 = vpop.f32.mrb[4].mxu0  ;;  %v3099_v57 = vpop.f32.mrb[6].mxu1 }
 0x21b   :  { %v493_v58 = vpop.f32.mrb[7].mxu1 }
 0x21c   :  { %3450 = vrsqrt.f32 %v583_v56  ;;  %v197_v56 = vpop.f32.mrb[5].mxu0 }
 0x21d   :  { %v268_v26 = vpop.xlane.xlu0 %267  ;;  %v3989_v59 = vpop.f32.mrb[6].mxu0 }
 0x21e   :  { %v290_v27 = vmul.f32 0.0625, %v268_v26  ;;  %v3991_v60 = vpop.f32.mrb[7].mxu0  ;;  %v479_v26 = vadd.f32 %v3093_v48, %v3829_v12 }
 0x220   :  { %v298_v29 = vadd.f32 1e-06, %v290_v27  ;;  %v484_v27 = vadd.f32 %v3829_v12, %v483_v54  ;;  %v188_v54 = vadd.f32 %v3837_v18, %v3987_v52 }
 0x222   :  { %v3449_v4 = vpop.eup %3448  ;;  %3452 = vrsqrt.f32 %v298_v29  ;;  %v489_v29 = vadd.f32 %v3096_v53, %v3829_v12 }
 0x223   :  { %v598_v9 = vmul.f32 %v3449_v4, %v3844_v28  ;;  %v271_v28 = vpop.xlane.xlu1 %270 }
 0x224   :  { %v291_v30 = vmul.f32 0.0625, %v271_v28  ;;  %v511_v28 = vsel %vm216_vm3, %v479_v26, 0.0 }
 0x225   :  { %v613_v16 = vmul.f32 %v3911_v5, %v598_v9 }
 0x226   :  { %v3451_v20 = vpop.eup %3450  ;;  %v299_v31 = vadd.f32 1e-06, %v291_v30  ;;  %v514_v30 = vsel %vm216_vm3, %v484_v27, 0.0 }
 0x227   :  { %v628_v21 = vadd.f32 %v3929_v14, %v613_v16  ;;  %v599_v22 = vmul.f32 %v3451_v20, %v3848_v32 }
 0x228   :  { %3454 = vrsqrt.f32 %v299_v31  ;;  %v494_v31 = vadd.f32 %v3829_v12, %v493_v58 }
 0x229   :  { %644 = vrot.lane.b32.xlu0 %v628_v21, %s3693_s1  ;;  %v614_v23 = vmul.f32 %v3911_v5, %v599_v22  ;;  %v474_v21 = vadd.f32 %v3829_v12, %v473_v49 }
 0x22b   :  { %v629_v25 = vadd.f32 %v3929_v14, %v614_v23  ;;  %v508_v22 = vsel %vm216_vm3, %v474_v21, 0.0 }
 0x22c   :  { %v3453_v32 = vpop.eup %3452 }
 0x22d   :  { %646 = vrot.lane.b32.xlu1 %v629_v25, %s3693_s1  ;;  %v314_v33 = vmul.f32 %v3453_v32, %v3854_v38  ;;  %v517_v32 = vsel %vm216_vm3, %v489_v29, 0.0 }
 0x22f   :  { %v329_v36 = vmul.f32 %v3965_v35, %v314_v33  ;;  %v499_v33 = vadd.f32 %v3099_v57, %v3829_v12 }
 0x231   :  { %v344_v40 = vadd.f32 %v3972_v39, %v329_v36  ;;  %v4018_v36 = vadd.f32 %v3079_v51, %v3837_v18 }
 0x232   :  { %v3455_v34 = vpop.eup %3454 }
 0x233   :  { %v315_v37 = vmul.f32 %v3455_v34, %v3858_v42  ;;  %v520_v34 = vsel %vm216_vm3, %v494_v31, 0.0 }
 0x235   :  { %v330_v41 = vmul.f32 %v3965_v35, %v315_v37  ;;  %v523_v37 = vsel %vm216_vm3, %v499_v33, 0.0 }
 0x237   :  { %v345_v44 = vadd.f32 %v3972_v39, %v330_v41  ;;  %v226_v41 = vsel %vm216_vm3, %v4018_v36, 0.0 }
 0x259   :  { %v914_v62 = vpop.f32.mrb[8].mxu0 }
 0x25a   :  { %v3130_v63 = vpop.f32.mrb[9].mxu0 }
 0x29b   :  { %v645_v38 = vpop.permute.xlu0 %644 }
 0x29c   :  { %v668_v43 = vsel %vm216_vm3, %v344_v40, %v645_v38  ;;  %v4022_v40 = vadd.f32 %v3837_v18, %v197_v56  ;;  %v4027_v38 = vadd.f32 %v3082_v55, %v3837_v18  ;;  %v4047_v56 = vadd.f32 %v3837_v18, %v3991_v60 }
 0x29d   :  { %676 = vst.msk [vmem:[#allocation2] sm:$0xff] %vm86_vm2, %v668_v43 }
 0x29e   :  { %v229_v12 = vsel %vm216_vm3, %v4022_v40, 0.0  ;;  %v232_v43 = vsel %vm216_vm3, %v4027_v38, 0.0 }
 0x29f   :  { %v647_v45 = vpop.permute.xlu1 %646 }
 0x2a0   :  { %v669_v46 = vsel %vm216_vm3, %v345_v44, %v647_v45 }
 0x2a1   :  { %677 = vst.msk [vmem:[#allocation2 + $0x8] sm:$0xff] %vm86_vm2, %v669_v46 }
 0x2a4   :  { %v684_v42 = vld [vmem:[#allocation2] sm:$0xff] }
 0x2a5   :  { %3108 = vmatprep.mubr.msk.f32.mxu1 %vm86_vm2, %v684_v42 }
 0x2a8   :  { %v685_v47 = vld [vmem:[#allocation2 + $0x8] sm:$0xff] }
 0x2a9   :  { %3109 = vmatmul.mubr.msk.f32.vlgmr.msra.gmra.mrb[8].mxu1 %vm86_vm2, %v685_v47 }
 0x2aa   :  { %3346 = vmatpush3.bf16.msra.mxu1 %v3882_v61 }
 0x2ab   :  { %3347 = vmatprep.subr.bf16.mxu1 %v3692_v50 }
 0x2ae   :  { %3349 = vmatpush3.bf16.msra.mxu1 %v3931_v15 }
 0x2af   :  { %3356 = vmatprep.subr.bf16.mxu1 %v3692_v50 }
 0x37c   :  { %v3110_v1 = vpop.f32.mrb[8].mxu1 }
 0x37d   :  { %v793_v2 = vpop.f32.mrb[9].mxu1  ;;  %v799_v45 = vadd.f32 %v3110_v1, %v3996_v0 }
 0x37e   :  { %v794_v3 = vadd.f32 %v3996_v0, %v793_v2 }
 0x380   :  { %v918_v4 = vadd.f32 %v914_v62, %v794_v3  ;;  %v223_v62 = vsel %vm216_vm3, %v188_v54, 0.0  ;;  %v235_v3 = vsel %vm216_vm3, %v4047_v56, 0.0 }
 0x382   :  { %3456 = vtanh.f32 %v918_v4  ;;  %v2887_v7 = vmul.f32 -1.442695, %v918_v4 }
 0x384   :  { %3458 = vpow2.f32 %v2887_v7 }
 0x38c   :  { %v3457_v6 = vpop.eup %3456 }
 0x38d   :  { %928 = vrot.lane.b32.xlu1 %v3457_v6, %s3696_s17 }
 0x38e   :  { %v3459_v8 = vpop.eup %3458 }
 0x38f   :  { %v922_v9 = vadd.f32 1.0, %v3459_v8 }
 0x391   :  { %3460 = vrcp.f32 %v922_v9 }
 0x39b   :  { %v3461_v10 = vpop.eup %3460 }
 0x39c   :  { %v926_v16 = vmul.f32 0.0, %v3461_v10 }
 0x3ff   :  { %v929_v11 = vpop.permute.xlu1 %928 }
 0x400   :  { %v931_v13 = vmul.f32 %v3461_v10, %v929_v11 }
 0x402   :  { %933 = vrot.lane.b32.xlu1 %v931_v13, %s3697_s2 }
 0x474   :  { %v934_v17 = vpop.permute.xlu1 %933 }
 0x475   :  { %v4001_v19 = vadd.f32 %v934_v17, %v926_v16 }
 0x477   :  { %3462 = vtanh.f32 %v4001_v19 }
 0x481   :  { %v3463_v20 = vpop.eup %3462 }
 0x482   :  { %939 = vrot.lane.b32.xlu0 %v3463_v20, %s3696_s17 }
 0x4a1   :  { %509 = vadd.xlane.f32.xlu0 %v508_v22 }
 0x4f4   :  { %v940_v23 = vpop.permute.xlu0 %939 }
 0x4f5   :  { %v942_v25 = vmul.f32 %v3461_v10, %v940_v23 }
 0x4f7   :  { %944 = vrot.lane.b32.xlu1 %v942_v25, %s3697_s2 }
 0x51b   :  { %512 = vadd.xlane.f32.xlu1 %v511_v28 }
 0x51f   :  { %515 = vadd.xlane.f32.xlu1 %v514_v30 }
 0x523   :  { %518 = vadd.xlane.f32.xlu1 %v517_v32 }
 0x527   :  { %521 = vadd.xlane.f32.xlu1 %v520_v34 }
 0x52b   :  { %524 = vadd.xlane.f32.xlu1 %v523_v37 }
 0x52e   :  { %v510_v51 = vpop.xlane.xlu0 %509 }
 0x52f   :  { %227 = vadd.xlane.f32.xlu1 %v226_v41  ;;  %v528_v55 = vmul.f32 0.0625, %v510_v51  ;;  %v213_v41 = vadd.f32 %v3989_v59, %v3837_v18 }
 0x531   :  { %v4049_v57 = vsub.f32 %v474_v21, %v528_v55 }
 0x533   :  { %230 = vadd.xlane.f32.xlu1 %v229_v12  ;;  %v544_v52 = vmul.f32 %v4049_v57, %v4049_v57  ;;  %v238_v12 = vsel %vm216_vm3, %v213_v41, 0.0 }
 0x535   :  { %v556_v7 = vsel %vm216_vm3, %v544_v52, 0.0 }
 0x537   :  { %233 = vadd.xlane.f32.xlu1 %v232_v43 }
 0x569   :  { %v945_v44 = vpop.permute.xlu1 %944 }
 0x56a   :  { %947 = vst.msk [vmem:[#allocation2] sm:$0xff] %vm86_vm2, %v945_v44  ;;  %3140 = vmatmul.mubr.msk.f32.vlgmr.msra.gmra.mrb[10].mxu0 %vm86_vm2, %v945_v44 }
 0x56b   :  { %3352 = vmatpush3.bf16.msra.mxu0 %v3882_v61  ;;  %3161 = vmatprep.mubr.msk.f32.mxu0 %vm3694_vm4, %v3695_v24 }
 0x56c   :  { %3353 = vmatprep.subr.bf16.mxu0 %v3692_v50 }
 0x56f   :  { %3355 = vmatpush3.bf16.msra.mxu0 %v3931_v15 }
 0x570   :  { %3362 = vmatprep.subr.bf16.mxu0 %v3692_v50 }
 0x5a8   :  { %v513_v49 = vpop.xlane.xlu1 %512 }
 0x5a9   :  { %v529_v58 = vmul.f32 0.0625, %v513_v49 }
 0x5ab   :  { %v4052_v1 = vsub.f32 %v479_v26, %v529_v58 }
 0x5ac   :  { %v516_v53 = vpop.xlane.xlu1 %515 }
 0x5ad   :  { %v530_v2 = vmul.f32 0.0625, %v516_v53  ;;  %v545_v8 = vmul.f32 %v4052_v1, %v4052_v1 }
 0x5af   :  { %v4058_v60 = vsub.f32 %v484_v27, %v530_v2  ;;  %v559_v11 = vsel %vm216_vm3, %v545_v8, 0.0 }
 0x5b0   :  { %v519_v63 = vpop.xlane.xlu1 %518 }
 0x5b1   :  { %v531_v6 = vmul.f32 0.0625, %v519_v63  ;;  %v546_v13 = vmul.f32 %v4058_v60, %v4058_v60 }
 0x5b3   :  { %v4063_v9 = vsub.f32 %v489_v29, %v531_v6  ;;  %v562_v21 = vsel %vm216_vm3, %v546_v13, 0.0 }
 0x5b4   :  { %v522_v4 = vpop.xlane.xlu1 %521 }
 0x5b5   :  { %v532_v10 = vmul.f32 0.0625, %v522_v4  ;;  %v547_v22 = vmul.f32 %v4063_v9, %v4063_v9 }
 0x5b7   :  { %v4068_v17 = vsub.f32 %v494_v31, %v532_v10  ;;  %v565_v25 = vsel %vm216_vm3, %v547_v22, 0.0 }
 0x5b8   :  { %v525_v16 = vpop.xlane.xlu1 %524 }
 0x5b9   :  { %v533_v20 = vmul.f32 0.0625, %v525_v16  ;;  %v548_v26 = vmul.f32 %v4068_v17, %v4068_v17 }
 0x5bb   :  { %v4073_v23 = vsub.f32 %v499_v33, %v533_v20  ;;  %v568_v27 = vsel %vm216_vm3, %v548_v26, 0.0 }
 0x5bc   :  { %v228_v43 = vpop.xlane.xlu1 %227 }
 0x5bd   :  { %v549_v28 = vmul.f32 %v4073_v23, %v4073_v23 }
 0x5bf   :  { %v571_v29 = vsel %vm216_vm3, %v549_v28, 0.0 }
 0x5c0   :  { %v231_v44 = vpop.xlane.xlu1 %230 }
 0x5c4   :  { %v234_v51 = vpop.xlane.xlu1 %233 }
 0x5c5   :  { %v247_v59 = vmul.f32 0.0625, %v234_v51 }
 0x63d   :  { %v1018_v46 = vpop.f32.mrb[10].mxu0 }
 0x63e   :  { %v1022_v42 = vadd.f32 %v1018_v46, %v799_v45  ;;  %v3141_v47 = vpop.f32.mrb[11].mxu0  ;;  %v245_v45 = vmul.f32 0.0625, %v228_v43 }
 0x640   :  { %3464 = vtanh.f32 %v1022_v42  ;;  %v2889_v30 = vmul.f32 -1.442695, %v1022_v42  ;;  %v4090_v47 = vsub.f32 %v4018_v36, %v245_v45  ;;  %v4103_v36 = vsub.f32 %v4027_v38, %v247_v59 }
 0x642   :  { %3466 = vpow2.f32 %v2889_v30  ;;  %v261_v58 = vmul.f32 %v4090_v47, %v4090_v47 }
 0x64a   :  { %v3465_v48 = vpop.eup %3464 }
 0x64b   :  { %1032 = vrot.lane.b32.xlu0 %v3465_v48, %s3696_s17  ;;  %v246_v48 = vmul.f32 0.0625, %v231_v44 }
 0x64c   :  { %v3467_v31 = vpop.eup %3466 }
 0x64d   :  { %v1026_v32 = vadd.f32 1.0, %v3467_v31  ;;  %v4097_v18 = vsub.f32 %v4022_v40, %v246_v48  ;;  %v263_v40 = vmul.f32 %v4103_v36, %v4103_v36 }
 0x64f   :  { %3468 = vrcp.f32 %v1026_v32  ;;  %v281_v2 = vsel %vm216_vm3, %v263_v40, 0.0 }
 0x659   :  { %v4082_v33 = vpop.eup %3468 }
 0x66a   :  { %224 = vadd.xlane.f32.xlu0 %v223_v62  ;;  %v262_v62 = vmul.f32 %v4097_v18, %v4097_v18 }
 0x66c   :  { %v278_v63 = vsel %vm216_vm3, %v262_v62, 0.0 }
 0x66e   :  { %236 = vadd.xlane.f32.xlu0 %v235_v3  ;;  %v1030_v3 = vmul.f32 %v4082_v33, %v4001_v19 }
 0x672   :  { %557 = vadd.xlane.f32.xlu0 %v556_v7 }
 0x676   :  { %560 = vadd.xlane.f32.xlu0 %v559_v11 }
 0x67a   :  { %563 = vadd.xlane.f32.xlu0 %v562_v21 }
 0x67e   :  { %566 = vadd.xlane.f32.xlu0 %v565_v25 }
 0x682   :  { %569 = vadd.xlane.f32.xlu0 %v568_v27 }
 0x686   :  { %572 = vadd.xlane.f32.xlu0 %v571_v29 }
 0x6bd   :  { %v1033_v34 = vpop.permute.xlu0 %1032 }
 0x6be   :  { %v1035_v37 = vmul.f32 %v4082_v33, %v1033_v34 }
 0x6c0   :  { %1037 = vrot.lane.b32.xlu1 %v1035_v37, %s3697_s2 }
 0x6e4   :  { %239 = vadd.xlane.f32.xlu1 %v238_v12 }
 0x6f7   :  { %v225_v46 = vpop.xlane.xlu0 %224 }
 0x6f8   :  { %v244_v42 = vmul.f32 0.0625, %v225_v46 }
 0x6fa   :  { %v4092_v49 = vsub.f32 %v188_v54, %v244_v42  ;;  %v275_v54 = vsel %vm216_vm3, %v261_v58, 0.0 }
 0x6fb   :  { %v237_v4 = vpop.xlane.xlu0 %236 }
 0x6fc   :  { %v260_v53 = vmul.f32 %v4092_v49, %v4092_v49  ;;  %v248_v11 = vmul.f32 0.0625, %v237_v4 }
 0x6fe   :  { %v272_v55 = vsel %vm216_vm3, %v260_v53, 0.0  ;;  %v4119_v16 = vsub.f32 %v4047_v56, %v248_v11 }
 0x6ff   :  { %273 = vadd.xlane.f32.xlu1 %v272_v55  ;;  %v558_v7 = vpop.xlane.xlu0 %557 }
 0x700   :  { %v264_v19 = vmul.f32 %v4119_v16, %v4119_v16  ;;  %v576_v26 = vmul.f32 0.0625, %v558_v7 }
 0x702   :  { %v284_v22 = vsel %vm216_vm3, %v264_v19, 0.0  ;;  %v584_v28 = vadd.f32 1e-06, %v576_v26 }
 0x703   :  { %276 = vadd.xlane.f32.xlu1 %v275_v54  ;;  %v561_v8 = vpop.xlane.xlu0 %560 }
 0x704   :  { %v577_v29 = vmul.f32 0.0625, %v561_v8 }
 0x706   :  { %v585_v34 = vadd.f32 1e-06, %v577_v29 }
 0x707   :  { %279 = vadd.xlane.f32.xlu1 %v278_v63  ;;  %v564_v10 = vpop.xlane.xlu0 %563 }
 0x708   :  { %v578_v37 = vmul.f32 0.0625, %v564_v10 }
 0x70b   :  { %282 = vadd.xlane.f32.xlu1 %v281_v2  ;;  %v567_v13 = vpop.xlane.xlu0 %566 }
 0x70c   :  { %v579_v20 = vmul.f32 0.0625, %v567_v13 }
 0x70e   :  { %v587_v21 = vadd.f32 1e-06, %v579_v20 }
 0x70f   :  { %v570_v56 = vpop.xlane.xlu0 %569 }
 0x710   :  { %v580_v45 = vmul.f32 0.0625, %v570_v56 }
 0x712   :  { %v588_v48 = vadd.f32 1e-06, %v580_v45 }
 0x713   :  { %v573_v46 = vpop.xlane.xlu0 %572 }
 0x714   :  { %v581_v51 = vmul.f32 0.0625, %v573_v46 }
 0x716   :  { %v589_v59 = vadd.f32 1e-06, %v581_v51 }
 0x732   :  { %v1038_v38 = vpop.permute.xlu1 %1037 }
 0x733   :  { %v4114_v52 = vadd.f32 %v1038_v38, %v1030_v3 }
 0x735   :  { %3470 = vtanh.f32 %v4114_v52 }
 0x736   :  { %3472 = vrsqrt.f32 %v587_v21 }
 0x737   :  { %3474 = vrsqrt.f32 %v584_v28 }
 0x738   :  { %3476 = vrsqrt.f32 %v585_v34 }
 0x73f   :  { %v3471_v6 = vpop.eup %3470 }
 0x740   :  { %1043 = vrot.lane.b32.xlu0 %v3471_v6, %s3696_s17  ;;  %v3473_v25 = vpop.eup %3472 }
 0x741   :  { %v603_v27 = vmul.f32 %v3473_v25, %v4063_v9  ;;  %v586_v9 = vadd.f32 1e-06, %v578_v37  ;;  %v3475_v53 = vpop.eup %3474 }
 0x742   :  { %v3477_v55 = vpop.eup %3476 }
 0x743   :  { %v618_v30 = vmul.f32 %v3911_v5, %v603_v27  ;;  %3478 = vrsqrt.f32 %v586_v9  ;;  %v601_v54 = vmul.f32 %v3477_v55, %v4052_v1 }
 0x744   :  { %3480 = vrsqrt.f32 %v588_v48 }
 0x745   :  { %v633_v12 = vadd.f32 %v3929_v14, %v618_v30  ;;  %3482 = vrsqrt.f32 %v589_v59  ;;  %v616_v40 = vmul.f32 %v3911_v5, %v601_v54 }
 0x747   :  { %v631_v38 = vadd.f32 %v3929_v14, %v616_v40 }
 0x74d   :  { %v3479_v62 = vpop.eup %3478 }
 0x74e   :  { %v602_v2 = vmul.f32 %v3479_v62, %v4058_v60  ;;  %v3481_v3 = vpop.eup %3480 }
 0x74f   :  { %v604_v4 = vmul.f32 %v3481_v3, %v4068_v17  ;;  %v3483_v6 = vpop.eup %3482 }
 0x750   :  { %v605_v8 = vmul.f32 %v3483_v6, %v4073_v23 }
 0x751   :  { %v619_v7 = vmul.f32 %v3911_v5, %v604_v4 }
 0x752   :  { %v620_v10 = vmul.f32 %v3911_v5, %v605_v8 }
 0x753   :  { %v634_v60 = vadd.f32 %v3929_v14, %v619_v7 }
 0x754   :  { %v635_v11 = vadd.f32 %v3929_v14, %v620_v10 }
 0x75f   :  { %285 = vadd.xlane.f32.xlu0 %v284_v22 }
 0x771   :  { %v240_v31 = vpop.xlane.xlu1 %239 }
 0x772   :  { %v249_v32 = vmul.f32 0.0625, %v240_v31 }
 0x774   :  { %v4127_v43 = vsub.f32 %v213_v41, %v249_v32  ;;  %v600_v41 = vmul.f32 %v3475_v53, %v4049_v57  ;;  %v617_v57 = vmul.f32 %v3911_v5, %v602_v2 }
 0x775   :  { %654 = vrot.lane.b32.xlu0 %v633_v12, %s3693_s1 }
 0x776   :  { %v265_v44 = vmul.f32 %v4127_v43, %v4127_v43  ;;  %v615_v58 = vmul.f32 %v3911_v5, %v600_v41  ;;  %v632_v1 = vadd.f32 %v3929_v14, %v617_v57 }
 0x778   :  { %v287_v42 = vsel %vm216_vm3, %v265_v44, 0.0  ;;  %v630_v63 = vadd.f32 %v3929_v14, %v615_v58 }
 0x779   :  { %288 = vadd.xlane.f32.xlu1 %v287_v42 }
 0x78a   :  { %648 = vrot.lane.b32.xlu1 %v630_v63, %s3693_s1 }
 0x78c   :  { %v274_v20 = vpop.xlane.xlu1 %273 }
 0x78d   :  { %v292_v14 = vmul.f32 0.0625, %v274_v20 }
 0x78e   :  { %650 = vrot.lane.b32.xlu1 %v631_v38, %s3693_s1 }
 0x78f   :  { %v300_v30 = vadd.f32 1e-06, %v292_v14 }
 0x790   :  { %v277_v21 = vpop.xlane.xlu1 %276 }
 0x792   :  { %652 = vrot.lane.b32.xlu1 %v632_v1, %s3693_s1 }
 0x794   :  { %v280_v23 = vpop.xlane.xlu1 %279 }
 0x795   :  { %v294_v34 = vmul.f32 0.0625, %v280_v23 }
 0x796   :  { %656 = vrot.lane.b32.xlu1 %v634_v60, %s3693_s1 }
 0x797   :  { %v302_v37 = vadd.f32 1e-06, %v294_v34 }
 0x798   :  { %v283_v19 = vpop.xlane.xlu1 %282 }
 0x799   :  { %v295_v22 = vmul.f32 0.0625, %v283_v19 }
 0x79a   :  { %658 = vrot.lane.b32.xlu1 %v635_v11, %s3693_s1 }
 0x79b   :  { %v303_v25 = vadd.f32 1e-06, %v295_v22 }
 0x79d   :  { %3484 = vrsqrt.f32 %v303_v25 }
 0x79e   :  { %3486 = vrsqrt.f32 %v300_v30 }
 0x7a7   :  { %v3485_v26 = vpop.eup %3484 }
 0x7a8   :  { %v319_v5 = vmul.f32 %v3485_v26, %v4103_v36  ;;  %v3487_v44 = vpop.eup %3486 }
 0x7a9   :  { %v316_v9 = vmul.f32 %v3487_v44, %v4092_v49 }
 0x7aa   :  { %v334_v27 = vmul.f32 %v3965_v35, %v319_v5 }
 0x7ab   :  { %v331_v46 = vmul.f32 %v3965_v35, %v316_v9 }
 0x7ac   :  { %v349_v29 = vadd.f32 %v3972_v39, %v334_v27 }
 0x7ad   :  { %v346_v41 = vadd.f32 %v3972_v39, %v331_v46 }
 0x7b2   :  { %v1044_v17 = vpop.permute.xlu0 %1043 }
 0x7b3   :  { %v1046_v13 = vmul.f32 %v4082_v33, %v1044_v17  ;;  %v293_v33 = vmul.f32 0.0625, %v277_v21 }
 0x7b5   :  { %1048 = vrot.lane.b32.xlu1 %v1046_v13, %s3697_s2  ;;  %v301_v32 = vadd.f32 1e-06, %v293_v33 }
 0x7b7   :  { %3488 = vrsqrt.f32 %v301_v32 }
 0x7b8   :  { %3490 = vrsqrt.f32 %v302_v37 }
 0x7c1   :  { %v3489_v45 = vpop.eup %3488 }
 0x7c2   :  { %v317_v42 = vmul.f32 %v3489_v45, %v4090_v47  ;;  %v3491_v48 = vpop.eup %3490 }
 0x7c3   :  { %v318_v58 = vmul.f32 %v3491_v48, %v4097_v18 }
 0x7c4   :  { %v332_v55 = vmul.f32 %v3965_v35, %v317_v42 }
 0x7c5   :  { %v333_v47 = vmul.f32 %v3965_v35, %v318_v58 }
 0x7c6   :  { %v347_v63 = vadd.f32 %v3972_v39, %v332_v55 }
 0x7c7   :  { %v348_v18 = vadd.f32 %v3972_v39, %v333_v47 }
 0x7ec   :  { %v286_v28 = vpop.xlane.xlu0 %285 }
 0x7ed   :  { %v296_v12 = vmul.f32 0.0625, %v286_v28 }
 0x7ef   :  { %v304_v36 = vadd.f32 1e-06, %v296_v12 }
 0x7f0   :  { %v655_v31 = vpop.permute.xlu0 %654 }
 0x7f1   :  { %v673_v56 = vsel %vm216_vm3, %v349_v29, %v655_v31  ;;  %3492 = vrsqrt.f32 %v304_v36 }
 0x7f2   :  { %681 = vst.msk [vmem:[#allocation2 + $0x28] sm:$0xff] %vm86_vm2, %v673_v56 }
 0x7f9   :  { %v689_v23 = vld [vmem:[#allocation2 + $0x28] sm:$0xff] }
 0x7fb   :  { %v3493_v54 = vpop.eup %3492 }
 0x7fc   :  { %v320_v40 = vmul.f32 %v3493_v54, %v4119_v16 }
 0x7fe   :  { %v335_v38 = vmul.f32 %v3965_v35, %v320_v40 }
 0x800   :  { %v350_v16 = vadd.f32 %v3972_v39, %v335_v38 }
 0x806   :  { %v289_v51 = vpop.xlane.xlu1 %288 }
 0x807   :  { %v297_v53 = vmul.f32 0.0625, %v289_v51 }
 0x809   :  { %v305_v59 = vadd.f32 1e-06, %v297_v53 }
 0x80a   :  { %v649_v62 = vpop.permute.xlu1 %648 }
 0x80b   :  { %3494 = vrsqrt.f32 %v305_v59  ;;  %v670_v49 = vsel %vm216_vm3, %v346_v41, %v649_v62 }
 0x80c   :  { %678 = vst.msk [vmem:[#allocation2 + $0x10] sm:$0xff] %vm86_vm2, %v670_v49 }
 0x80e   :  { %v651_v2 = vpop.permute.xlu1 %650 }
 0x80f   :  { %v671_v3 = vsel %vm216_vm3, %v347_v63, %v651_v2 }
 0x810   :  { %679 = vst.msk [vmem:[#allocation2 + $0x18] sm:$0xff] %vm86_vm2, %v671_v3 }
 0x812   :  { %v653_v57 = vpop.permute.xlu1 %652 }
 0x813   :  { %v672_v4 = vsel %vm216_vm3, %v348_v18, %v653_v57  ;;  %v686_v6 = vld [vmem:[#allocation2 + $0x10] sm:$0xff] }
 0x814   :  { %680 = vst.msk [vmem:[#allocation2 + $0x20] sm:$0xff] %vm86_vm2, %v672_v4  ;;  %3111 = vmatprep.mubr.msk.f32.mxu1 %vm86_vm2, %v686_v6 }
 0x815   :  { %v3495_v1 = vpop.eup %3494 }
 0x816   :  { %v657_v7 = vpop.permute.xlu1 %656  ;;  %v321_v8 = vmul.f32 %v3495_v1, %v4127_v43 }
 0x817   :  { %v674_v60 = vsel %vm216_vm3, %v350_v16, %v657_v7  ;;  %v687_v10 = vld [vmem:[#allocation2 + $0x18] sm:$0xff] }
 0x818   :  { %682 = vst.msk [vmem:[#allocation2 + $0x30] sm:$0xff] %vm86_vm2, %v674_v60  ;;  %3112 = vmatmul.mubr.msk.f32.gmra.mrb[10].mxu1 %vm86_vm2, %v687_v10  ;;  %v336_v11 = vmul.f32 %v3965_v35, %v321_v8 }
 0x81a   :  { %v351_v17 = vadd.f32 %v3972_v39, %v336_v11  ;;  %v659_v13 = vpop.permute.xlu1 %658 }
 0x81b   :  { %v688_v20 = vld [vmem:[#allocation2 + $0x20] sm:$0xff] }
 0x81c   :  { %v675_v21 = vsel %vm216_vm3, %v351_v17, %v659_v13  ;;  %3114 = vmatprep.mubr.msk.f32.mxu1 %vm86_vm2, %v688_v20 }
 0x81d   :  { %683 = vst.msk [vmem:[#allocation2 + $0x38] sm:$0xff] %vm86_vm2, %v675_v21  ;;  %3115 = vmatmul.mubr.msk.f32.gmra.mrb[12].mxu1 %vm86_vm2, %v689_v23 }
 0x81f   :  { %v690_v43 = vld [vmem:[#allocation2 + $0x30] sm:$0xff] }
 0x820   :  { %3117 = vmatprep.mubr.msk.f32.mxu1 %vm86_vm2, %v690_v43 }
 0x824   :  { %v691_v19 = vld [vmem:[#allocation2 + $0x38] sm:$0xff] }
 0x825   :  { %3118 = vmatmul.mubr.msk.f32.gmra.mrb[14].mxu1 %vm86_vm2, %v691_v19 }
 0x826   :  { %3150 = vmatprep.mubr.msk.f32.mxu1 %vm3694_vm4, %v3695_v24 }
 0x827   :  { %v1049_v35 = vpop.permute.xlu1 %1048 }
 0x828   :  { %1052 = vst.msk [vmem:[#allocation2 + $0x8] sm:$0xff] %vm86_vm2, %v1049_v35 }
 0x829   :  { %3151 = vmatmul.mubr.msk.f32.vlgmr.msra.gmra.mrb[16].mxu1 %vm86_vm2, %v1049_v35 }
 0x82a   :  { %3358 = vmatpush3.bf16.msra.mxu1 %v3882_v61  ;;  %3172 = vmatprep.mubr.msk.f32.mxu1 %vm3694_vm4, %v3695_v24 }
 0x82b   :  { %3359 = vmatprep.subr.bf16.mxu1 %v3692_v50 }
 0x82e   :  { %3361 = vmatpush3.bf16.msra.mxu1 %v3931_v15 }
 0x82f   :  { %3368 = vmatprep.subr.bf16.mxu1 %v3692_v50 }
 0x8eb   :  { %v3113_v39 = vpop.f32.mrb[10].mxu1 }
 0x8ec   :  { %v803_v22 = vpop.f32.mrb[11].mxu1 }
 0x8ed   :  { %v804_v14 = vadd.f32 %v3996_v0, %v803_v22 }
 0x8f0   :  { %v4201_v25 = vpop.f32.mrb[12].mxu1 }
 0x8f1   :  { %v4203_v26 = vpop.f32.mrb[13].mxu1  ;;  %v819_v22 = vadd.f32 %v4201_v25, %v3996_v0 }
 0x8f2   :  { %v814_v4 = vadd.f32 %v3996_v0, %v4203_v26 }
 0x8f8   :  { %v4205_v5 = vpop.f32.mrb[14].mxu1 }
 0x8f9   :  { %v4207_v27 = vpop.f32.mrb[15].mxu1 }
 0x8fc   :  { %v1123_v28 = vpop.f32.mrb[16].mxu1 }
 0x8fd   :  { %v1127_v29 = vadd.f32 %v1123_v28, %v804_v14  ;;  %v3152_v30 = vpop.f32.mrb[17].mxu1 }
 0x8ff   :  { %3496 = vtanh.f32 %v1127_v29  ;;  %v2891_v31 = vmul.f32 -1.442695, %v1127_v29 }
 0x901   :  { %3498 = vpow2.f32 %v2891_v31 }
 0x909   :  { %v3497_v33 = vpop.eup %3496 }
 0x90a   :  { %1137 = vrot.lane.b32.xlu1 %v3497_v33, %s3696_s17 }
 0x90b   :  { %v3499_v56 = vpop.eup %3498 }
 0x90c   :  { %v1131_v32 = vadd.f32 1.0, %v3499_v56 }
 0x90e   :  { %3500 = vrcp.f32 %v1131_v32 }
 0x918   :  { %v3501_v34 = vpop.eup %3500 }
 0x919   :  { %v1135_v36 = vmul.f32 %v3501_v34, %v4114_v52  ;;  %v809_v52 = vadd.f32 %v3113_v39, %v3996_v0 }
 0x97c   :  { %v1138_v37 = vpop.permute.xlu1 %1137 }
 0x97d   :  { %v1140_v12 = vmul.f32 %v3501_v34, %v1138_v37  ;;  %v2902_v37 = vld [vmem:[%s4464_s10 + $0x20] sm:$0xff] }
 0x97f   :  { %1142 = vrot.lane.b32.xlu1 %v1140_v12, %s3697_s2  ;;  %v2903_v12 = vld [vmem:[%s4464_s10 + $0x28] sm:$0xff] }
 0x9f1   :  { %v1143_v44 = vpop.permute.xlu1 %1142 }
 0x9f2   :  { %v1145_v9 = vadd.f32 %v1143_v44, %v1135_v36  ;;  %v3380_v36 = vpack.c.bf16 %v2903_v12, %v2902_v37 }
 0x9f4   :  { %3502 = vtanh.f32 %v1145_v9 }
 0x9fe   :  { %v3503_v45 = vpop.eup %3502 }
 0x9ff   :  { %1148 = vrot.lane.b32.xlu1 %v3503_v45, %s3696_s17 }
 0xa71   :  { %v1149_v46 = vpop.permute.xlu1 %1148 }
 0xa72   :  { %v1151_v42 = vmul.f32 %v3501_v34, %v1149_v46  ;;  %v2904_v46 = vld [vmem:[%s4464_s10 + $0x30] sm:$0xff] }
 0xa74   :  { %1153 = vrot.lane.b32.xlu0 %v1151_v42, %s3697_s2  ;;  %v2905_v42 = vld [vmem:[%s4464_s10 + $0x38] sm:$0xff] }
 0xae6   :  { %v1154_v48 = vpop.permute.xlu0 %1153 }
 0xae7   :  { %1157 = vst.msk [vmem:[#allocation2 + $0x10] sm:$0xff] %vm86_vm2, %v1154_v48  ;;  %3162 = vmatmul.mubr.msk.f32.vlgmr.msra.gmra.mrb[12].mxu0 %vm86_vm2, %v1154_v48  ;;  %v3384_v48 = vpack.c.bf16 %v2905_v42, %v2904_v46 }
 0xae8   :  { %3364 = vmatpush3.bf16.msra.mxu0 %v3882_v61  ;;  %3183 = vmatprep.mubr.msk.f32.mxu0 %vm3694_vm4, %v3695_v24 }
 0xae9   :  { %3365 = vmatprep.subr.bf16.mxu0 %v3692_v50 }
 0xaec   :  { %3367 = vmatpush3.bf16.msra.mxu0 %v3931_v15 }
 0xaed   :  { %3374 = vmatprep.subr.bf16.mxu0 %v3692_v50 }
 0xbba   :  { %v1228_v51 = vpop.f32.mrb[12].mxu0 }
 0xbbb   :  { %v1232_v53 = vadd.f32 %v1228_v51, %v809_v52  ;;  %v3163_v59 = vpop.f32.mrb[13].mxu0  ;;  %v1683_v51 = vld [vmem:[#allocation2] sm:$0xff] }
 0xbbc   :  { %v1685_v59 = vld [vmem:[#allocation2 + $0x10] sm:$0xff] }
 0xbbd   :  { %3504 = vtanh.f32 %v1232_v53  ;;  %v2893_v55 = vmul.f32 -1.442695, %v1232_v53  ;;  %v1684_v53 = vld [vmem:[#allocation2 + $0x8] sm:$0xff] }
 0xbbf   :  { %3506 = vpow2.f32 %v2893_v55 }
 0xbc7   :  { %v3505_v41 = vpop.eup %3504 }
 0xbc8   :  { %1242 = vrot.lane.b32.xlu1 %v3505_v41, %s3696_s17 }
 0xbc9   :  { %v3507_v58 = vpop.eup %3506 }
 0xbca   :  { %v1236_v54 = vadd.f32 1.0, %v3507_v58 }
 0xbcc   :  { %3508 = vrcp.f32 %v1236_v54  ;;  %v824_v54 = vadd.f32 %v3996_v0, %v4207_v27 }
 0xbd6   :  { %v3509_v62 = vpop.eup %3508 }
 0xbd7   :  { %v1240_v47 = vmul.f32 %v3509_v62, %v1145_v9 }
 0xc3a   :  { %v1243_v49 = vpop.permute.xlu1 %1242 }
 0xc3b   :  { %v1245_v63 = vmul.f32 %v3509_v62, %v1243_v49 }
 0xc3d   :  { %1247 = vrot.lane.b32.xlu0 %v1245_v63, %s3697_s2 }
 0xcaf   :  { %v1248_v40 = vpop.permute.xlu0 %1247 }
 0xcb0   :  { %v1250_v2 = vadd.f32 %v1248_v40, %v1240_v47 }
 0xcb2   :  { %3510 = vtanh.f32 %v1250_v2 }
 0xcbc   :  { %v3511_v3 = vpop.eup %3510 }
 0xcbd   :  { %1253 = vrot.lane.b32.xlu1 %v3511_v3, %s3696_s17 }
 0xd2f   :  { %v1254_v18 = vpop.permute.xlu1 %1253 }
 0xd30   :  { %v1256_v38 = vmul.f32 %v3509_v62, %v1254_v18 }
 0xd32   :  { %1258 = vrot.lane.b32.xlu0 %v1256_v38, %s3697_s2 }
 0xda4   :  { %v1259_v57 = vpop.permute.xlu0 %1258 }
 0xda5   :  { %1262 = vst.msk [vmem:[#allocation2 + $0x18] sm:$0xff] %vm86_vm2, %v1259_v57  ;;  %3173 = vmatmul.mubr.msk.f32.vlgmr.msra.gmra.mrb[18].mxu1 %vm86_vm2, %v1259_v57 }
 0xda6   :  { %3370 = vmatpush3.bf16.msra.mxu1 %v3882_v61  ;;  %3194 = vmatprep.mubr.msk.f32.mxu1 %vm3694_vm4, %v3695_v24 }
 0xda7   :  { %3371 = vmatprep.subr.bf16.mxu1 %v3692_v50 }
 0xdaa   :  { %3373 = vmatpush3.bf16.msra.mxu1 %v3931_v15 }
 0xdab   :  { %3381 = vmatprep.subr.bf16.mxu1 %v3380_v36 }
 0xdac   :  { %v1686_v41 = vld [vmem:[#allocation2 + $0x18] sm:$0xff] }
 0xe78   :  { %v1333_v6 = vpop.f32.mrb[18].mxu1 }
 0xe79   :  { %v1337_v1 = vadd.f32 %v1333_v6, %v814_v4  ;;  %v3174_v16 = vpop.f32.mrb[19].mxu1 }
 0xe7b   :  { %3512 = vtanh.f32 %v1337_v1  ;;  %v2895_v8 = vmul.f32 -1.442695, %v1337_v1 }
 0xe7d   :  { %3514 = vpow2.f32 %v2895_v8 }
 0xe85   :  { %v3513_v7 = vpop.eup %3512 }
 0xe86   :  { %1347 = vrot.lane.b32.xlu1 %v3513_v7, %s3696_s17 }
 0xe87   :  { %v3515_v60 = vpop.eup %3514 }
 0xe88   :  { %v1341_v10 = vadd.f32 1.0, %v3515_v60 }
 0xe8a   :  { %3516 = vrcp.f32 %v1341_v10 }
 0xe94   :  { %v3517_v11 = vpop.eup %3516 }
 0xe95   :  { %v1345_v20 = vmul.f32 %v3517_v11, %v1250_v2 }
 0xef8   :  { %v1348_v17 = vpop.permute.xlu1 %1347 }
 0xef9   :  { %v1350_v13 = vmul.f32 %v3517_v11, %v1348_v17  ;;  %v1843_v17 = vld [vmem:[#allocation5 + $0x28] sm:$0xff] }
 0xefb   :  { %1352 = vrot.lane.b32.xlu0 %v1350_v13, %s3697_s2 }
 0xf6d   :  { %v1353_v21 = vpop.permute.xlu0 %1352 }
 0xf6e   :  { %v1355_v23 = vadd.f32 %v1353_v21, %v1345_v20  ;;  %v1844_v20 = vld [vmem:[#allocation5 + $0x30] sm:$0xff]  ;;  %v1845_v21 = vld [vmem:[#allocation5 + $0x38] sm:$0xff] }
 0xf70   :  { %3518 = vtanh.f32 %v1355_v23 }
 0xf7a   :  { %v3519_v43 = vpop.eup %3518 }
 0xf7b   :  { %1358 = vrot.lane.b32.xlu1 %v3519_v43, %s3696_s17 }
 0xfed   :  { %v1359_v19 = vpop.permute.xlu1 %1358 }
 0xfee   :  { %v1361_v35 = vmul.f32 %v3517_v11, %v1359_v19  ;;  %v1842_v11 = vld [vmem:[#allocation5 + $0x20] sm:$0xff] }
 0xfef   :  { %v4294_v13 = vpack.c.bf16 %v1843_v17, %v1842_v11 }
 0xff0   :  { %1363 = vrot.lane.b32.xlu0 %v1361_v35, %s3697_s2 }
0x1062   :  { %v1364_v39 = vpop.permute.xlu0 %1363 }
0x1063   :  { %1367 = vst.msk [vmem:[#allocation2 + $0x20] sm:$0xff] %vm86_vm2, %v1364_v39  ;;  %3184 = vmatmul.mubr.msk.f32.vlgmr.msra.gmra.mrb[14].mxu0 %vm86_vm2, %v1364_v39 }
0x1064   :  { %3376 = vmatpush3.bf16.msra.mxu0 %v3882_v61  ;;  %3205 = vmatprep.mubr.msk.f32.mxu0 %vm3694_vm4, %v3695_v24 }
0x1065   :  { %3377 = vmatprep.subr.bf16.mxu0 %v3692_v50 }
0x1068   :  { %3379 = vmatpush3.bf16.msra.mxu0 %v3931_v15 }
0x1069   :  { %3388 = vmatprep.subr.bf16.mxu0 %v3692_v50 }
0x106a   :  { %v1687_v55 = vld [vmem:[#allocation2 + $0x20] sm:$0xff] }
0x1136   :  { %v1438_v26 = vpop.f32.mrb[14].mxu0 }
0x1137   :  { %v1442_v14 = vadd.f32 %v1438_v26, %v819_v22  ;;  %v3185_v28 = vpop.f32.mrb[15].mxu0  ;;  %v3640_v22 = vld [vmem:[%s4466_s12] ss:$0 sm:$0xff] }
0x1138   :  { %v829_v26 = vadd.f32 %v3640_v22, %v4205_v5 }
0x1139   :  { %3520 = vtanh.f32 %v1442_v14  ;;  %v2897_v61 = vmul.f32 -1.442695, %v1442_v14 }
0x113b   :  { %3522 = vpow2.f32 %v2897_v61  ;;  %v4326_v61 = vld [vmem:[%s4466_s12 + $0x1] ss:$0 sm:$0xff] }
0x1143   :  { %v3521_v29 = vpop.eup %3520 }
0x1144   :  { %1452 = vrot.lane.b32.xlu1 %v3521_v29, %s3696_s17 }
0x1145   :  { %v3523_v30 = vpop.eup %3522 }
0x1146   :  { %v1446_v33 = vadd.f32 1.0, %v3523_v30 }
0x1148   :  { %3524 = vrcp.f32 %v1446_v33 }
0x1152   :  { %v3525_v31 = vpop.eup %3524 }
0x1153   :  { %v1450_v32 = vmul.f32 %v3525_v31, %v1355_v23  ;;  %v4298_v23 = vpack.c.bf16 %v1845_v21, %v1844_v20 }
0x11b6   :  { %v1453_v56 = vpop.permute.xlu1 %1452 }
0x11b7   :  { %v1455_v15 = vmul.f32 %v3525_v31, %v1453_v56 }
0x11b9   :  { %1457 = vrot.lane.b32.xlu0 %v1455_v15, %s3697_s2 }
0x122b   :  { %v1458_v34 = vpop.permute.xlu0 %1457 }
0x122c   :  { %v1460_v25 = vadd.f32 %v1458_v34, %v1450_v32 }
0x122e   :  { %3526 = vtanh.f32 %v1460_v25 }
0x1238   :  { %v3527_v44 = vpop.eup %3526 }
0x1239   :  { %1463 = vrot.lane.b32.xlu1 %v3527_v44, %s3696_s17 }
0x12ab   :  { %v1464_v9 = vpop.permute.xlu1 %1463 }
0x12ac   :  { %v1466_v45 = vmul.f32 %v3525_v31, %v1464_v9 }
0x12ae   :  { %1468 = vrot.lane.b32.xlu0 %v1466_v45, %s3697_s2 }
0x1320   :  { %v1469_v52 = vpop.permute.xlu0 %1468 }
0x1321   :  { %1472 = vst.msk [vmem:[#allocation2 + $0x28] sm:$0xff] %vm86_vm2, %v1469_v52  ;;  %3195 = vmatmul.mubr.msk.f32.vlgmr.msra.gmra.mrb[20].mxu1 %vm86_vm2, %v1469_v52 }
0x1322   :  { %3383 = vmatpush3.bf16.msra.mxu1 %v3380_v36  ;;  %3216 = vmatprep.mubr.msk.f32.mxu1 %vm86_vm2, %v1683_v51 }
0x1323   :  { %3385 = vmatprep.subr.bf16.mxu1 %v3384_v48 }
0x1326   :  { %3387 = vmatpush3.bf16.msra.mxu1 %v3384_v48 }
0x1327   :  { %3400 = vmatprep.subr.bf16.mxu1 %v3692_v50 }
0x1328   :  { %v1688_v58 = vld [vmem:[#allocation2 + $0x28] sm:$0xff] }
0x1329   :  { %3217 = vmatmul.mubr.msk.f32.vlgmr.msra.gmra.mrb[22].mxu1 %vm86_vm2, %v1684_v53 }
0x132a   :  { %3219 = vmatprep.mubr.msk.f32.mxu1 %vm86_vm2, %v1685_v59  ;;  %3402 = vmatpush3.bf16.msra.mxu1 %v4294_v13 }
0x132b   :  { %3403 = vmatprep.subr.bf16.mxu1 %v3692_v50 }
0x132d   :  { %3220 = vmatmul.mubr.msk.f32.gmra.mrb[24].mxu1 %vm86_vm2, %v1686_v41 }
0x132e   :  { %3222 = vmatprep.mubr.msk.f32.mxu1 %vm86_vm2, %v1687_v55  ;;  %3405 = vmatpush3.bf16.msra.mxu1 %v4298_v23 }
0x132f   :  { %3412 = vmatprep.subr.bf16.mxu1 %v3692_v50 }
0x1331   :  { %3223 = vmatmul.mubr.msk.f32.gmra.mrb[26].mxu1 %vm86_vm2, %v1688_v58 }
0x13f4   :  { %v1543_v62 = vpop.f32.mrb[20].mxu1 }
0x13f5   :  { %v1547_v49 = vadd.f32 %v1543_v62, %v824_v54  ;;  %v3196_v63 = vpop.f32.mrb[21].mxu1 }
0x13f7   :  { %3528 = vtanh.f32 %v1547_v49  ;;  %v2899_v4 = vmul.f32 -1.442695, %v1547_v49 }
0x13f9   :  { %3530 = vpow2.f32 %v2899_v4 }
0x13fc   :  { %v4278_v47 = vpop.f32.mrb[22].mxu1 }
0x13fd   :  { %v1794_v40 = vpop.f32.mrb[23].mxu1  ;;  %v1800_v4 = vadd.f32 %v4278_v47, %v4326_v61 }
0x13fe   :  { %v1795_v30 = vadd.f32 %v4326_v61, %v1794_v40 }
0x1400   :  { %v4280_v2 = vpop.f32.mrb[24].mxu1 }
0x1401   :  { %v3529_v3 = vpop.eup %3528  ;;  %v4282_v18 = vpop.f32.mrb[25].mxu1 }
0x1402   :  { %1557 = vrot.lane.b32.xlu1 %v3529_v3, %s3696_s17 }
0x1403   :  { %v3531_v0 = vpop.eup %3530 }
0x1404   :  { %v4285_v38 = vpop.f32.mrb[26].mxu1  ;;  %v1551_v27 = vadd.f32 1.0, %v3531_v0 }
0x1405   :  { %v4287_v57 = vpop.f32.mrb[27].mxu1 }
0x1406   :  { %3532 = vrcp.f32 %v1551_v27 }
0x1410   :  { %v3533_v6 = vpop.eup %3532 }
0x1411   :  { %v1555_v7 = vmul.f32 %v3533_v6, %v1460_v25 }
0x1474   :  { %v1558_v1 = vpop.permute.xlu1 %1557 }
0x1475   :  { %v1560_v16 = vmul.f32 %v3533_v6, %v1558_v1 }
0x1477   :  { %1562 = vrot.lane.b32.xlu0 %v1560_v16, %s3697_s2 }
0x14e9   :  { %v1563_v8 = vpop.permute.xlu0 %1562 }
0x14ea   :  { %v4290_v60 = vadd.f32 %v1563_v8, %v1555_v7 }
0x14ec   :  { %3534 = vtanh.f32 %v4290_v60 }
0x14f6   :  { %v3535_v10 = vpop.eup %3534 }
0x14f7   :  { %1568 = vrot.lane.b32.xlu1 %v3535_v10, %s3696_s17 }
0x1569   :  { %v1569_v43 = vpop.permute.xlu1 %1568 }
0x156a   :  { %v1571_v19 = vmul.f32 %v3533_v6, %v1569_v43 }
0x156c   :  { %1573 = vrot.lane.b32.xlu0 %v1571_v19, %s3697_s2 }
0x15de   :  { %v1574_v35 = vpop.permute.xlu0 %1573 }
0x15df   :  { %1577 = vst.msk [vmem:[#allocation2 + $0x30] sm:$0xff] %vm86_vm2, %v1574_v35  ;;  %3206 = vmatmul.mubr.msk.f32.vlgmr.msra.gmra.mrb[16].mxu0 %vm86_vm2, %v1574_v35 }
0x15e0   :  { %3390 = vmatpush3.bf16.msra.mxu0 %v4294_v13  ;;  %3236 = vmatprep.mubr.msk.f32.mxu0 %vm3694_vm4, %v3695_v24 }
0x15e1   :  { %3391 = vmatprep.subr.bf16.mxu0 %v3692_v50 }
0x15e4   :  { %3393 = vmatpush3.bf16.msra.mxu0 %v4298_v23 }
0x15e5   :  { %3394 = vmatprep.subr.bf16.mxu0 %v3692_v50 }
0x15e6   :  { %v1689_v39 = vld [vmem:[#allocation2 + $0x30] sm:$0xff] }
0x15e7   :  { %3237 = vmatmul.mubr.f32.vlgmr.msra.gmra.mrb[18].mxu0 %v3695_v24  ;;  %3225 = vmatprep.mubr.msk.f32.mxu1 %vm86_vm2, %v1689_v39 }
0x15e8   :  { %3396 = vmatpush3.bf16.msra.mxu0 %v4294_v13  ;;  %3247 = vmatprep.mubr.msk.f32.mxu0 %vm3694_vm4, %v3695_v24 }
0x15e9   :  { %3397 = vmatprep.subr.bf16.mxu0 %v3692_v50 }
0x15ec   :  { %3399 = vmatpush3.bf16.msra.mxu0 %v4298_v23 }
0x15ed   :  { %3406 = vmatprep.subr.bf16.mxu0 %v3692_v50 }
0x16b2   :  { %v1648_v14 = vpop.f32.mrb[16].mxu0 }
0x16b3   :  { %v1652_v28 = vadd.f32 %v1648_v14, %v829_v26  ;;  %v3207_v29 = vpop.f32.mrb[17].mxu0 }
0x16b5   :  { %v2901_v42 = vmul.f32 -1.442695, %v1652_v28 }
0x16ba   :  { %v1913_v33 = vpop.f32.mrb[18].mxu0 }
0x16bb   :  { %v1917_v31 = vadd.f32 %v1913_v33, %v1795_v30  ;;  %v3238_v56 = vpop.f32.mrb[19].mxu0 }
0x16bd   :  { %3536 = vtanh.f32 %v1917_v31  ;;  %v2916_v32 = vmul.f32 -1.442695, %v1917_v31 }
0x16bf   :  { %3538 = vpow2.f32 %v2916_v32 }
0x16c7   :  { %v3537_v15 = vpop.eup %3536 }
0x16c8   :  { %1927 = vrot.lane.b32.xlu1 %v3537_v15, %s3696_s17 }
0x16c9   :  { %v3539_v5 = vpop.eup %3538 }
0x16ca   :  { %v1921_v34 = vadd.f32 1.0, %v3539_v5 }
0x16cc   :  { %3540 = vrcp.f32 %v1921_v34 }
0x16d6   :  { %v3541_v25 = vpop.eup %3540 }
0x16d7   :  { %v1925_v36 = vmul.f32 0.0, %v3541_v25 }
0x173a   :  { %v1928_v37 = vpop.permute.xlu1 %1927 }
0x173b   :  { %v1930_v12 = vmul.f32 %v3541_v25, %v1928_v37 }
0x173d   :  { %1932 = vrot.lane.b32.xlu0 %v1930_v12, %s3697_s2 }
0x17af   :  { %v1933_v44 = vpop.permute.xlu0 %1932 }
0x17b0   :  { %v1935_v9 = vadd.f32 %v1933_v44, %v1925_v36 }
0x17b2   :  { %3542 = vtanh.f32 %v1935_v9 }
0x17b3   :  { %3544 = vtanh.f32 %v1652_v28  ;;  %v1805_v28 = vadd.f32 %v4326_v61, %v4282_v18 }
0x17b4   :  { %3546 = vpow2.f32 %v2901_v42 }
0x17bc   :  { %v3543_v45 = vpop.eup %3542 }
0x17bd   :  { %1938 = vrot.lane.b32.xlu1 %v3543_v45, %s3696_s17  ;;  %v3545_v46 = vpop.eup %3544 }
0x17be   :  { %v3547_v48 = vpop.eup %3546 }
0x17bf   :  { %v1656_v52 = vadd.f32 1.0, %v3547_v48 }
0x17c1   :  { %1662 = vrot.lane.b32.xlu1 %v3545_v46, %s3696_s17  ;;  %3548 = vrcp.f32 %v1656_v52  ;;  %v1810_v46 = vadd.f32 %v4280_v2, %v4326_v61 }
0x17cb   :  { %v3549_v59 = vpop.eup %3548 }
0x17cc   :  { %v1660_v54 = vmul.f32 %v3549_v59, %v4290_v60 }
0x182f   :  { %v1939_v51 = vpop.permute.xlu1 %1938 }
0x1830   :  { %v1941_v53 = vmul.f32 %v3541_v25, %v1939_v51 }
0x1832   :  { %1943 = vrot.lane.b32.xlu0 %v1941_v53, %s3697_s2 }
0x1833   :  { %v1663_v41 = vpop.permute.xlu1 %1662 }
0x1834   :  { %v1665_v55 = vmul.f32 %v3549_v59, %v1663_v41 }
0x1836   :  { %1667 = vrot.lane.b32.xlu1 %v1665_v55, %s3697_s2 }
0x18a4   :  { %v1944_v58 = vpop.permute.xlu0 %1943 }
0x18a5   :  { %1946 = vst.msk [vmem:[#allocation2] sm:$0xff] %vm86_vm2, %v1944_v58  ;;  %3248 = vmatmul.mubr.msk.f32.vlgmr.msra.gmra.mrb[20].mxu0 %vm86_vm2, %v1944_v58 }
0x18a6   :  { %3408 = vmatpush3.bf16.msra.mxu0 %v4294_v13  ;;  %3269 = vmatprep.mubr.msk.f32.mxu0 %vm3694_vm4, %v3695_v24 }
0x18a7   :  { %3409 = vmatprep.subr.bf16.mxu0 %v3692_v50 }
0x18a8   :  { %v1668_v62 = vpop.permute.xlu1 %1667 }
0x18a9   :  { %v1670_v49 = vadd.f32 %v1668_v62, %v1660_v54 }
0x18aa   :  { %3411 = vmatpush3.bf16.msra.mxu0 %v4298_v23 }
0x18ab   :  { %3550 = vtanh.f32 %v1670_v49  ;;  %3418 = vmatprep.subr.bf16.mxu0 %v3692_v50 }
0x18b5   :  { %v3551_v63 = vpop.eup %3550 }
0x18b6   :  { %1673 = vrot.lane.b32.xlu1 %v3551_v63, %s3696_s17 }
0x1928   :  { %v1674_v40 = vpop.permute.xlu1 %1673 }
0x1929   :  { %v1676_v3 = vmul.f32 %v3549_v59, %v1674_v40 }
0x192b   :  { %1678 = vrot.lane.b32.xlu1 %v1676_v3, %s3697_s2 }
0x1978   :  { %v2016_v0 = vpop.f32.mrb[20].mxu0 }
0x1979   :  { %v2020_v27 = vadd.f32 %v2016_v0, %v1800_v4  ;;  %v3249_v6 = vpop.f32.mrb[21].mxu0  ;;  %v1815_v0 = vadd.f32 %v4326_v61, %v4287_v57 }
0x197b   :  { %3552 = vtanh.f32 %v2020_v27  ;;  %v2918_v8 = vmul.f32 -1.442695, %v2020_v27 }
0x197d   :  { %3554 = vpow2.f32 %v2918_v8 }
0x1985   :  { %v3553_v1 = vpop.eup %3552 }
0x1986   :  { %2030 = vrot.lane.b32.xlu0 %v3553_v1, %s3696_s17 }
0x1987   :  { %v3555_v60 = vpop.eup %3554 }
0x1988   :  { %v2024_v47 = vadd.f32 1.0, %v3555_v60 }
0x198a   :  { %3556 = vrcp.f32 %v2024_v47 }
0x1994   :  { %v3557_v10 = vpop.eup %3556 }
0x1995   :  { %v2028_v20 = vmul.f32 %v3557_v10, %v1935_v9 }
0x199d   :  { %v1679_v16 = vpop.permute.xlu1 %1678 }
0x199e   :  { %1682 = vst.msk [vmem:[#allocation2 + $0x38] sm:$0xff] %vm86_vm2, %v1679_v16 }
0x19a5   :  { %v1690_v7 = vld [vmem:[#allocation2 + $0x38] sm:$0xff] }
0x19a6   :  { %3226 = vmatmul.mubr.msk.f32.gmra.mrb[28].mxu1 %vm86_vm2, %v1690_v7 }
0x19a7   :  { %3258 = vmatprep.mubr.msk.f32.mxu1 %vm3694_vm4, %v3695_v24 }
0x19f8   :  { %v2031_v11 = vpop.permute.xlu0 %2030 }
0x19f9   :  { %v2033_v17 = vmul.f32 %v3557_v10, %v2031_v11 }
0x19fb   :  { %2035 = vrot.lane.b32.xlu0 %v2033_v17, %s3697_s2 }
0x1a6d   :  { %v2036_v21 = vpop.permute.xlu0 %2035 }
0x1a6e   :  { %v2038_v43 = vadd.f32 %v2036_v21, %v2028_v20 }
0x1a70   :  { %3558 = vtanh.f32 %v2038_v43 }
0x1a79   :  { %v4354_v19 = vpop.f32.mrb[28].mxu1 }
0x1a7a   :  { %v3559_v35 = vpop.eup %3558  ;;  %v4356_v39 = vpop.f32.mrb[29].mxu1 }
0x1a7b   :  { %2041 = vrot.lane.b32.xlu0 %v3559_v35, %s3696_s17 }
0x1aed   :  { %v2042_v22 = vpop.permute.xlu0 %2041 }
0x1aee   :  { %v2044_v26 = vmul.f32 %v3557_v10, %v2042_v22 }
0x1af0   :  { %2046 = vrot.lane.b32.xlu0 %v2044_v26, %s3697_s2  ;;  %v1820_v26 = vadd.f32 %v4285_v38, %v4326_v61 }
0x1b62   :  { %v2047_v14 = vpop.permute.xlu0 %2046 }
0x1b63   :  { %2049 = vst.msk [vmem:[#allocation2 + $0x8] sm:$0xff] %vm86_vm2, %v2047_v14  ;;  %3259 = vmatmul.mubr.msk.f32.vlgmr.msra.gmra.mrb[30].mxu1 %vm86_vm2, %v2047_v14 }
0x1b64   :  { %3414 = vmatpush3.bf16.msra.mxu1 %v4294_v13  ;;  %3280 = vmatprep.mubr.msk.f32.mxu1 %vm3694_vm4, %v3695_v24 }
0x1b65   :  { %3415 = vmatprep.subr.bf16.mxu1 %v3692_v50 }
0x1b68   :  { %3417 = vmatpush3.bf16.msra.mxu1 %v4298_v23 }
0x1b69   :  { %3424 = vmatprep.subr.bf16.mxu1 %v3692_v50 }
0x1c36   :  { %v2119_v29 = vpop.f32.mrb[30].mxu1 }
0x1c37   :  { %v2123_v30 = vadd.f32 %v2119_v29, %v1805_v28  ;;  %v3260_v33 = vpop.f32.mrb[31].mxu1 }
0x1c39   :  { %3560 = vtanh.f32 %v2123_v30  ;;  %v2920_v56 = vmul.f32 -1.442695, %v2123_v30 }
0x1c3b   :  { %3562 = vpow2.f32 %v2920_v56 }
0x1c43   :  { %v3561_v31 = vpop.eup %3560 }
0x1c44   :  { %2133 = vrot.lane.b32.xlu1 %v3561_v31, %s3696_s17 }
0x1c45   :  { %v3563_v15 = vpop.eup %3562 }
0x1c46   :  { %v2127_v32 = vadd.f32 1.0, %v3563_v15 }
0x1c48   :  { %3564 = vrcp.f32 %v2127_v32 }
0x1c52   :  { %v3565_v5 = vpop.eup %3564 }
0x1c53   :  { %v2131_v37 = vmul.f32 %v3565_v5, %v2038_v43 }
0x1cb6   :  { %v2134_v34 = vpop.permute.xlu1 %2133 }
0x1cb7   :  { %v2136_v25 = vmul.f32 %v3565_v5, %v2134_v34 }
0x1cb9   :  { %2138 = vrot.lane.b32.xlu0 %v2136_v25, %s3697_s2 }
0x1d2b   :  { %v2139_v12 = vpop.permute.xlu0 %2138 }
0x1d2c   :  { %v2141_v18 = vadd.f32 %v2139_v12, %v2131_v37  ;;  %v1825_v37 = vadd.f32 %v4326_v61, %v4356_v39 }
0x1d2e   :  { %3566 = vtanh.f32 %v2141_v18 }
0x1d38   :  { %v3567_v36 = vpop.eup %3566 }
0x1d39   :  { %2144 = vrot.lane.b32.xlu1 %v3567_v36, %s3696_s17 }
0x1dab   :  { %v2145_v44 = vpop.permute.xlu1 %2144 }
0x1dac   :  { %v2147_v9 = vmul.f32 %v3565_v5, %v2145_v44 }
0x1dae   :  { %2149 = vrot.lane.b32.xlu0 %v2147_v9, %s3697_s2 }
0x1e20   :  { %v2150_v45 = vpop.permute.xlu0 %2149 }
0x1e21   :  { %2152 = vst.msk [vmem:[#allocation2 + $0x10] sm:$0xff] %vm86_vm2, %v2150_v45  ;;  %3270 = vmatmul.mubr.msk.f32.vlgmr.msra.gmra.mrb[22].mxu0 %vm86_vm2, %v2150_v45 }
0x1e22   :  { %3420 = vmatpush3.bf16.msra.mxu0 %v4294_v13  ;;  %3291 = vmatprep.mubr.msk.f32.mxu0 %vm3694_vm4, %v3695_v24 }
0x1e23   :  { %3421 = vmatprep.subr.bf16.mxu0 %v3692_v50 }
0x1e26   :  { %3423 = vmatpush3.bf16.msra.mxu0 %v4298_v23 }
0x1e27   :  { %3430 = vmatprep.subr.bf16.mxu0 %v3692_v50 }
0x1ef4   :  { %v2222_v42 = vpop.f32.mrb[22].mxu0 }
0x1ef5   :  { %v2226_v48 = vadd.f32 %v2222_v42, %v1810_v46  ;;  %v3271_v52 = vpop.f32.mrb[23].mxu0 }
0x1ef7   :  { %3568 = vtanh.f32 %v2226_v48  ;;  %v2922_v53 = vmul.f32 -1.442695, %v2226_v48 }
0x1ef9   :  { %3570 = vpow2.f32 %v2922_v53 }
0x1f01   :  { %v3569_v51 = vpop.eup %3568 }
0x1f02   :  { %2236 = vrot.lane.b32.xlu1 %v3569_v51, %s3696_s17 }
0x1f03   :  { %v3571_v59 = vpop.eup %3570 }
0x1f04   :  { %v2230_v41 = vadd.f32 1.0, %v3571_v59 }
0x1f06   :  { %3572 = vrcp.f32 %v2230_v41 }
0x1f10   :  { %v3573_v55 = vpop.eup %3572 }
0x1f11   :  { %v2234_v62 = vmul.f32 %v3573_v55, %v2141_v18 }
0x1f74   :  { %v2237_v58 = vpop.permute.xlu1 %2236 }
0x1f75   :  { %v2239_v54 = vmul.f32 %v3573_v55, %v2237_v58 }
0x1f77   :  { %2241 = vrot.lane.b32.xlu0 %v2239_v54, %s3697_s2  ;;  %v1830_v54 = vadd.f32 %v4354_v19, %v4326_v61 }
0x1fe9   :  { %v2242_v49 = vpop.permute.xlu0 %2241 }
0x1fea   :  { %v2244_v2 = vadd.f32 %v2242_v49, %v2234_v62 }
0x1fec   :  { %3574 = vtanh.f32 %v2244_v2 }
0x1ff6   :  { %v3575_v63 = vpop.eup %3574 }
0x1ff7   :  { %2247 = vrot.lane.b32.xlu1 %v3575_v63, %s3696_s17 }
0x2069   :  { %v2248_v40 = vpop.permute.xlu1 %2247 }
0x206a   :  { %v2250_v3 = vmul.f32 %v3573_v55, %v2248_v40 }
0x206c   :  { %2252 = vrot.lane.b32.xlu0 %v2250_v3, %s3697_s2 }
0x20de   :  { %v2253_v4 = vpop.permute.xlu0 %2252 }
0x20df   :  { %2255 = vst.msk [vmem:[#allocation2 + $0x18] sm:$0xff] %vm86_vm2, %v2253_v4  ;;  %3281 = vmatmul.mubr.msk.f32.vlgmr.msra.gmra.mrb[32].mxu1 %vm86_vm2, %v2253_v4 }
0x20e0   :  { %3426 = vmatpush3.bf16.msra.mxu1 %v4294_v13  ;;  %3302 = vmatprep.mubr.msk.f32.mxu1 %vm3694_vm4, %v3695_v24 }
0x20e1   :  { %3427 = vmatprep.subr.bf16.mxu1 %v3692_v50 }
0x20e4   :  { %3429 = vmatpush3.bf16.msra.mxu1 %v4298_v23 }
0x21b2   :  { %v2325_v27 = vpop.f32.mrb[32].mxu1 }
0x21b3   :  { %v2329_v6 = vadd.f32 %v2325_v27, %v1815_v0  ;;  %v3282_v1 = vpop.f32.mrb[33].mxu1 }
0x21b5   :  { %3576 = vtanh.f32 %v2329_v6  ;;  %v2924_v7 = vmul.f32 -1.442695, %v2329_v6 }
0x21b7   :  { %3578 = vpow2.f32 %v2924_v7  ;;  %v2668_v7 = vld [vmem:[#allocation2] sm:$0xff] }
0x21bf   :  { %v3577_v16 = vpop.eup %3576 }
0x21c0   :  { %2339 = vrot.lane.b32.xlu1 %v3577_v16, %s3696_s17 }
0x21c1   :  { %v3579_v8 = vpop.eup %3578 }
0x21c2   :  { %v2333_v60 = vadd.f32 1.0, %v3579_v8  ;;  %v2931_v8 = vld [vmem:[%s4467_s13] ss:$0 sm:$0xff]  ;;  %s3699_s13 = smov [#allocation8]  }
0x21c3   :  { %s2846_s26 = sshll.u32 %s3699_s13, 4  ;;  %s2847_s26 = int_to_ptr.vmem [resolvable:$true] %s2846_s26 }
0x21c4   :  { %3580 = vrcp.f32 %v2333_v60  ;;  %v2683_v60 = vmul.f32 %v2931_v8, %v2668_v7  ;;  %s3663_s6 = scalar_lea.vmem %s2847_s26, 128  ;;  %p3668_p9 = scmp.lt.s32.totalorder %s2847_s26, %s2847_s26 }
0x21c5   :  { %p3664_p8 = scmp.ne.s32.totalorder %s2847_s26, %s3663_s6  ;;  %p3669_p10 = scmp.lt.s32.totalorder %s3663_s6, %s3663_s6 }
0x21c7   :  { %p3670_p11 = por %p3669_p10, %p3668_p9 }
0x21c9   :  { %p3671_p12 = pnand %p3670_p11, %p3664_p8 }
0x21ce   :  { %v3581_v47 = vpop.eup %3580 }
0x21cf   :  { %v2337_v17 = vmul.f32 %v3581_v47, %v2244_v2 }
0x2232   :  { %v2340_v10 = vpop.permute.xlu1 %2339 }
0x2233   :  { %v2342_v11 = vmul.f32 %v3581_v47, %v2340_v10  ;;  %v2691_v10 = vsel %vm86_vm2, %v2683_v60, 0.0 }
0x2235   :  { %2344 = vrot.lane.b32.xlu0 %v2342_v11, %s3697_s2 }
0x22a7   :  { %v2345_v20 = vpop.permute.xlu0 %2344 }
0x22a8   :  { %v2347_v57 = vadd.f32 %v2345_v20, %v2337_v17 }
0x22aa   :  { %3582 = vtanh.f32 %v2347_v57 }
0x22b4   :  { %v3583_v21 = vpop.eup %3582 }
0x22b5   :  { %2350 = vrot.lane.b32.xlu1 %v3583_v21, %s3696_s17 }
0x2327   :  { %v2351_v43 = vpop.permute.xlu1 %2350 }
0x2328   :  { %v2353_v35 = vmul.f32 %v3581_v47, %v2351_v43  ;;  %v2671_v47 = vld [vmem:[#allocation2 + $0x18] sm:$0xff]  ;;  %v3698_v43 = vmov 0  }
0x2329   :  { %v2686_v11 = vmul.f32 %v2931_v8, %v2671_v47  ;;  %3447 = vset.pattern.permute.xlu0 %v3698_v43 }
0x232a   :  { %2355 = vrot.lane.b32.xlu0 %v2353_v35, %s3697_s2 }
0x232b   :  { %v2700_v20 = vsel %vm86_vm2, %v2686_v11, 0.0 }
0x239c   :  { %v2356_v22 = vpop.permute.xlu0 %2355 }
0x239d   :  { %2358 = vst.msk [vmem:[#allocation2 + $0x20] sm:$0xff] %vm86_vm2, %v2356_v22  ;;  %3292 = vmatmul.mubr.msk.f32.vlgmr.msra.gmra.mrb[24].mxu0 %vm86_vm2, %v2356_v22 }
0x239e   :  { %3432 = vmatpush3.bf16.msra.mxu0 %v4294_v13  ;;  %3313 = vmatprep.mubr.msk.f32.mxu0 %vm3694_vm4, %v3695_v24 }
0x239f   :  { %3433 = vmatprep.subr.bf16.mxu0 %v3692_v50 }
0x23a2   :  { %3435 = vmatpush3.bf16.msra.mxu0 %v4298_v23 }
0x2470   :  { %v2428_v14 = vpop.f32.mrb[24].mxu0 }
0x2471   :  { %v2432_v28 = vadd.f32 %v2428_v14, %v1820_v26  ;;  %v3293_v29 = vpop.f32.mrb[25].mxu0  ;;  %v2669_v26 = vld [vmem:[#allocation2 + $0x8] sm:$0xff] }
0x2472   :  { %v2684_v14 = vmul.f32 %v2931_v8, %v2669_v26 }
0x2473   :  { %3584 = vtanh.f32 %v2432_v28  ;;  %v2926_v33 = vmul.f32 -1.442695, %v2432_v28  ;;  %v2670_v28 = vld [vmem:[#allocation2 + $0x10] sm:$0xff] }
0x2474   :  { %v2694_v29 = vsel %vm86_vm2, %v2684_v14, 0.0 }
0x2475   :  { %3586 = vpow2.f32 %v2926_v33  ;;  %v2672_v33 = vld [vmem:[#allocation2 + $0x20] sm:$0xff] }
0x247d   :  { %v3585_v30 = vpop.eup %3584 }
0x247e   :  { %2442 = vrot.lane.b32.xlu1 %v3585_v30, %s3696_s17  ;;  %v2685_v30 = vmul.f32 %v2931_v8, %v2670_v28 }
0x247f   :  { %v3587_v13 = vpop.eup %3586 }
0x2480   :  { %v2436_v31 = vadd.f32 1.0, %v3587_v13  ;;  %v2697_v13 = vsel %vm86_vm2, %v2685_v30, 0.0 }
0x2482   :  { %3588 = vrcp.f32 %v2436_v31  ;;  %v2687_v31 = vmul.f32 %v2931_v8, %v2672_v33 }
0x248c   :  { %v3589_v24 = vpop.eup %3588 }
0x248d   :  { %v2440_v23 = vmul.f32 %v3589_v24, %v2347_v57 }
0x24f0   :  { %v2443_v56 = vpop.permute.xlu1 %2442 }
0x24f1   :  { %v2445_v50 = vmul.f32 %v3589_v24, %v2443_v56  ;;  %v2703_v56 = vsel %vm86_vm2, %v2687_v31, 0.0 }
0x24f3   :  { %2447 = vrot.lane.b32.xlu0 %v2445_v50, %s3697_s2 }
0x2565   :  { %v2448_v15 = vpop.permute.xlu0 %2447 }
0x2566   :  { %v2450_v38 = vadd.f32 %v2448_v15, %v2440_v23  ;;  %v2932_v15 = vld [vmem:[#allocation4] ss:$0 sm:$0xff] }
0x2568   :  { %3590 = vtanh.f32 %v2450_v38 }
0x2572   :  { %v3591_v32 = vpop.eup %3590 }
0x2573   :  { %2453 = vrot.lane.b32.xlu1 %v3591_v32, %s3696_s17 }
0x25e5   :  { %v2454_v5 = vpop.permute.xlu1 %2453 }
0x25e6   :  { %v2456_v34 = vmul.f32 %v3589_v24, %v2454_v5 }
0x25e8   :  { %2458 = vrot.lane.b32.xlu0 %v2456_v34, %s3697_s2 }
0x265a   :  { %v2459_v25 = vpop.permute.xlu0 %2458 }
0x265b   :  { %2461 = vst.msk [vmem:[#allocation2 + $0x28] sm:$0xff] %vm86_vm2, %v2459_v25  ;;  %3303 = vmatmul.mubr.msk.f32.vlgmr.msra.gmra.mrb[34].mxu1 %vm86_vm2, %v2459_v25 }
0x2662   :  { %v2673_v17 = vld [vmem:[#allocation2 + $0x28] sm:$0xff] }
0x2663   :  { %v2688_v57 = vmul.f32 %v2931_v8, %v2673_v17 }
0x2665   :  { %v2706_v21 = vsel %vm86_vm2, %v2688_v57, 0.0 }
0x272e   :  { %v2531_v12 = vpop.f32.mrb[34].mxu1 }
0x272f   :  { %v2535_v18 = vadd.f32 %v2531_v12, %v1825_v37  ;;  %v3304_v36 = vpop.f32.mrb[35].mxu1 }
0x2731   :  { %3592 = vtanh.f32 %v2535_v18  ;;  %v2928_v9 = vmul.f32 -1.442695, %v2535_v18 }
0x2733   :  { %3594 = vpow2.f32 %v2928_v9 }
0x273b   :  { %v3593_v44 = vpop.eup %3592 }
0x273c   :  { %2545 = vrot.lane.b32.xlu1 %v3593_v44, %s3696_s17 }
0x273d   :  { %v3595_v45 = vpop.eup %3594 }
0x273e   :  { %v2539_v46 = vadd.f32 1.0, %v3595_v45 }
0x2740   :  { %3596 = vrcp.f32 %v2539_v46 }
0x274a   :  { %v3597_v42 = vpop.eup %3596 }
0x274b   :  { %v2543_v51 = vmul.f32 %v3597_v42, %v2450_v38 }
0x27ae   :  { %v2546_v48 = vpop.permute.xlu1 %2545 }
0x27af   :  { %v2548_v52 = vmul.f32 %v3597_v42, %v2546_v48 }
0x27b1   :  { %2550 = vrot.lane.b32.xlu0 %v2548_v52, %s3697_s2 }
0x2823   :  { %v2551_v53 = vpop.permute.xlu0 %2550 }
0x2824   :  { %v2553_v39 = vadd.f32 %v2551_v53, %v2543_v51 }
0x2826   :  { %3598 = vtanh.f32 %v2553_v39 }
0x2830   :  { %v3599_v59 = vpop.eup %3598 }
0x2831   :  { %2556 = vrot.lane.b32.xlu1 %v3599_v59, %s3696_s17 }
0x28a3   :  { %v2557_v41 = vpop.permute.xlu1 %2556 }
0x28a4   :  { %v2559_v55 = vmul.f32 %v3597_v42, %v2557_v41 }
0x28a6   :  { %2561 = vrot.lane.b32.xlu0 %v2559_v55, %s3697_s2 }
0x2918   :  { %v2562_v58 = vpop.permute.xlu0 %2561 }
0x2919   :  { %2564 = vst.msk [vmem:[#allocation2 + $0x30] sm:$0xff] %vm86_vm2, %v2562_v58  ;;  %3314 = vmatmul.mubr.msk.f32.vlgmr.msra.gmra.mrb[26].mxu0 %vm86_vm2, %v2562_v58 }
0x2920   :  { %v2674_v24 = vld [vmem:[#allocation2 + $0x30] sm:$0xff] }
0x2921   :  { %v2689_v50 = vmul.f32 %v2931_v8, %v2674_v24 }
0x2923   :  { %v2709_v23 = vsel %vm86_vm2, %v2689_v50, 0.0 }
0x29ec   :  { %v2634_v62 = vpop.f32.mrb[26].mxu0 }
0x29ed   :  { %v2638_v49 = vadd.f32 %v2634_v62, %v1830_v54  ;;  %v3315_v2 = vpop.f32.mrb[27].mxu0 }
0x29ef   :  { %3600 = vtanh.f32 %v2638_v49  ;;  %v2930_v40 = vmul.f32 -1.442695, %v2638_v49 }
0x29f1   :  { %3602 = vpow2.f32 %v2930_v40 }
0x29f9   :  { %v3601_v63 = vpop.eup %3600 }
0x29fa   :  { %2648 = vrot.lane.b32.xlu1 %v3601_v63, %s3696_s17 }
0x29fb   :  { %v3603_v3 = vpop.eup %3602 }
0x29fc   :  { %v2642_v4 = vadd.f32 1.0, %v3603_v3 }
0x29fe   :  { %3604 = vrcp.f32 %v2642_v4 }
0x2a08   :  { %v3605_v0 = vpop.eup %3604 }
0x2a09   :  { %v2646_v1 = vmul.f32 %v3605_v0, %v2553_v39 }
0x2a6c   :  { %v2649_v27 = vpop.permute.xlu1 %2648 }
0x2a6d   :  { %v2651_v6 = vmul.f32 %v3605_v0, %v2649_v27 }
0x2a6f   :  { %2653 = vrot.lane.b32.xlu0 %v2651_v6, %s3697_s2  ;;  %v2789_v6 = vlaneseq }
0x2a71   :  { %v2792_v60 = vshrl.u32 %v2789_v6, 7 }
0x2ae1   :  { %v2654_v16 = vpop.permute.xlu0 %2653 }
0x2ae2   :  { %v2656_v61 = vadd.f32 %v2654_v16, %v2646_v1 }
0x2ae4   :  { %3606 = vtanh.f32 %v2656_v61 }
0x2aee   :  { %v3607_v19 = vpop.eup %3606 }
0x2aef   :  { %2659 = vrot.lane.b32.xlu1 %v3607_v19, %s3696_s17 }
0x2b13   :  { %2692 = vadd.xlane.f32.xlu1 %v2691_v10 }
0x2b17   :  { %2701 = vadd.xlane.f32.xlu1 %v2700_v20 }
0x2b1b   :  { %2707 = vadd.xlane.f32.xlu1 %v2706_v21 }
0x2b61   :  { %v2660_v35 = vpop.permute.xlu1 %2659 }
0x2b62   :  { %v2662_v22 = vmul.f32 %v3605_v0, %v2660_v35 }
0x2b64   :  { %2664 = vrot.lane.b32.xlu0 %v2662_v22, %s3697_s2 }
0x2b83   :  { %2695 = vadd.xlane.f32.xlu0 %v2694_v29 }
0x2b87   :  { %2698 = vadd.xlane.f32.xlu0 %v2697_v13 }
0x2b8b   :  { %2704 = vadd.xlane.f32.xlu0 %v2703_v56 }
0x2b8f   :  { %2710 = vadd.xlane.f32.xlu0 %v2709_v23 }
0x2ba0   :  { %v2693_v44 = vpop.xlane.xlu1 %2692 }
0x2ba4   :  { %v2702_v52 = vpop.xlane.xlu1 %2701 }
0x2ba5   :  { %2722 = vperm.xlu0 %3447, %v2932_v15  }
0x2ba8   :  { %v2708_v41 = vpop.xlane.xlu1 %2707 }
0x2bd6   :  { %v2665_v38 = vpop.permute.xlu0 %2664 }
0x2bd7   :  { %2667 = vst.msk [vmem:[#allocation2 + $0x38] sm:$0xff] %vm86_vm2, %v2665_v38 }
0x2bde   :  { %v2675_v32 = vld [vmem:[#allocation2 + $0x38] sm:$0xff] }
0x2bdf   :  { %v2690_v5 = vmul.f32 %v2931_v8, %v2675_v32  ;;  %v2790_v8 = vand.u32 127, %v2789_v6 }
0x2be1   :  { %v2712_v34 = vsel %vm86_vm2, %v2690_v5, 0.0  ;;  %v2793_v20 = vsub.s32 %v2790_v8, %v2792_v60 }
0x2be2   :  { %2713 = vadd.xlane.f32.xlu1 %v2712_v34 }
0x2c10   :  { %v2696_v25 = vpop.xlane.xlu0 %2695 }
0x2c14   :  { %v2699_v37 = vpop.xlane.xlu0 %2698 }
0x2c18   :  { %v2705_v12 = vpop.xlane.xlu0 %2704 }
0x2c1c   :  { %v2711_v18 = vpop.xlane.xlu0 %2710 }
0x2c24   :  { %v2723_v36 = vpop.permute.xlu0 %2722 }
0x2c25   :  { %v2725_v9 = vadd.f32 %v2723_v36, %v2693_v44  ;;  %v2726_v45 = vadd.f32 %v2723_v36, %v2696_v25  ;;  %v2727_v46 = vadd.f32 %v2723_v36, %v2699_v37  ;;  %v2728_v53 = vadd.f32 %v2723_v36, %v2702_v52 }
0x2c26   :  { %v2729_v39 = vadd.f32 %v2723_v36, %v2705_v12  ;;  %v2730_v55 = vadd.f32 %v2723_v36, %v2708_v41  ;;  %v2731_v58 = vadd.f32 %v2723_v36, %v2711_v18 }
0x2c27   :  { %v2933_v42 = vmul.f32 -1.442695, %v2725_v9  ;;  %v2934_v48 = vmul.f32 -1.442695, %v2726_v45  ;;  %v2935_v51 = vmul.f32 -1.442695, %v2727_v46 }
0x2c28   :  { %v2936_v59 = vmul.f32 -1.442695, %v2728_v53  ;;  %v2937_v54 = vmul.f32 -1.442695, %v2729_v39  ;;  %v2938_v2 = vmul.f32 -1.442695, %v2730_v55 }
0x2c29   :  { %3608 = vpow2.f32 %v2933_v42  ;;  %v2939_v63 = vmul.f32 -1.442695, %v2731_v58 }
0x2c2a   :  { %3610 = vpow2.f32 %v2934_v48 }
0x2c2b   :  { %3612 = vpow2.f32 %v2935_v51 }
0x2c2c   :  { %3614 = vpow2.f32 %v2936_v59 }
0x2c2d   :  { %3616 = vpow2.f32 %v2937_v54 }
0x2c2e   :  { %3618 = vpow2.f32 %v2938_v2 }
0x2c2f   :  { %3620 = vpow2.f32 %v2939_v63 }
0x2c33   :  { %v3609_v62 = vpop.eup %3608 }
0x2c34   :  { %v3611_v49 = vpop.eup %3610  ;;  %v2757_v40 = vadd.f32 1.0, %v3609_v62 }
0x2c35   :  { %v3613_v3 = vpop.eup %3612  ;;  %v2758_v4 = vadd.f32 1.0, %v3611_v49 }
0x2c36   :  { %v2759_v0 = vadd.f32 1.0, %v3613_v3  ;;  %3622 = vrcp.f32 %v2757_v40  ;;  %v3615_v27 = vpop.eup %3614 }
0x2c37   :  { %3624 = vrcp.f32 %v2758_v4  ;;  %v3617_v61 = vpop.eup %3616  ;;  %v2760_v19 = vadd.f32 1.0, %v3615_v27 }
0x2c38   :  { %3626 = vrcp.f32 %v2759_v0  ;;  %v3619_v47 = vpop.eup %3618  ;;  %v2761_v10 = vadd.f32 1.0, %v3617_v61 }
0x2c39   :  { %v3621_v11 = vpop.eup %3620  ;;  %v2762_v21 = vadd.f32 1.0, %v3619_v47 }
0x2c3a   :  { %v2763_v35 = vadd.f32 1.0, %v3621_v11 }
0x2c40   :  { %v3623_v17 = vpop.eup %3622 }
0x2c41   :  { %v3625_v57 = vpop.eup %3624  ;;  %v2794_v22 = vrot.slane %v3623_v17, %v2793_v20 }
0x2c42   :  { %v3627_v43 = vpop.eup %3626  ;;  %v2798_v26 = vrot.slane %v3625_v57, %v2793_v20 }
0x2c43   :  { %v2802_v14 = vrot.slane %v3627_v43, %v2793_v20 }
0x2c44   :  { %v2824_v29 = vsel %vm2823_vm5, %v2798_v26, %v2794_v22 }
0x2c45   :  { %v2826_v13 = vsel %vm2825_vm6, %v2802_v14, %v2824_v29 }
0x2c6f   :  { %v2714_v1 = vpop.xlane.xlu1 %2713 }
0x2c70   :  { %v2732_v16 = vadd.f32 %v2723_v36, %v2714_v1 }
0x2c72   :  { %v2940_v7 = vmul.f32 -1.442695, %v2732_v16 }
0x2c74   :  { %3628 = vpow2.f32 %v2940_v7 }
0x2c75   :  { %3630 = vrcp.f32 %v2760_v19 }
0x2c76   :  { %3632 = vrcp.f32 %v2761_v10 }
0x2c77   :  { %3634 = vrcp.f32 %v2762_v21 }
0x2c78   :  { %3636 = vrcp.f32 %v2763_v35 }
0x2c7e   :  { %v3629_v28 = vpop.eup %3628 }
0x2c7f   :  { %v3631_v30 = vpop.eup %3630  ;;  %v2764_v33 = vadd.f32 1.0, %v3629_v28 }
0x2c80   :  { %v3633_v31 = vpop.eup %3632  ;;  %v2806_v24 = vrot.slane %v3631_v30, %v2793_v20 }
0x2c81   :  { %3638 = vrcp.f32 %v2764_v33  ;;  %v3635_v50 = vpop.eup %3634  ;;  %v2810_v23 = vrot.slane %v3633_v31, %v2793_v20 }
0x2c82   :  { %v2828_v56 = vsel %vm2827_vm7, %v2806_v24, %v2826_v13  ;;  %v3637_v38 = vpop.eup %3636  ;;  %v2814_v32 = vrot.slane %v3635_v50, %v2793_v20 }
0x2c83   :  { %v2830_v15 = vsel %vm2829_vm8, %v2810_v23, %v2828_v56  ;;  %v2818_v25 = vrot.slane %v3637_v38, %v2793_v20 }
0x2c84   :  { %v2832_v5 = vsel %vm2831_vm9, %v2814_v32, %v2830_v15 }
0x2c85   :  { %v2834_v12 = vsel %vm2833_vm10, %v2818_v25, %v2832_v5 }
0x2c8b   :  { %v3639_v34 = vpop.eup %3638 }
0x2c8c   :  { %v2822_v37 = vrot.slane %v3639_v34, %v2793_v20 }
0x2c8e   :  { %v2836_v18 = vsel %vm2835_vm11, %v2822_v37, %v2834_v12 }
0x2c8f   :  { %2839 = vst.msk [vmem:[#allocation8] sm:$0xff] %vm2838_vm12, %v2836_v18 }
0x2c90   :  { %3674 = shalt.err (!%p3671_p12)
}
0x2c91   :  { %s3675_s14 = scalar_lea.hbm %s4469_s15, 128 }
0x2c92   :  { %p3676_p13 = scmp.ne.s32.totalorder %s4469_s15, %s3675_s14  ;;  %p3679_p0 = scmp.lt.u32.totalorder %s3675_s14, %s4469_s15 }
0x2c94   :  { %p3681_p1 = pnand %p3679_p0, %p3676_p13 }
0x2c96   :  { %3684 = shalt.err (!%p3681_p1)
}
0x2c97   :  { %2849 = dma.vmem_to_hbm [thread:$0]  %s2847_s26, 128, %s4469_s15, [#allocation7]  }
0x2c98   :  { %3687 = dma.done.wait [#allocation7], 128  }
0x2c99   :  { %3688 = vsyncadd [#allocation7], 4294967168 }
0x2c9a   :  { %2853 = vsyncpa [#allocation6], 1 }
0x2c9b   :  { %2854 = vsyncpa [#allocation7], 1 }

</bundles_post_ra>
